<compile_context>
chip_gen: v7x
topology: tpu7x:2x2x1
jax: 0.10.0
libtpu: 0.0.40
codegen_flags: <defaults>
</compile_context>

<pallas_src>
import math

import jax
import jax.numpy as jnp
from jax import lax
from jax.experimental import pallas as pl
from jax.experimental.pallas import tpu as pltpu


def _round_up(x, m):
    return ((x + m - 1) // m) * m


def multdae_fwd_kernel(
    x_ref, tgt_ref,
    e0w_ref, e0b_ref, e1w_ref, e1b_ref,
    dp0w_ref, dp0b_ref, d1w_ref, d1b_ref,
    p1w_ref, p1b_ref,
    probs_ref, loss_ref, zproj_ref,
):
    """Processes one [TM, :] batch tile of the MultDAE eval-mode forward pass."""
    dfac = d1w_ref.shape[0]

    # x is bf16 (exact for 0/1 interaction indicators).
    x = x_ref[...]
    xf = x.astype(jnp.float32)
    norm_sq = jnp.sum(xf * xf, axis=1, keepdims=True)
    inv_norm = lax.rsqrt(jnp.maximum(norm_sq, 1e-24))  # == 1 / max(||x||, 1e-12), EUP slot

    # F.dropout(..., training=False) is identity.
    # TODO(synk): training-mode dropout (p = 1 - keep) not implemented; eval path only.

    def mm(a_bf16, w_ref):
        # bf16 MXU inputs, f32 accumulation.
        return jnp.dot(a_bf16, w_ref[...], preferred_element_type=jnp.float32)

    # encoder: Linear(n_items, dfac) -> Tanh -> Linear(dfac, dfac)
    # Row L2-normalize commuted past the first matmul (diag row-scale commutes with
    # right-multiplication), so only the [TM, dfac] result is scaled.
    h = jnp.tanh(mm(x, e0w_ref) * inv_norm + e0b_ref[...])
    h = mm(h.astype(jnp.bfloat16), e1w_ref) + e1b_ref[...]
    h_bf = h.astype(jnp.bfloat16)  # single cast, shared by the fused dec0/proj0 matmul

    # Fused decoder-layer-0 | proj-head-layer-0: [TM, dfac] @ [dfac, dfac + proj_hid]
    dp = mm(h_bf, dp0w_ref) + dp0b_ref[...]
    d = jnp.tanh(dp[:, :dfac])                 # decoder hidden (tanh)
    p = jnp.maximum(dp[:, dfac:], 0.0)         # proj-head hidden (relu)

    # decoder output: Linear(dfac, n_items)
    probs = mm(d.astype(jnp.bfloat16), d1w_ref) + d1b_ref[...]
    probs_ref[...] = probs.astype(probs_ref.dtype)

    # Loss: sum(-log_softmax(probs) * tgt) = lse * sum(tgt) - sum(probs * tgt).
    # No [TM, n_items] logits slab is materialized.
    # TODO(synk): for very large n_items (>~8-16k on v7x), block the items axis and
    # use an online log-softmax instead of holding full [TM, n_items] slabs in VMEM.
    m = jnp.max(probs, axis=1, keepdims=True)
    lse = m + jnp.log(jnp.sum(jnp.exp(probs - m), axis=1, keepdims=True))
    tgt = tgt_ref[...].astype(jnp.float32)
    tgt_sum = jnp.sum(tgt, axis=1, keepdims=True)
    probs_dot_tgt = jnp.sum(probs * tgt, axis=1, keepdims=True)
    loss_ref[...] = lse * tgt_sum - probs_dot_tgt

    # proj_head output: Linear(proj_hid, proj_hid)
    z = mm(p.astype(jnp.bfloat16), p1w_ref) + p1b_ref[...]
    zproj_ref[...] = z.astype(zproj_ref.dtype)


def prepare_params(params):
    """One-time param prep: bf16 weights, fused dec0|proj0 weight/bias. Biases stay f32."""
    wd = jnp.bfloat16
    return {
        "e0w": params["e0w"].astype(wd), "e0b": params["e0b"],
        "e1w": params["e1w"].astype(wd), "e1b": params["e1b"],
        "dp0w": jnp.concatenate([params["d0w"], params["p0w"]], axis=1).astype(wd),
        "dp0b": jnp.concatenate([params["d0b"], params["p0b"]], axis=1),
        "d1w": params["d1w"].astype(wd), "d1b": params["d1b"],
        "p1w": params["p1w"].astype(wd), "p1b": params["p1b"],
    }


def multdae_forward(x, output, prepared, *, tile_m=128, probs_dtype=jnp.bfloat16):
    """x, output: [B, n_items]. prepared: output of prepare_params (bf16 weights)."""
    B, n_items = x.shape
    dfac = prepared["e0w"].shape[1]
    proj_hid = prepared["p1w"].shape[1]

    # Inputs feed the kernel in bf16 (exact for 0/1 indicators, halves input HBM bytes).
    if x.dtype != jnp.bfloat16:
        x = x.astype(jnp.bfloat16)
    if output.dtype != jnp.bfloat16:
        output = output.astype(jnp.bfloat16)

    # Batch tile: multiple of 8 (sublane). Default 128 fills MXU rows; sweep 256/512 on
    # v6e for large B, but keep >= 2 grid steps so the parallel axis shards across cores.
    tm = min(_round_up(tile_m, 8), _round_up(B, 8))
    B_pad = _round_up(B, tm)
    if B_pad != B:
        pad = ((0, B_pad - B), (0, 0))
        x = jnp.pad(x, pad)
        output = jnp.pad(output, pad)
    grid = (B_pad // tm,)

    args = (
        x, output,
        prepared["e0w"], prepared["e0b"],
        prepared["e1w"], prepared["e1b"],
        prepared["dp0w"], prepared["dp0b"],
        prepared["d1w"], prepared["d1b"],
        prepared["p1w"], prepared["p1b"],
    )

    row = lambda i: (i, 0)      # batch-tiled activations
    const = lambda i: (0, 0)    # weights/biases: VMEM-resident across all grid steps
    fused = dfac + proj_hid

    # TODO(synk): mark the constant-index weight specs pipeline_mode=pl.Buffered(1) to
    # drop their second VMEM buffer when n_items makes e0w/d1w large.
    in_specs = [
        pl.BlockSpec((tm, n_items), row),              # x (bf16)
        pl.BlockSpec((tm, n_items), row),              # output / target (bf16)
        pl.BlockSpec((n_items, dfac), const),  pl.BlockSpec((1, dfac), const),       # enc 0
        pl.BlockSpec((dfac, dfac), const),     pl.BlockSpec((1, dfac), const),       # enc 1
        pl.BlockSpec((dfac, fused), const),    pl.BlockSpec((1, fused), const),      # dec0|proj0 fused
        pl.BlockSpec((dfac, n_items), const),  pl.BlockSpec((1, n_items), const),    # dec 1
        pl.BlockSpec((proj_hid, proj_hid), const), pl.BlockSpec((1, proj_hid), const),  # proj 1
    ]
    out_specs = (
        pl.BlockSpec((tm, n_items), row),              # probs
        pl.BlockSpec((tm, 1), row),                    # per-row loss partials
        pl.BlockSpec((tm, proj_hid), row),             # z_proj
    )
    out_shape = (
        jax.ShapeDtypeStruct((B_pad, n_items), probs_dtype),
        jax.ShapeDtypeStruct((B_pad, 1), jnp.float32),
        jax.ShapeDtypeStruct((B_pad, proj_hid), jnp.float32),
    )

    # Rough VMEM budget: resident (double-buffer-counted) bf16 weights + pipelined
    # activation tiles + in-kernel f32 slab temporaries; capped generation-aware.
    probs_itemsize = jnp.dtype(probs_dtype).itemsize
    w_elems = (n_items * dfac + dfac * dfac + dfac * fused
               + dfac * n_items + proj_hid * proj_hid)
    w_bytes = 2 * 2 * w_elems
    b_bytes = 2 * 4 * (2 * dfac + fused + n_items + proj_hid)
    act_bytes = 2 * tm * (2 * 2 * n_items + probs_itemsize * n_items + 4 * proj_hid + 4)
    tmp_bytes = 4 * tm * n_items * 4
    needed = w_bytes + b_bytes + act_bytes + tmp_bytes
    try:
        phys_vmem = int(pltpu.get_tpu_info().vmem_capacity_bytes)
    except Exception:
        phys_vmem = 64 * 2 ** 20  # conservative (v7x per-TC VMEM)
    vmem_cap = int(0.8 * phys_vmem)
    vmem_limit = int(min(vmem_cap, max(16 * 2 ** 20, 1.4 * needed)))

    flops = 2 * B_pad * (n_items * dfac + dfac * dfac + dfac * fused
                         + dfac * n_items + proj_hid * proj_hid)
    transcendentals = B_pad * (2 * dfac + n_items + 2)
    bytes_accessed = int(
        2 * B_pad * n_items * 2                                   # bf16 x + target reads
        + B_pad * (n_items * probs_itemsize + proj_hid * 4 + 4)   # outputs
        + w_bytes // 2 + b_bytes // 2                             # params read once
    )

    probs, per_row_loss, z_proj = pl.pallas_call(
        multdae_fwd_kernel,
        out_shape=out_shape,
        grid_spec=pltpu.PrefetchScalarGridSpec(
            num_scalar_prefetch=0,
            grid=grid,
            in_specs=in_specs,
            out_specs=out_specs,
        ),
        compiler_params=pltpu.CompilerParams(
            dimension_semantics=("parallel",),
            vmem_limit_bytes=vmem_limit,
        ),
        cost_estimate=pl.CostEstimate(
            flops=flops,
            transcendentals=transcendentals,
            bytes_accessed=bytes_accessed,
        ),
    )(*args)

    recon_loss = jnp.sum(per_row_loss[:B, 0]) / B
    return probs[:B], recon_loss, z_proj[:B]


# ----------------------------- parameter init (matches PyTorch inits) -----------------------------

def xavier_uniform(key, fan_in, fan_out):
    # Generated directly as [in, out] (symmetric distribution, shape-transposed vs PyTorch).
    bound = math.sqrt(6.0 / (fan_in + fan_out))
    return jax.random.uniform(key, (fan_in, fan_out), jnp.float32, -bound, bound)


def trunc_normal_bias(key, dim, std=0.001):
    # nn.init.trunc_normal_(bias, std=0.001): N(0, std) truncated to [-2, 2] (absolute).
    return jax.random.truncated_normal(key, -2.0 / std, 2.0 / std, (1, dim), jnp.float32) * std


def init_params(key, n_items, dfac, proj_hid):
    ks = jax.random.split(key, 10)
    return {
        # encoder
        "e0w": xavier_uniform(ks[0], n_items, dfac), "e0b": trunc_normal_bias(ks[1], dfac),
        "e1w": xavier_uniform(ks[2], dfac, dfac),    "e1b": trunc_normal_bias(ks[3], dfac),
        # decoder
        "d0w": xavier_uniform(ks[4], dfac, dfac),    "d0b": trunc_normal_bias(ks[5], dfac),
        "d1w": xavier_uniform(ks[6], dfac, n_items), "d1b": trunc_normal_bias(ks[7], n_items),
        # proj_head (biases zero-initialized in the module)
        "p0w": xavier_uniform(ks[8], dfac, proj_hid), "p0b": jnp.zeros((1, proj_hid), jnp.float32),
        "p1w": xavier_uniform(ks[9], proj_hid, proj_hid), "p1b": jnp.zeros((1, proj_hid), jnp.float32),
    }


def multdae_reference(x, output, params):
    """Pure-JAX f32 reference of the eval-mode forward (for tolerance checking)."""
    norm = jnp.sqrt(jnp.sum(x * x, axis=1, keepdims=True))
    h = x / jnp.maximum(norm, 1e-12)
    h = jnp.tanh(h @ params["e0w"] + params["e0b"])
    h = h @ params["e1w"] + params["e1b"]
    d = jnp.tanh(h @ params["d0w"] + params["d0b"])
    probs = d @ params["d1w"] + params["d1b"]
    logits = jax.nn.log_softmax(probs, axis=1)
    recon_loss = jnp.mean(jnp.sum(-logits * output, axis=-1))
    p = jnp.maximum(h @ params["p0w"] + params["p0b"], 0.0)
    z = p @ params["p1w"] + params["p1b"]
    return probs, recon_loss, z


if __name__ == "__main__":
    # Small but lane-dense shapes: dfac = proj_hid = 128, n_items = 512, batch of 256
    # tiled into two 128-row grid steps (keeps the parallel axis shardable on 2 cores).
    B, n_items, dfac, proj_hid = 256, 512, 128, 128

    key = jax.random.PRNGKey(0)
    k_in, k_out, k_par = jax.random.split(key, 3)

    # Implicit-feedback style inputs: non-negative 0/1 interaction indicators
    # (bf16 round-trips these values exactly).
    x_bf = jax.random.bernoulli(k_in, 0.1, (B, n_items)).astype(jnp.bfloat16)
    out_bf = jax.random.bernoulli(k_out, 0.1, (B, n_items)).astype(jnp.bfloat16)

    params = init_params(k_par, n_items, dfac, proj_hid)
    prepared = prepare_params(params)  # bf16 weights + fused dec0|proj0, done once

    probs, recon_loss, z_proj = multdae_forward(x_bf, out_bf, prepared, tile_m=128)
    jax.block_until_ready((probs, recon_loss, z_proj))

    assert probs.shape == (B, n_items)
    assert recon_loss.shape == ()
    assert z_proj.shape == (B, proj_hid)
    assert bool(jnp.isfinite(recon_loss))

    # Correctness vs. pure-JAX f32 reference (loose tolerances for bf16 MXU inputs/outputs).
    x_f32 = x_bf.astype(jnp.float32)
    out_f32 = out_bf.astype(jnp.float32)
    ref_probs, ref_loss, ref_z = multdae_reference(x_f32, out_f32, params)
    assert bool(jnp.allclose(probs.astype(jnp.float32), ref_probs,
                             rtol=5e-2, atol=2e-2)), "probs mismatch"
    assert bool(jnp.allclose(recon_loss, ref_loss, rtol=2e-2, atol=1e-2)), "loss mismatch"
    assert bool(jnp.allclose(z_proj, ref_z, rtol=5e-2, atol=2e-2)), "z_proj mismatch"

    print("KERNEL_OK")
</pallas_src>

<mosaic_0001>
module attributes {stable_mosaic.version = 11 : i64} {
  func.func @multdae_fwd_kernel(%arg0: i32, %arg1: memref<128x512xbf16, #tpu.memory_space<vmem>>, %arg2: memref<128x512xbf16, #tpu.memory_space<vmem>>, %arg3: memref<512x128xbf16, #tpu.memory_space<vmem>>, %arg4: memref<1x128xf32, #tpu.memory_space<vmem>>, %arg5: memref<128x128xbf16, #tpu.memory_space<vmem>>, %arg6: memref<1x128xf32, #tpu.memory_space<vmem>>, %arg7: memref<128x256xbf16, #tpu.memory_space<vmem>>, %arg8: memref<1x256xf32, #tpu.memory_space<vmem>>, %arg9: memref<128x512xbf16, #tpu.memory_space<vmem>>, %arg10: memref<1x512xf32, #tpu.memory_space<vmem>>, %arg11: memref<128x128xbf16, #tpu.memory_space<vmem>>, %arg12: memref<1x128xf32, #tpu.memory_space<vmem>>, %arg13: memref<128x512xbf16, #tpu.memory_space<vmem>>, %arg14: memref<128x1xf32, #tpu.memory_space<vmem>>, %arg15: memref<128x128xf32, #tpu.memory_space<vmem>>) attributes {dimension_semantics = [#tpu.dimension_semantics<parallel>], iteration_bounds = array<i64: 2>, scalar_prefetch = 0 : i64, scratch_operands = 0 : i64, tpu.core_type = #tpu.core_type<tc>, window_params = [{transform_indices = @transform_0, window_bounds = array<i64: 128, 512>}, {transform_indices = @transform_1, window_bounds = array<i64: 128, 512>}, {pipeline_mode = #tpu.pipeline_mode<synchronous>, transform_indices = @transform_2, window_bounds = array<i64: 512, 128>}, {pipeline_mode = #tpu.pipeline_mode<synchronous>, transform_indices = @transform_3, window_bounds = array<i64: 1, 128>}, {pipeline_mode = #tpu.pipeline_mode<synchronous>, transform_indices = @transform_4, window_bounds = array<i64: 128, 128>}, {pipeline_mode = #tpu.pipeline_mode<synchronous>, transform_indices = @transform_5, window_bounds = array<i64: 1, 128>}, {pipeline_mode = #tpu.pipeline_mode<synchronous>, transform_indices = @transform_6, window_bounds = array<i64: 128, 256>}, {pipeline_mode = #tpu.pipeline_mode<synchronous>, transform_indices = @transform_7, window_bounds = array<i64: 1, 256>}, {pipeline_mode = #tpu.pipeline_mode<synchronous>, transform_indices = @transform_8, window_bounds = array<i64: 128, 512>}, {pipeline_mode = #tpu.pipeline_mode<synchronous>, transform_indices = @transform_9, window_bounds = array<i64: 1, 512>}, {pipeline_mode = #tpu.pipeline_mode<synchronous>, transform_indices = @transform_10, window_bounds = array<i64: 128, 128>}, {pipeline_mode = #tpu.pipeline_mode<synchronous>, transform_indices = @transform_11, window_bounds = array<i64: 1, 128>}, {transform_indices = @transform_12, window_bounds = array<i64: 128, 512>}, {transform_indices = @transform_13, window_bounds = array<i64: 128, 1>}, {transform_indices = @transform_14, window_bounds = array<i64: 128, 128>}]} {
    %c0 = arith.constant 0 : index
    %c0_0 = arith.constant 0 : index
    %0 = vector.load %arg1[%c0, %c0_0] : memref<128x512xbf16, #tpu.memory_space<vmem>>, vector<128x512xbf16>
    %1 = arith.extf %0 : vector<128x512xbf16> to vector<128x512xf32>
    %2 = arith.mulf %1, %1 : vector<128x512xf32>
    %cst = arith.constant dense<0.000000e+00> : vector<128xf32>
    %3 = vector.multi_reduction <add>, %2, %cst [1] : vector<128x512xf32> to vector<128xf32>
    %4 = vector.shape_cast %3 : vector<128xf32> to vector<128x1xf32>
    %cst_1 = arith.constant 1.000000e-24 : f32
    %5 = vector.broadcast %cst_1 : f32 to vector<128x1xf32>
    %6 = arith.maximumf %4, %5 : vector<128x1xf32>
    %7 = math.rsqrt %6 : vector<128x1xf32>
    %c0_2 = arith.constant 0 : index
    %c0_3 = arith.constant 0 : index
    %8 = vector.load %arg3[%c0_2, %c0_3] : memref<512x128xbf16, #tpu.memory_space<vmem>>, vector<512x128xbf16>
    %cst_4 = arith.constant dense<0.000000e+00> : vector<128x128xf32>
    %9 = tpu.matmul %0, %8, %cst_4 {dimension_numbers = #tpu.dot_dimension_numbers<[1], [0], [0], [1], [0, 0, 1, 1], [], []>} : vector<128x512xbf16>, vector<512x128xbf16>, vector<128x128xf32> -> vector<128x128xf32>
    %10 = vector.broadcast %7 : vector<128x1xf32> to vector<128x128xf32>
    %11 = arith.mulf %9, %10 : vector<128x128xf32>
    %c0_5 = arith.constant 0 : index
    %c0_6 = arith.constant 0 : index
    %12 = vector.load %arg4[%c0_5, %c0_6] : memref<1x128xf32, #tpu.memory_space<vmem>>, vector<1x128xf32>
    %13 = vector.broadcast %12 : vector<1x128xf32> to vector<128x128xf32>
    %14 = arith.addf %11, %13 : vector<128x128xf32>
    %15 = math.tanh %14 : vector<128x128xf32>
    %16 = arith.truncf %15 : vector<128x128xf32> to vector<128x128xbf16>
    %c0_7 = arith.constant 0 : index
    %c0_8 = arith.constant 0 : index
    %17 = vector.load %arg5[%c0_7, %c0_8] : memref<128x128xbf16, #tpu.memory_space<vmem>>, vector<128x128xbf16>
    %cst_9 = arith.constant dense<0.000000e+00> : vector<128x128xf32>
    %18 = tpu.matmul %16, %17, %cst_9 {dimension_numbers = #tpu.dot_dimension_numbers<[1], [0], [0], [1], [0, 0, 1, 1], [], []>} : vector<128x128xbf16>, vector<128x128xbf16>, vector<128x128xf32> -> vector<128x128xf32>
    %c0_10 = arith.constant 0 : index
    %c0_11 = arith.constant 0 : index
    %19 = vector.load %arg6[%c0_10, %c0_11] : memref<1x128xf32, #tpu.memory_space<vmem>>, vector<1x128xf32>
    %20 = vector.broadcast %19 : vector<1x128xf32> to vector<128x128xf32>
    %21 = arith.addf %18, %20 : vector<128x128xf32>
    %22 = arith.truncf %21 : vector<128x128xf32> to vector<128x128xbf16>
    %c0_12 = arith.constant 0 : index
    %c0_13 = arith.constant 0 : index
    %23 = vector.load %arg7[%c0_12, %c0_13] : memref<128x256xbf16, #tpu.memory_space<vmem>>, vector<128x256xbf16>
    %cst_14 = arith.constant dense<0.000000e+00> : vector<128x256xf32>
    %24 = tpu.matmul %22, %23, %cst_14 {dimension_numbers = #tpu.dot_dimension_numbers<[1], [0], [0], [1], [0, 0, 1, 1], [], []>} : vector<128x128xbf16>, vector<128x256xbf16>, vector<128x256xf32> -> vector<128x256xf32>
    %c0_15 = arith.constant 0 : index
    %c0_16 = arith.constant 0 : index
    %25 = vector.load %arg8[%c0_15, %c0_16] : memref<1x256xf32, #tpu.memory_space<vmem>>, vector<1x256xf32>
    %26 = vector.broadcast %25 : vector<1x256xf32> to vector<128x256xf32>
    %27 = arith.addf %24, %26 : vector<128x256xf32>
    %28 = vector.extract_strided_slice %27 {offsets = [0, 0], sizes = [128, 128], strides = [1, 1]} : vector<128x256xf32> to vector<128x128xf32>
    %29 = math.tanh %28 : vector<128x128xf32>
    %30 = vector.extract_strided_slice %27 {offsets = [0, 128], sizes = [128, 128], strides = [1, 1]} : vector<128x256xf32> to vector<128x128xf32>
    %cst_17 = arith.constant 0.000000e+00 : f32
    %31 = vector.broadcast %cst_17 : f32 to vector<128x128xf32>
    %32 = arith.maximumf %30, %31 : vector<128x128xf32>
    %33 = arith.truncf %29 : vector<128x128xf32> to vector<128x128xbf16>
    %c0_18 = arith.constant 0 : index
    %c0_19 = arith.constant 0 : index
    %34 = vector.load %arg9[%c0_18, %c0_19] : memref<128x512xbf16, #tpu.memory_space<vmem>>, vector<128x512xbf16>
    %cst_20 = arith.constant dense<0.000000e+00> : vector<128x512xf32>
    %35 = tpu.matmul %33, %34, %cst_20 {dimension_numbers = #tpu.dot_dimension_numbers<[1], [0], [0], [1], [0, 0, 1, 1], [], []>} : vector<128x128xbf16>, vector<128x512xbf16>, vector<128x512xf32> -> vector<128x512xf32>
    %c0_21 = arith.constant 0 : index
    %c0_22 = arith.constant 0 : index
    %36 = vector.load %arg10[%c0_21, %c0_22] : memref<1x512xf32, #tpu.memory_space<vmem>>, vector<1x512xf32>
    %37 = vector.broadcast %36 : vector<1x512xf32> to vector<128x512xf32>
    %38 = arith.addf %35, %37 : vector<128x512xf32>
    %39 = arith.truncf %38 : vector<128x512xf32> to vector<128x512xbf16>
    %c0_23 = arith.constant 0 : index
    %c0_24 = arith.constant 0 : index
    %40 = vector.load %arg13[%c0_23, %c0_24] : memref<128x512xbf16, #tpu.memory_space<vmem>>, vector<128x512xbf16>
    tpu.vector_store %arg13[%c0_23, %c0_24], %39 {strides = array<i32>} : memref<128x512xbf16, #tpu.memory_space<vmem>>, vector<128x512xbf16>,
    %cst_25 = arith.constant dense<0xFF800000> : vector<128xf32>
    %41 = vector.multi_reduction <maximumf>, %38, %cst_25 [1] : vector<128x512xf32> to vector<128xf32>
    %42 = vector.shape_cast %41 : vector<128xf32> to vector<128x1xf32>
    %43 = vector.broadcast %42 : vector<128x1xf32> to vector<128x512xf32>
    %44 = arith.subf %38, %43 : vector<128x512xf32>
    %45 = math.exp %44 : vector<128x512xf32>
    %cst_26 = arith.constant dense<0.000000e+00> : vector<128xf32>
    %46 = vector.multi_reduction <add>, %45, %cst_26 [1] : vector<128x512xf32> to vector<128xf32>
    %47 = vector.shape_cast %46 : vector<128xf32> to vector<128x1xf32>
    %48 = math.log %47 : vector<128x1xf32>
    %49 = arith.addf %42, %48 : vector<128x1xf32>
    %c0_27 = arith.constant 0 : index
    %c0_28 = arith.constant 0 : index
    %50 = vector.load %arg2[%c0_27, %c0_28] : memref<128x512xbf16, #tpu.memory_space<vmem>>, vector<128x512xbf16>
    %51 = arith.extf %50 : vector<128x512xbf16> to vector<128x512xf32>
    %cst_29 = arith.constant dense<0.000000e+00> : vector<128xf32>
    %52 = vector.multi_reduction <add>, %51, %cst_29 [1] : vector<128x512xf32> to vector<128xf32>
    %53 = vector.shape_cast %52 : vector<128xf32> to vector<128x1xf32>
    %54 = arith.mulf %38, %51 : vector<128x512xf32>
    %cst_30 = arith.constant dense<0.000000e+00> : vector<128xf32>
    %55 = vector.multi_reduction <add>, %54, %cst_30 [1] : vector<128x512xf32> to vector<128xf32>
    %56 = vector.shape_cast %55 : vector<128xf32> to vector<128x1xf32>
    %57 = arith.mulf %49, %53 : vector<128x1xf32>
    %58 = arith.subf %57, %56 : vector<128x1xf32>
    %c0_31 = arith.constant 0 : index
    %c0_32 = arith.constant 0 : index
    %59 = vector.load %arg14[%c0_31, %c0_32] : memref<128x1xf32, #tpu.memory_space<vmem>>, vector<128x1xf32>
    tpu.vector_store %arg14[%c0_31, %c0_32], %58 {strides = array<i32>} : memref<128x1xf32, #tpu.memory_space<vmem>>, vector<128x1xf32>,
    %60 = arith.truncf %32 : vector<128x128xf32> to vector<128x128xbf16>
    %c0_33 = arith.constant 0 : index
    %c0_34 = arith.constant 0 : index
    %61 = vector.load %arg11[%c0_33, %c0_34] : memref<128x128xbf16, #tpu.memory_space<vmem>>, vector<128x128xbf16>
    %cst_35 = arith.constant dense<0.000000e+00> : vector<128x128xf32>
    %62 = tpu.matmul %60, %61, %cst_35 {dimension_numbers = #tpu.dot_dimension_numbers<[1], [0], [0], [1], [0, 0, 1, 1], [], []>} : vector<128x128xbf16>, vector<128x128xbf16>, vector<128x128xf32> -> vector<128x128xf32>
    %c0_36 = arith.constant 0 : index
    %c0_37 = arith.constant 0 : index
    %63 = vector.load %arg12[%c0_36, %c0_37] : memref<1x128xf32, #tpu.memory_space<vmem>>, vector<1x128xf32>
    %64 = vector.broadcast %63 : vector<1x128xf32> to vector<128x128xf32>
    %65 = arith.addf %62, %64 : vector<128x128xf32>
    %c0_38 = arith.constant 0 : index
    %c0_39 = arith.constant 0 : index
    %66 = vector.load %arg15[%c0_38, %c0_39] : memref<128x128xf32, #tpu.memory_space<vmem>>, vector<128x128xf32>
    tpu.vector_store %arg15[%c0_38, %c0_39], %65 {strides = array<i32>} : memref<128x128xf32, #tpu.memory_space<vmem>>, vector<128x128xf32>,
    return
  }
  func.func @transform_0(%arg0: i32) -> (i32, i32) {
    %c0_i32 = arith.constant 0 : i32
    %c0_i32_0 = arith.constant 0 : i32
    return %arg0, %c0_i32 : i32, i32
  }
  func.func @transform_1(%arg0: i32) -> (i32, i32) {
    %c0_i32 = arith.constant 0 : i32
    %c0_i32_0 = arith.constant 0 : i32
    return %arg0, %c0_i32 : i32, i32
  }
  func.func @transform_2(%arg0: i32) -> (i32, i32) {
    %c0_i32 = arith.constant 0 : i32
    %c0_i32_0 = arith.constant 0 : i32
    %c0_i32_1 = arith.constant 0 : i32
    return %c0_i32, %c0_i32_0 : i32, i32
  }
  func.func @transform_3(%arg0: i32) -> (i32, i32) {
    %c0_i32 = arith.constant 0 : i32
    %c0_i32_0 = arith.constant 0 : i32
    %c0_i32_1 = arith.constant 0 : i32
    return %c0_i32, %c0_i32_0 : i32, i32
  }
  func.func @transform_4(%arg0: i32) -> (i32, i32) {
    %c0_i32 = arith.constant 0 : i32
    %c0_i32_0 = arith.constant 0 : i32
    %c0_i32_1 = arith.constant 0 : i32
    return %c0_i32, %c0_i32_0 : i32, i32
  }
  func.func @transform_5(%arg0: i32) -> (i32, i32) {
    %c0_i32 = arith.constant 0 : i32
    %c0_i32_0 = arith.constant 0 : i32
    %c0_i32_1 = arith.constant 0 : i32
    return %c0_i32, %c0_i32_0 : i32, i32
  }
  func.func @transform_6(%arg0: i32) -> (i32, i32) {
    %c0_i32 = arith.constant 0 : i32
    %c0_i32_0 = arith.constant 0 : i32
    %c0_i32_1 = arith.constant 0 : i32
    return %c0_i32, %c0_i32_0 : i32, i32
  }
  func.func @transform_7(%arg0: i32) -> (i32, i32) {
    %c0_i32 = arith.constant 0 : i32
    %c0_i32_0 = arith.constant 0 : i32
    %c0_i32_1 = arith.constant 0 : i32
    return %c0_i32, %c0_i32_0 : i32, i32
  }
  func.func @transform_8(%arg0: i32) -> (i32, i32) {
    %c0_i32 = arith.constant 0 : i32
    %c0_i32_0 = arith.constant 0 : i32
    %c0_i32_1 = arith.constant 0 : i32
    return %c0_i32, %c0_i32_0 : i32, i32
  }
  func.func @transform_9(%arg0: i32) -> (i32, i32) {
    %c0_i32 = arith.constant 0 : i32
    %c0_i32_0 = arith.constant 0 : i32
    %c0_i32_1 = arith.constant 0 : i32
    return %c0_i32, %c0_i32_0 : i32, i32
  }
  func.func @transform_10(%arg0: i32) -> (i32, i32) {
    %c0_i32 = arith.constant 0 : i32
    %c0_i32_0 = arith.constant 0 : i32
    %c0_i32_1 = arith.constant 0 : i32
    return %c0_i32, %c0_i32_0 : i32, i32
  }
  func.func @transform_11(%arg0: i32) -> (i32, i32) {
    %c0_i32 = arith.constant 0 : i32
    %c0_i32_0 = arith.constant 0 : i32
    %c0_i32_1 = arith.constant 0 : i32
    return %c0_i32, %c0_i32_0 : i32, i32
  }
  func.func @transform_12(%arg0: i32) -> (i32, i32) {
    %c0_i32 = arith.constant 0 : i32
    %c0_i32_0 = arith.constant 0 : i32
    return %arg0, %c0_i32 : i32, i32
  }
  func.func @transform_13(%arg0: i32) -> (i32, i32) {
    %c0_i32 = arith.constant 0 : i32
    %c0_i32_0 = arith.constant 0 : i32
    return %arg0, %c0_i32 : i32, i32
  }
  func.func @transform_14(%arg0: i32) -> (i32, i32) {
    %c0_i32 = arith.constant 0 : i32
    %c0_i32_0 = arith.constant 0 : i32
    return %arg0, %c0_i32 : i32, i32
  }
}

</mosaic_0001>

<bundles_post_ra>
// kernel: tpu_custom_call.1
= control target key start
LH: loop header
LB: loop body
LE: loop exit
PB: predicated region body
PF: predicated region fallthrough
CT: control target
= control target key end

     0   :  { %s7256_s0 = inlined_call_operand.hbm [shape: bf16[256,512], index: 0, kind: input, shape index: {}]   ;;  %s7257_s1 = inlined_call_operand.hbm [shape: bf16[256,512], index: 1, kind: input, shape index: {}]   ;;  %s7258_s2 = inlined_call_operand.hbm [shape: bf16[512,128], index: 2, kind: input, shape index: {}]   ;;  %s7259_s3 = inlined_call_operand.vmem [shape: f32[1,128], index: 3, kind: input, shape index: {}]   ;;  %s7260_s4 = inlined_call_operand.hbm [shape: bf16[128,128], index: 4, kind: input, shape index: {}]   ;;  %s7261_s5 = inlined_call_operand.vmem [shape: f32[1,128], index: 5, kind: input, shape index: {}]   ;;  %s7262_s6 = inlined_call_operand.hbm [shape: bf16[128,256], index: 6, kind: input, shape index: {}]   ;;  %s7263_s7 = inlined_call_operand.vmem [shape: f32[1,256], index: 7, kind: input, shape index: {}]   ;;  %s7264_s8 = inlined_call_operand.hbm [shape: bf16[128,512], index: 8, kind: input, shape index: {}]   ;;  %s7265_s9 = inlined_call_operand.vmem [shape: f32[1,512], index: 9, kind: input, shape index: {}]   ;;  %s7266_s10 = inlined_call_operand.hbm [shape: bf16[128,128], index: 10, kind: input, shape index: {}]   ;;  %s7267_s11 = inlined_call_operand.vmem [shape: f32[1,128], index: 11, kind: input, shape index: {}]   ;;  %s7268_s12 = inlined_call_operand.hbm [shape: bf16[256,512], index: 12, kind: output, shape index: {0}]   ;;  %s7269_s13 = inlined_call_operand.vmem [shape: f32[256,1], index: 13, kind: output, shape index: {1}]   ;;  %s7270_s14 = inlined_call_operand.hbm [shape: f32[256,128], index: 14, kind: output, shape index: {2}]  }
   0x1   :  { %7425 = sst [smem:[#allocation89_spill]] %s7256_s0 }
   0x2   :  { %7426 = sst [smem:[#allocation90_spill]] %s7258_s2 }
   0x3   :  { %7427 = sst [smem:[#allocation91_spill]] %s7260_s4 }
   0x4   :  { %7428 = sst [smem:[#allocation92_spill]] %s7262_s6 }
   0x5   :  { %7429 = sst [smem:[#allocation93_spill]] %s7263_s7 }
   0x6   :  { %7430 = sst [smem:[#allocation94_spill]] %s7264_s8 }
   0x7   :  { %7431 = sst [smem:[#allocation95_spill]] %s7265_s9 }
   0x8   :  { %7432 = sst [smem:[#allocation96_spill]] %s7266_s10 }
   0x9   :  { %7433 = sst [smem:[#allocation97_spill]] %s7267_s11 }
   0xa   :  { %7434 = sst [smem:[#allocation98_spill]] %s7268_s12 }
   0xb   :  { %7435 = sst [smem:[#allocation99_spill]] %s7269_s13 }
   0xc   :  { %7436 = sst [smem:[#allocation100_spill]] %s7270_s14 }
   0xd   :  { %20 = vsyncpa [#allocation3], 0 }
   0xe   :  { %22 = vsyncpa [#allocation3 + $0x1], 0 }
   0xf   :  { %23 = vsyncpa [#allocation6], 0 }
  0x10   :  { %25 = vsyncpa [#allocation6 + $0x1], 0 }
  0x11   :  { %26 = vsyncpa [#allocation9], 0 }
  0x12   :  { %27 = vsyncpa [#allocation12], 0 }
  0x13   :  { %28 = vsyncpa [#allocation4], 0 }
  0x14   :  { %30 = vsyncpa [#allocation4 + $0x1], 0 }
  0x15   :  { %31 = vsyncpa [#allocation16], 0 }
  0x16   :  { %33 = vsyncpa [#allocation16 + $0x1], 0  ;;  %s5281_s29 = smov 0   ;;  %s5283_s30 = smov 0  }
  0x17   :  { %s5285_s15 = smov 0   ;;  %s5287_s16 = smov 0  }
  0x18 LB: > { %s5186_s17 = smov [#allocation7]   ;;  %s5302_s19 = sadd.s32 4294967295, %s5184_s16   ;;  %s5184_s16 = sphi %s5287_s16, %s7754_s16   ;;  %s5180_s15 = sphi %s5285_s15, %s7753_s15   ;;  %s5176_s30 = sphi %s5283_s30, %s7752_s30   ;;  %s5172_s29 = sphi %s5281_s29, %s7751_s29  }
  0x19   : > { %s396_s18 = sshll.u32 %s5186_s17, 4  ;;  %p3882_p0 = scmp.ge.s32.totalorder %s5184_s16, 1  ;;  %s5307_s18 = int_to_ptr.vmem [resolvable:$true] %s396_s18 }
  0x1a   : > { %p7275_p1 = scmp.eq.s32.totalorder %s5302_s19, 0  ;;  %p384_p2 = scmp.lt.s32.totalorder %s5184_s16, 3 }
  0x1b   : > { %s5187_s21 = smov [#allocation8]   ;;  %s5188_s24 = smov [#allocation11]  }
  0x1c   : > { %p5309_p3 = pnand %p3882_p0, %p384_p2  ;;  %s412_s22 = sshll.u32 %s5187_s21, 4  ;;  %s5322_s22 = int_to_ptr.vmem [resolvable:$true] %s412_s22 }
  0x1d   : > { %s444_s25 = sshll.u32 %s5188_s24, 4  ;;  %s7439_s2 = sld [smem:[#allocation90_spill]]  ;;  %s5324_s25 = int_to_ptr.vmem [resolvable:$true] %s444_s25 }
  0x1e   : > { %s7437_s20 = scalar_select %p5309_p3, 1, 0 }
  0x1f   : > { %p4372_p5 = pneg %p5309_p3 }
  0x21   : > { %p5318_p6 = pnand %p4372_p5, %p7275_p1 }
  0x23   : > { %s4870_s28 = scalar_lea.hbm %s7439_s2, 4096  ;;  %p5334_p8 = pneg %p5318_p6 }
  0x24   : > { %p4871_p7 = scmp.ne.s32.totalorder %s7439_s2, %s4870_s28  ;;  %p4877_p11 = scmp.lt.u32.totalorder %s4870_s28, %s7439_s2 }
  0x26   : > { %p4873_p9 = pnand %p5334_p8, %p4871_p7 }
  0x28   : > { %p4874_p10 = pneg %p4873_p9 }
  0x2a   : > { %p4879_p12 = pnand %p4877_p11, %p4874_p10 }
  0x2c   : > { %4882 = shalt.err (!%p4879_p12)
}
  0x2d   : > { %s4883_s13 = scalar_lea.vmem %s5307_s18, 4096  ;;  %p4891_p5 = scmp.lt.s32.totalorder %s5307_s18, %s5307_s18 }
  0x2e   : > { %p4884_p13 = scmp.ne.s32.totalorder %s5307_s18, %s4883_s13  ;;  %p4892_p4 = scmp.lt.s32.totalorder %s4883_s13, %s4883_s13 }
  0x30   : > { %p4886_p0 = pnand %p4884_p13, %p5334_p8  ;;  %p4893_p7 = por %p4892_p4, %p4891_p5 }
  0x32   : > { %p4887_p2 = pneg %p4886_p0 }
  0x34   : > { %p4894_p9 = pnand %p4893_p7, %p4887_p2 }
  0x36   : > { %4897 = shalt.err (!%p4894_p9)
}
  0x37   : > { %s7273_s26 = smov 64   ;;  %s7274_s14 = smov 4  }
  0x38   : > { %4375 = dma.hbm_to_vmem [thread:$0]  (!%p5318_p6), %s7439_s2, 4096, %s5307_s18, [#allocation6], %s7273_s26, %s7273_s26, %s7274_s14  }
  0x39   : > { %s7441_s4 = sld [smem:[#allocation91_spill]] }
  0x3f   : > { %s4898_s13 = scalar_lea.hbm %s7441_s4, 1024 }
  0x40   : > { %p4899_p4 = scmp.ne.s32.totalorder %s7441_s4, %s4898_s13  ;;  %p4905_p12 = scmp.lt.u32.totalorder %s4898_s13, %s7441_s4 }
  0x42   : > { %p4901_p10 = pnand %p4899_p4, %p5334_p8 }
  0x44   : > { %p4902_p11 = pneg %p4901_p10 }
  0x46   : > { %p4907_p13 = pnand %p4905_p12, %p4902_p11 }
  0x48   : > { %4910 = shalt.err (!%p4907_p13)
}
  0x49   : > { %s4911_s18 = scalar_lea.vmem %s5322_s22, 1024  ;;  %p4919_p7 = scmp.lt.s32.totalorder %s5322_s22, %s5322_s22 }
  0x4a   : > { %p4912_p0 = scmp.ne.s32.totalorder %s5322_s22, %s4911_s18  ;;  %p4920_p9 = scmp.lt.s32.totalorder %s4911_s18, %s4911_s18 }
  0x4c   : > { %p4914_p2 = pnand %p4912_p0, %p5334_p8  ;;  %p4921_p4 = por %p4920_p9, %p4919_p7 }
  0x4e   : > { %p4915_p5 = pneg %p4914_p2 }
  0x50   : > { %p4922_p10 = pnand %p4921_p4, %p4915_p5 }
  0x52   : > { %4925 = shalt.err (!%p4922_p10)
}
  0x53   : > { %4378 = dma.hbm_to_vmem [thread:$0]  (!%p5318_p6), %s7441_s4, 1024, %s5322_s22, [#allocation9], %s7273_s26, %s7273_s26, %s7274_s14  }
  0x54   : > { %s7442_s8 = sld [smem:[#allocation94_spill]] }
  0x5a   : > { %s4926_s27 = scalar_lea.hbm %s7442_s8, 4096 }
  0x5b   : > { %p4927_p11 = scmp.ne.s32.totalorder %s7442_s8, %s4926_s27  ;;  %p4933_p0 = scmp.lt.u32.totalorder %s4926_s27, %s7442_s8 }
  0x5d   : > { %p4929_p12 = pnand %p4927_p11, %p5334_p8 }
  0x5f   : > { %p4930_p13 = pneg %p4929_p12 }
  0x61   : > { %p4935_p2 = pnand %p4933_p0, %p4930_p13 }
  0x63   : > { %4938 = shalt.err (!%p4935_p2)
}
  0x64   : > { %s4939_s22 = scalar_lea.vmem %s5324_s25, 4096  ;;  %p4947_p4 = scmp.lt.s32.totalorder %s5324_s25, %s5324_s25 }
  0x65   : > { %p4940_p5 = scmp.ne.s32.totalorder %s5324_s25, %s4939_s22  ;;  %p4948_p10 = scmp.lt.s32.totalorder %s4939_s22, %s4939_s22 }
  0x67   : > { %p4942_p7 = pnand %p4940_p5, %p5334_p8  ;;  %p4949_p11 = por %p4948_p10, %p4947_p4 }
  0x69   : > { %p4943_p9 = pneg %p4942_p7 }
  0x6b   : > { %p4950_p12 = pnand %p4949_p11, %p4943_p9 }
  0x6d   : > { %4953 = shalt.err (!%p4950_p12)
}
  0x6e   : > { %s7277_s18 = smov 256   ;;  %s7279_s7 = smov 16  }
  0x6f   : > { %4384 = dma.hbm_to_vmem [thread:$0]  (!%p5318_p6), %s7442_s8, 4096, %s5324_s25, [#allocation12], %s7277_s18, %s7277_s18, %s7279_s7  }
  0x70   : > { %s5193_s12 = smov [#allocation10]   ;;  %s7443_s6 = sld [smem:[#allocation92_spill]] }
  0x71   : > { %s428_s27 = sshll.u32 %s5193_s12, 4  ;;  %s429_s27 = int_to_ptr.vmem [resolvable:$true] %s428_s27 }
  0x76   : > { %s4954_s24 = scalar_lea.hbm %s7443_s6, 2048 }
  0x77   : > { %p4955_p13 = scmp.ne.s32.totalorder %s7443_s6, %s4954_s24  ;;  %p4961_p5 = scmp.lt.u32.totalorder %s4954_s24, %s7443_s6 }
  0x79   : > { %p4957_p0 = pnand %p4955_p13, %p5334_p8 }
  0x7b   : > { %p4958_p2 = pneg %p4957_p0 }
  0x7d   : > { %p4963_p7 = pnand %p4961_p5, %p4958_p2 }
  0x7f   : > { %4966 = shalt.err (!%p4963_p7)
}
  0x80   : > { %s4967_s25 = scalar_lea.vmem %s429_s27, 2048  ;;  %p4975_p11 = scmp.lt.s32.totalorder %s429_s27, %s429_s27 }
  0x81   : > { %p4968_p9 = scmp.ne.s32.totalorder %s429_s27, %s4967_s25  ;;  %p4976_p12 = scmp.lt.s32.totalorder %s4967_s25, %s4967_s25 }
  0x83   : > { %p4970_p4 = pnand %p4968_p9, %p5334_p8  ;;  %p4977_p1 = por %p4976_p12, %p4975_p11 }
  0x85   : > { %p4971_p10 = pneg %p4970_p4 }
  0x87   : > { %p4978_p3 = pnand %p4977_p1, %p4971_p10 }
  0x89   : > { %4981 = shalt.err (!%p4978_p3)
}
  0x8a   : > { %s5194_s9 = smov 128   ;;  %s5195_s11 = smov 8  }
  0x8b   : > { %4381 = dma.hbm_to_vmem [thread:$0]  (!%p5318_p6), %s7443_s6, 2048, %s429_s27, [#allocation9], %s5194_s9, %s5194_s9, %s5195_s11  }
  0x8c   : > { %s5196_s12 = smov [#allocation13]   ;;  %s7444_s10 = sld [smem:[#allocation96_spill]] }
  0x8d   : > { %s460_s28 = sshll.u32 %s5196_s12, 4  ;;  %s461_s28 = int_to_ptr.vmem [resolvable:$true] %s460_s28 }
  0x92   : > { %s4982_s13 = scalar_lea.hbm %s7444_s10, 1024 }
  0x93   : > { %p4983_p1 = scmp.ne.s32.totalorder %s7444_s10, %s4982_s13  ;;  %p4989_p0 = scmp.lt.u32.totalorder %s4982_s13, %s7444_s10 }
  0x95   : > { %p4985_p3 = pnand %p4983_p1, %p5334_p8 }
  0x97   : > { %p4986_p13 = pneg %p4985_p3 }
  0x99   : > { %p4991_p2 = pnand %p4989_p0, %p4986_p13 }
  0x9b   : > { %4994 = shalt.err (!%p4991_p2)
}
  0x9c   : > { %s4995_s27 = scalar_lea.vmem %s461_s28, 1024  ;;  %p5003_p4 = scmp.lt.s32.totalorder %s461_s28, %s461_s28 }
  0x9d   : > { %p4996_p5 = scmp.ne.s32.totalorder %s461_s28, %s4995_s27  ;;  %p5004_p10 = scmp.lt.s32.totalorder %s4995_s27, %s4995_s27 }
  0x9f   : > { %p4998_p7 = pnand %p4996_p5, %p5334_p8  ;;  %p5005_p11 = por %p5004_p10, %p5003_p4 }
  0xa1   : > { %p4999_p9 = pneg %p4998_p7 }
  0xa3   : > { %p5006_p12 = pnand %p5005_p11, %p4999_p9 }
  0xa5   : > { %5009 = shalt.err (!%p5006_p12)
}
  0xa6   : > { %s7445_s9 = smov 4   ;;  %s7446_s11 = smov 64  }
  0xa7   : > { %4387 = dma.hbm_to_vmem [thread:$0]  (!%p5318_p6), %s7444_s10, 1024, %s461_s28, [#allocation12], %s7446_s11, %s7446_s11, %s7445_s9  }
  0xa8   : > { %s3881_s23 = sadd.s32 4294967294, %s5184_s16   ;;  %s5451_s21 = sadd.s32 1, %s5184_s16  }
  0xa9   : > { %s46_s26 = sadd.s32 1, %s5180_s15  ;;  %s43_s14 = ssub.s32 %s5184_s16, %s5451_s21 }
  0xaa   : > { %p53_p8 = scmp.ne.s32.totalorder %s5180_s15, %s5176_s30  ;;  %p44_p1 = scmp.eq.s32.totalorder %s43_s14, 0 }
  0xab   : > { %p54_p3 = scmp.eq.s32.totalorder %s5184_s16, 0  ;;  %p59_p13 = scmp.ne.s32.totalorder %s5176_s30, %s5172_s29 }
  0xac   : > { %p319_p0 = scmp.eq.s32.totalorder %s5302_s19, 1  ;;  %p7448_p5 = scmp.eq.s32.totalorder %s5302_s19, 0 }
  0xad   : > { %s5463_s12 = scalar_select %p44_p1, %s5180_s15, %s46_s26  }
  0xae   : > { %p55_p2 = por %p54_p3, %p53_p8  ;;  %p5467_p7 = por %p7448_p5, %p59_p13 }
  0xaf   : > { %7447 = sst [smem:[#allocation24_spill]] %s5463_s12  ;;  %p5471_p6 = por %p319_p0, %p53_p8 }
  0xb0   : > { %p325_p9 = scmp.eq.s32.totalorder %s3881_s23, 1  ;;  %p4407_p4 = scmp.lt.s32.totalorder %s5184_s16, 2 }
  0xb1   : > { %s7450_s28 = scalar_select %p5471_p6, 1, 0 }
  0xb2   : > { %s477_s24 = sand.u32 1, %s5180_s15   ;;  %p5477_p10 = por %p325_p9, %p59_p13 }
  0xb3   : > { %s5481_s22 = sshll.u32 %s477_s24, 8  ;;  %s4082_s25 = sshll.u32 %s5184_s16, 12 }
  0xb4   : > { %s7451_s13 = scalar_select %p5477_p10, 1, 0 }
  0xb5   : > { %s7452_s0 = sld [smem:[#allocation89_spill]]  ;;  %s481_s18 = scalar_lea.vmem [#allocation2], %s5481_s22 }
  0xb6   : > { %s489_s7 = sshll.u32 %s481_s18, 4  ;;  %p5490_p11 = pnand %p4407_p4, %p55_p2  ;;  %s5494_s7 = int_to_ptr.vmem [resolvable:$true] %s489_s7 }
  0xb7   : > { %s5499_s27 = scalar_lea.hbm %s7257_s1, %s4082_s25  ;;  %s5501_s9 = scalar_lea.sflag [#allocation3], %s477_s24 }
  0xb8   : > { %p5012_p8 = pneg %p5490_p11 }
  0xbb   : > { %s5487_s11 = scalar_lea.hbm %s7452_s0, %s4082_s25  ;;  %s5015_s6 = scalar_lea.hbm %s7452_s0, 8192 }
  0xbc   : > { %s5010_s2 = scalar_lea.hbm %s5487_s11, 4096  ;;  %p5016_p13 = scmp.lt.u32.totalorder %s5487_s11, %s7452_s0 }
  0xbd   : > { %p5011_p12 = scmp.ne.s32.totalorder %s5487_s11, %s5010_s2  ;;  %p5017_p0 = scmp.lt.u32.totalorder %s5015_s6, %s5010_s2 }
  0xbe   : > { %p5019_p5 = scmp.lt.u32.totalorder %s5010_s2, %s5487_s11 }
  0xbf   : > { %p5013_p1 = pnand %p5012_p8, %p5011_p12  ;;  %p5018_p2 = por %p5017_p0, %p5016_p13 }
  0xc1   : > { %p5014_p3 = pneg %p5013_p1  ;;  %p5020_p9 = por %p5019_p5, %p5018_p2 }
  0xc3   : > { %p5021_p4 = pnand %p5020_p9, %p5014_p3 }
  0xc5   : > { %5024 = shalt.err (!%p5021_p4)
}
  0xc6   : > { %s5025_s24 = scalar_lea.vmem %s5494_s7, 4096  ;;  %s5197_s4 = smov [#allocation2]  }
  0xc7   : > { %p5026_p12 = scmp.ne.s32.totalorder %s5494_s7, %s5025_s24  ;;  %s5030_s25 = sshll.u32 %s5197_s4, 4  ;;  %s5031_s25 = int_to_ptr.vmem [resolvable:$false] %s5030_s25 }
  0xc8   : > { %s5032_s8 = scalar_lea.vmem %s5031_s25, 8192  ;;  %p5033_p6 = scmp.lt.s32.totalorder %s5494_s7, %s5031_s25 }
  0xc9   : > { %p5028_p1 = pnand %p5026_p12, %p5012_p8  ;;  %p5034_p13 = scmp.lt.s32.totalorder %s5032_s8, %s5025_s24 }
  0xcb   : > { %p5029_p10 = pneg %p5028_p1  ;;  %p5035_p0 = por %p5034_p13, %p5033_p6 }
  0xcd   : > { %p5036_p2 = pnand %p5035_p0, %p5029_p10 }
  0xcf   : > { %5039 = shalt.err (!%p5036_p2)
}
  0xd0   : > { %s7454_s2 = smov 16   ;;  %s7455_s6 = smov 256  }
  0xd1   : > { %4391 = dma.hbm_to_vmem [thread:$0]  (!%p5490_p11), %s5487_s11, 4096, %s5494_s7, %s5501_s9, %s7455_s6, %s7455_s6, %s7454_s2  }
  0xd2   : > { %s503_s10 = scalar_lea.vmem [#allocation5], %s5481_s22  ;;  %s499_s14 = sand.u32 1, %s5184_s16  }
  0xd3   : > { %s511_s26 = sshll.u32 %s503_s10, 4  ;;  %s5536_s18 = scalar_lea.sflag [#allocation6], %s499_s14  ;;  %s5534_s26 = int_to_ptr.vmem [resolvable:$true] %s511_s26 }
  0xd4   : > { %s5040_s24 = scalar_lea.hbm %s5499_s27, 4096  ;;  %s5045_s8 = scalar_lea.hbm %s7257_s1, 8192 }
  0xd5   : > { %p5041_p6 = scmp.ne.s32.totalorder %s5499_s27, %s5040_s24  ;;  %p5046_p5 = scmp.lt.u32.totalorder %s5499_s27, %s7257_s1 }
  0xd6   : > { %p5047_p9 = scmp.lt.u32.totalorder %s5045_s8, %s5040_s24  ;;  %p5049_p12 = scmp.lt.u32.totalorder %s5040_s24, %s5499_s27 }
  0xd7   : > { %p5043_p10 = pnand %p5041_p6, %p5012_p8 }
  0xd8   : > { %p5048_p4 = por %p5047_p9, %p5046_p5 }
  0xd9   : > { %p5044_p3 = pneg %p5043_p10 }
  0xda   : > { %p5050_p1 = por %p5049_p12, %p5048_p4 }
  0xdc   : > { %p5051_p13 = pnand %p5050_p1, %p5044_p3 }
  0xde   : > { %5054 = shalt.err (!%p5051_p13)
}
  0xdf   : > { %s5055_s22 = scalar_lea.vmem %s5534_s26, 4096  ;;  %s5198_s11 = smov [#allocation5]  }
  0xe0   : > { %p5056_p0 = scmp.ne.s32.totalorder %s5534_s26, %s5055_s22  ;;  %s5060_s7 = sshll.u32 %s5198_s11, 4  ;;  %s5061_s7 = int_to_ptr.vmem [resolvable:$false] %s5060_s7 }
  0xe1   : > { %s5062_s0 = scalar_lea.vmem %s5061_s7, 8192  ;;  %p5063_p10 = scmp.lt.s32.totalorder %s5534_s26, %s5061_s7 }
  0xe2   : > { %p5058_p2 = pnand %p5056_p0, %p5012_p8  ;;  %p5064_p5 = scmp.lt.s32.totalorder %s5062_s0, %s5055_s22 }
  0xe4   : > { %p5059_p6 = pneg %p5058_p2  ;;  %p5065_p9 = por %p5064_p5, %p5063_p10 }
  0xe6   : > { %p5066_p4 = pnand %p5065_p9, %p5059_p6 }
  0xe8   : > { %5069 = shalt.err (!%p5066_p4)
}
  0xe9   : > { %4394 = dma.hbm_to_vmem [thread:$0]  (!%p5490_p11), %s5499_s27, 4096, %s5534_s26, %s5536_s18, %s7455_s6, %s7455_s6, %s7454_s2  }
  0xea   : > { %p7456_p8 = scmp.ne.s32.totalorder %s7437_s20, 0 }
  0xec   : > { %523 = sbr.rel (%p7456_p8) target bundleno = 1599 (0x63f), region = 68 }
  0xf3   : > { %s5568_s12 = sand.u32 1, %s5176_s30  }
  0xf4   : > { %s5571_s9 = sshll.u32 %s5568_s12, 8  ;;  %s526_s23 = scalar_lea.sflag [#allocation3], %s5568_s12 }
  0xf5   : > { %s5575_s10 = scalar_lea.vmem [#allocation2], %s5571_s9 }
  0xf6   : > { %5143 = dma.done.wait (%p5467_p7), %s526_s23, 4096  }
  0xf7   : > { %5145 = vsyncadd (%p5467_p7), %s526_s23, 4294963200  ;;  %s534_s20 = sand.u32 1, %s5302_s19   ;;  %s5583_s2 = scalar_lea.vmem [#allocation5], %s5571_s9 }
  0xf8   : > { %s535_s27 = scalar_lea.sflag [#allocation6], %s534_s20 }
  0xf9   : > { %5147 = dma.done.wait (%p5467_p7), %s535_s27, 4096  }
  0xfa   : > { %5149 = vsyncadd (%p5467_p7), %s535_s27, 4294963200  ;;  %p7457_p11 = scmp.eq.s32.totalorder %s5302_s19, 0 }
  0xfc   : > { %5151 = dma.done.wait (%p7457_p11), [#allocation6], 4096   ;;  %p7458_p3 = pmov %p7457_p11 }
  0xfe   : > { %5153 = vsyncadd (%p7458_p3), [#allocation6], 4294963200  ;;  %p7459_p12 = pmov %p7458_p3 }
  0xff   : > { %p7460_p1 = pmov %p7458_p3 }
 0x100   : > { %5155 = dma.done.wait (%p7459_p12), [#allocation9], 3072  }
 0x101   : > { %5157 = vsyncadd (%p7460_p1), [#allocation9], 4294964224  ;;  %p7461_p13 = pmov %p7460_p1 }
 0x102   : > { %p7462_p0 = pmov %p7460_p1 }
 0x103   : > { %5159 = dma.done.wait (%p7461_p13), [#allocation12], 5120  }
 0x104   : > { %5161 = vsyncadd (%p7462_p0), [#allocation12], 4294962176  ;;  %v4462_v0 = vld [vmem:[#allocation7 + $0x40] sm:$0xff]   ;;  %v4466_v4 = vld [vmem:[#allocation7 + $0x48] sm:$0xff]   ;;  %s7471_s4 = sld [smem:[#allocation93_spill]]  ;;  %s7472_s22 = sld [smem:[#allocation95_spill]] }
 0x105   : > { %v4463_v1 = vld [vmem:[#allocation7 + $0xc0] sm:$0xff]   ;;  %4120 = vmatprep.subr.bf16.mxu0 %v4462_v0  ;;  %v4467_v5 = vld [vmem:[#allocation7 + $0xc8] sm:$0xff]   ;;  %v4470_v8 = vld [vmem:[#allocation7 + $0x50] sm:$0xff]   ;;  %s6064_s11 = scalar_lea.vmem [#allocation14], %s5571_s9  ;;  %s3906_s7 = sshll.u32 %s5568_s12, 7 }
 0x106   : > { %v4464_v2 = vld [vmem:[#allocation7] sm:$0xff]   ;;  %4184 = vmatprep.subr.bf16.mxu1 %v4463_v1  ;;  %v4468_v6 = vld [vmem:[#allocation7 + $0x8] sm:$0xff]   ;;  %v4471_v9 = vld [vmem:[#allocation7 + $0xd0] sm:$0xff]   ;;  %s7517_s23 = sld [smem:[#allocation97_spill]]  ;;  %s4118_s20 = sshll.u32 %s5302_s19, 12 }
 0x107   : > { %v4465_v3 = vld [vmem:[#allocation7 + $0x80] sm:$0xff]   ;;  %4121 = vmatpush3.bf16.msra.mxu0 %v4464_v2  ;;  %v4469_v7 = vld [vmem:[#allocation7 + $0x88] sm:$0xff]   ;;  %v4472_v10 = vld [vmem:[#allocation7 + $0x10] sm:$0xff]   ;;  %s7728_s17 = sld [smem:[#allocation98_spill]]  ;;  %s3661_s26 = sshll.u32 %s6064_s11, 4  ;;  %s7089_s26 = int_to_ptr.vmem [resolvable:$true] %s3661_s26 }
 0x108   : > { %4185 = vmatpush3.bf16.msra.mxu1 %v4465_v3  ;;  %4122 = vmatprep.subr.bf16.mxu0 %v4466_v4  ;;  %v4473_v11 = vld [vmem:[#allocation7 + $0x90] sm:$0xff]   ;;  %v4474_v12 = vld [vmem:[#allocation7 + $0x58] sm:$0xff]   ;;  %v4478_v16 = vld [vmem:[#allocation7 + $0x60] sm:$0xff]   ;;  %s3637_s14 = scalar_lea.sflag [#allocation4], %s5568_s12  ;;  %s5070_s18 = scalar_lea.vmem %s7089_s26, 4096 }
 0x109   : > { %4186 = vmatprep.subr.bf16.mxu1 %v4467_v5  ;;  %v4475_v13 = vld [vmem:[#allocation7 + $0xd8] sm:$0xff]   ;;  %v4479_v17 = vld [vmem:[#allocation7 + $0xe0] sm:$0xff]   ;;  %v4482_v20 = vld [vmem:[#allocation7 + $0x68] sm:$0xff]   ;;  %p5071_p7 = scmp.ne.s32.totalorder %s7089_s26, %s5070_s18  ;;  %p7729_p2 = scmp.ne.s32.totalorder %s7450_s28, 0 }
 0x10a   : > { %v4476_v14 = vld [vmem:[#allocation7 + $0x18] sm:$0xff]   ;;  %v4480_v18 = vld [vmem:[#allocation7 + $0x20] sm:$0xff]   ;;  %v4483_v21 = vld [vmem:[#allocation7 + $0xe8] sm:$0xff]   ;;  %s5200_s24 = smov [#allocation14]  }
 0x10b   : > { %4123 = vmatpush3.bf16.msra.mxu0 %v4468_v6  ;;  %v4477_v15 = vld [vmem:[#allocation7 + $0x98] sm:$0xff]   ;;  %v4481_v19 = vld [vmem:[#allocation7 + $0xa0] sm:$0xff]   ;;  %v4484_v22 = vld [vmem:[#allocation7 + $0x28] sm:$0xff]   ;;  %p5072_p6 = pnand %p5071_p7, %p7729_p2 }
 0x10c   : > { %4187 = vmatpush3.bf16.msra.mxu1 %v4469_v7  ;;  %4124 = vmatprep.subr.bf16.mxu0 %v4470_v8  ;;  %v4485_v23 = vld [vmem:[#allocation7 + $0xa8] sm:$0xff]   ;;  %v4486_v24 = vld [vmem:[#allocation7 + $0x70] sm:$0xff]   ;;  %v4490_v28 = vld [vmem:[#allocation7 + $0x78] sm:$0xff]  }
 0x10d   : > { %4188 = vmatprep.subr.bf16.mxu1 %v4471_v9  ;;  %v4487_v25 = vld [vmem:[#allocation7 + $0xf0] sm:$0xff]   ;;  %v4491_v29 = vld [vmem:[#allocation7 + $0xf8] sm:$0xff]   ;;  %v629_v32 = vld [vmem:[%s5575_s10] sm:$0xff]  ;;  %s7086_s6 = scalar_lea.hbm %s7728_s17, %s4118_s20  ;;  %p5073_p10 = pneg %p5072_p6 }
 0x10e   : > { %v4488_v26 = vld [vmem:[#allocation7 + $0x30] sm:$0xff]   ;;  %v4492_v30 = vld [vmem:[#allocation7 + $0x38] sm:$0xff]   ;;  %v5606_v34 = vld [vmem:[%s5575_s10 + $0x8] sm:$0xff]  ;;  %v661_v46 = vunpack.c.l.bf16 %v629_v32  ;;  %v662_v53 = vunpack.c.h.bf16 %v629_v32 }
 0x10f   : > { %4125 = vmatpush3.bf16.msra.mxu0 %v4472_v10  ;;  %v4489_v27 = vld [vmem:[#allocation7 + $0xb0] sm:$0xff]   ;;  %v4493_v31 = vld [vmem:[#allocation7 + $0xb8] sm:$0xff]   ;;  %v5614_v38 = vld [vmem:[%s5575_s10 + $0x20] sm:$0xff]  ;;  %v663_v59 = vunpack.c.l.bf16 %v5606_v34  ;;  %v664_v60 = vunpack.c.h.bf16 %v5606_v34 }
 0x110   : > { %4189 = vmatpush3.bf16.msra.mxu1 %v4473_v11  ;;  %4126 = vmatprep.subr.bf16.mxu0 %v4474_v12  ;;  %v5603_v33 = vld [vmem:[%s5575_s10 + $0x10] sm:$0xff]  ;;  %v5610_v36 = vld [vmem:[%s5575_s10 + $0x18] sm:$0xff]  ;;  %v5626_v43 = vld [vmem:[%s5575_s10 + $0x28] sm:$0xff] }
 0x111   : > { %4190 = vmatprep.subr.bf16.mxu1 %v4475_v13  ;;  %v3910_v35 = vcombine.high %v629_v32, %v5603_v33  ;;  %v3909_v37 = vcombine.low %v629_v32, %v5603_v33  ;;  %v5617_v39 = vld [vmem:[%s5575_s10 + $0x30] sm:$0xff]  ;;  %v3912_v40 = vcombine.high %v5606_v34, %v5610_v36  ;;  %v3911_v41 = vcombine.low %v5606_v34, %v5610_v36  ;;  %v5629_v44 = vld [vmem:[%s5575_s10 + $0x38] sm:$0xff]  ;;  %v5632_v45 = vld [vmem:[%s5575_s10 + $0x40] sm:$0xff] }
 0x112   : > { %v3914_v42 = vcombine.high %v5614_v38, %v5617_v39  ;;  %v3916_v47 = vcombine.high %v5626_v43, %v5629_v44  ;;  %v3913_v48 = vcombine.low %v5614_v38, %v5617_v39  ;;  %v3915_v49 = vcombine.low %v5626_v43, %v5629_v44  ;;  %v5641_v50 = vld [vmem:[%s5575_s10 + $0x50] sm:$0xff]  ;;  %v5644_v51 = vld [vmem:[%s5575_s10 + $0x48] sm:$0xff]  ;;  %v5647_v52 = vld [vmem:[%s5575_s10 + $0x58] sm:$0xff] }
 0x113   : > { %4127 = vmatpush3.bf16.msra.mxu0 %v4476_v14  ;;  %1349 = vmatprep.mubr.bf16.mxu0 %v3910_v35  ;;  %v3918_v54 = vcombine.high %v5632_v45, %v5641_v50  ;;  %v3920_v55 = vcombine.high %v5644_v51, %v5647_v52  ;;  %v5654_v56 = vld [vmem:[%s5575_s10 + $0x60] sm:$0xff]  ;;  %v5657_v57 = vld [vmem:[%s5575_s10 + $0x70] sm:$0xff]  ;;  %v5660_v58 = vld [vmem:[%s5575_s10 + $0x68] sm:$0xff]  ;;  %v3917_v61 = vcombine.low %v5632_v45, %v5641_v50  ;;  %v665_v3 = vunpack.c.l.bf16 %v5603_v33 }
 0x114   : > { %4191 = vmatpush3.bf16.msra.mxu1 %v4477_v15  ;;  %4128 = vmatprep.subr.bf16.mxu0 %v4478_v16  ;;  %v3919_v62 = vcombine.low %v5644_v51, %v5647_v52  ;;  %v3922_v63 = vcombine.high %v5654_v56, %v5657_v57  ;;  %v5671_v0 = vld [vmem:[%s5575_s10 + $0x78] sm:$0xff]  ;;  %v5674_v1 = vld [vmem:[%s5575_s10 + $0x80] sm:$0xff]  ;;  %v5677_v2 = vld [vmem:[%s5575_s10 + $0x90] sm:$0xff]  ;;  %v3921_v5 = vcombine.low %v5654_v56, %v5657_v57  ;;  %v666_v10 = vunpack.c.h.bf16 %v5603_v33 }
 0x115   : > { %4192 = vmatprep.subr.bf16.mxu1 %v4479_v17  ;;  %1446 = vmatprep.mubr.bf16.mxu1 %v3912_v40  ;;  %v3924_v4 = vcombine.high %v5660_v58, %v5671_v0  ;;  %v3923_v6 = vcombine.low %v5660_v58, %v5671_v0  ;;  %v5687_v7 = vld [vmem:[%s5575_s10 + $0x88] sm:$0xff]  ;;  %v5690_v8 = vld [vmem:[%s5575_s10 + $0x98] sm:$0xff]  ;;  %v5693_v9 = vld [vmem:[%s5575_s10 + $0xa0] sm:$0xff]  ;;  %v3926_v11 = vcombine.high %v5674_v1, %v5677_v2 }
 0x116   : > { %v3925_v12 = vcombine.low %v5674_v1, %v5677_v2  ;;  %v5701_v13 = vld [vmem:[%s5575_s10 + $0xb0] sm:$0xff]  ;;  %v5704_v14 = vld [vmem:[%s5575_s10 + $0xa8] sm:$0xff]  ;;  %v5707_v15 = vld [vmem:[%s5575_s10 + $0xb8] sm:$0xff]  ;;  %v725_v16 = vmul.f32 %v661_v46, %v661_v46  ;;  %v726_v17 = vmul.f32 %v662_v53, %v662_v53  ;;  %v728_v40 = vmul.f32 %v664_v60, %v664_v60 }
 0x117   : > { %4129 = vmatpush3.bf16.msra.mxu0 %v4480_v18  ;;  %v3928_v18 = vcombine.high %v5687_v7, %v5690_v8  ;;  %v5748_v35 = vld [vmem:[%s5575_s10 + $0xe8] sm:$0xff]  ;;  %v4526_v53 = vld [vmem:[#allocation8] sm:$0xff]   ;;  %v729_v34 = vmul.f32 %v665_v3, %v665_v3  ;;  %v730_v33 = vmul.f32 %v666_v10, %v666_v10  ;;  %v669_v60 = vunpack.c.l.bf16 %v5614_v38 }
 0x118   : > { %4193 = vmatpush3.bf16.msra.mxu1 %v4481_v19  ;;  %4130 = vmatprep.subr.bf16.mxu0 %v4482_v20  ;;  %v3927_v19 = vcombine.low %v5687_v7, %v5690_v8  ;;  %v3930_v20 = vcombine.high %v5693_v9, %v5701_v13  ;;  %v789_v46 = vadd.f32 %v726_v17, %v725_v16  ;;  %v4527_v32 = vld [vmem:[#allocation8 + $0x8] sm:$0xff]   ;;  %v672_v3 = vunpack.c.h.bf16 %v5626_v43 }
 0x119   : > { %4194 = vmatprep.subr.bf16.mxu1 %v4483_v21  ;;  %v3932_v21 = vcombine.high %v5704_v14, %v5707_v15  ;;  %v733_v10 = vmul.f32 %v669_v60, %v669_v60 }
 0x11b   : > { %4131 = vmatpush3.bf16.msra.mxu0 %v4484_v22  ;;  %v5718_v22 = vld [vmem:[%s5575_s10 + $0xc0] sm:$0xff] }
 0x11c   : > { %4195 = vmatpush3.bf16.msra.mxu1 %v4485_v23  ;;  %4132 = vmatprep.subr.bf16.mxu0 %v4486_v24  ;;  %v5721_v23 = vld [vmem:[%s5575_s10 + $0xd0] sm:$0xff]  ;;  %v5724_v24 = vld [vmem:[%s5575_s10 + $0xc8] sm:$0xff] }
 0x11d   : > { %4196 = vmatprep.subr.bf16.mxu1 %v4487_v25  ;;  %v675_v25 = vunpack.c.l.bf16 %v5629_v44 }
 0x11f   : > { %4133 = vmatpush3.bf16.msra.mxu0 %v4488_v26 }
 0x120   : > { %4197 = vmatpush3.bf16.msra.mxu1 %v4489_v27  ;;  %4134 = vmatprep.subr.bf16.mxu0 %v4490_v28  ;;  %v5733_v28 = vld [vmem:[%s5575_s10 + $0xd8] sm:$0xff]  ;;  %v4528_v27 = vld [vmem:[#allocation8 + $0x10] sm:$0xff]  }
 0x121   : > { %4198 = vmatprep.subr.bf16.mxu1 %v4491_v29  ;;  %v5736_v29 = vld [vmem:[%s5575_s10 + $0xe0] sm:$0xff] }
 0x123   : > { %4135 = vmatpush3.bf16.msra.mxu0 %v4492_v30  ;;  %v5739_v30 = vld [vmem:[%s5575_s10 + $0xf0] sm:$0xff] }
 0x124   : > { %4199 = vmatpush3.bf16.msra.mxu1 %v4493_v31  ;;  %v727_v31 = vmul.f32 %v663_v59, %v663_v59  ;;  %v668_v59 = vunpack.c.h.bf16 %v5610_v36  ;;  %4280 = vmatprep.subr.bf16.mxu0 %v4526_v53 }
 0x126   : > { %1350 = vmatmul.mubr.bf16.vlgmr.msra.gmra.mrb[0].mxu0 %v3909_v37  ;;  %v5751_v37 = vld [vmem:[%s5575_s10 + $0xf8] sm:$0xff]  ;;  %v790_v16 = vadd.f32 %v789_v46, %v727_v31  ;;  %v673_v31 = vunpack.c.l.bf16 %v5617_v39  ;;  %v736_v46 = vmul.f32 %v672_v3, %v672_v3  ;;  %s6472_s10 = scalar_lea.vmem [#allocation15], %s3906_s7 }
 0x127   : > { %1447 = vmatmul.mubr.bf16.vlgmr.msra.gmra.mrb[0].mxu1 %v3911_v41  ;;  %1357 = vmatprep.mubr.bf16.mxu0 %v3914_v42  ;;  %v670_v42 = vunpack.c.h.bf16 %v5614_v38  ;;  %v671_v41 = vunpack.c.l.bf16 %v5626_v43  ;;  %v676_v43 = vunpack.c.h.bf16 %v5629_v44 }
 0x128   : > { %1454 = vmatprep.mubr.bf16.mxu1 %v3916_v47  ;;  %v667_v47 = vunpack.c.l.bf16 %v5610_v36  ;;  %v732_v36 = vmul.f32 %v668_v59, %v668_v59  ;;  %v791_v26 = vadd.f32 %v790_v16, %v728_v40  ;;  %4281 = vmatpush3.bf16.msra.mxu0 %v4526_v53  ;;  %v678_v59 = vunpack.c.h.bf16 %v5632_v45 }
 0x129   : > { %4282 = vmatprep.subr.bf16.mxu0 %v4527_v32  ;;  %v740_v60 = vmul.f32 %v676_v43, %v676_v43  ;;  %v679_v16 = vunpack.c.l.bf16 %v5644_v51 }
 0x12a   : > { %v731_v17 = vmul.f32 %v667_v47, %v667_v47  ;;  %v674_v47 = vunpack.c.h.bf16 %v5617_v39  ;;  %792 = vadd.xlane.f32.xlu0 %v791_v26  ;;  %v680_v39 = vunpack.c.h.bf16 %v5644_v51  ;;  %v684_v51 = vunpack.c.h.bf16 %v5647_v52 }
 0x12c   : > { %4283 = vmatpush3.bf16.msra.mxu0 %v4527_v32  ;;  %v743_v32 = vmul.f32 %v679_v16, %v679_v16 }
 0x12d   : > { %4284 = vmatprep.subr.bf16.mxu0 %v4528_v27 }
 0x12e   : > { %1358 = vmatmul.mubr.bf16.gmra.mrb[4].mxu0 %v3913_v48  ;;  %v794_v48 = vadd.f32 %v730_v33, %v729_v34  ;;  %v737_v33 = vmul.f32 %v673_v31, %v673_v31  ;;  %v677_v34 = vunpack.c.l.bf16 %v5632_v45  ;;  %v682_v45 = vunpack.c.h.bf16 %v5641_v50 }
 0x12f   : > { %1455 = vmatmul.mubr.bf16.gmra.mrb[4].mxu1 %v3915_v49  ;;  %1365 = vmatprep.mubr.bf16.mxu0 %v3918_v54  ;;  %v734_v49 = vmul.f32 %v670_v42, %v670_v42  ;;  %v735_v54 = vmul.f32 %v671_v41, %v671_v41  ;;  %v738_v42 = vmul.f32 %v674_v47, %v674_v47  ;;  %v687_v47 = vunpack.c.l.bf16 %v5660_v58 }
 0x130   : > { %1462 = vmatprep.mubr.bf16.mxu1 %v3920_v55  ;;  %v795_v38 = vadd.f32 %v794_v48, %v731_v17  ;;  %v739_v41 = vmul.f32 %v675_v25, %v675_v25  ;;  %v741_v26 = vmul.f32 %v677_v34, %v677_v34  ;;  %v742_v17 = vmul.f32 %v678_v59, %v678_v59 }
 0x131   : > { %v799_v55 = vadd.f32 %v734_v49, %v733_v10  ;;  %v804_v44 = vadd.f32 %v738_v42, %v737_v33  ;;  %v744_v48 = vmul.f32 %v680_v39, %v680_v39  ;;  %v683_v10 = vunpack.c.l.bf16 %v5647_v52  ;;  %4285 = vmatpush3.bf16.msra.mxu0 %v4528_v27 }
 0x132   : > { %v796_v40 = vadd.f32 %v795_v38, %v732_v36  ;;  %v681_v36 = vunpack.c.l.bf16 %v5641_v50  ;;  %v809_v3 = vadd.f32 %v742_v17, %v741_v26  ;;  %v746_v49 = vmul.f32 %v682_v45, %v682_v45 }
 0x133   : > { %v800_v53 = vadd.f32 %v799_v55, %v735_v54  ;;  %v686_v54 = vunpack.c.h.bf16 %v5654_v56  ;;  %v747_v38 = vmul.f32 %v683_v10, %v683_v10  ;;  %v688_v55 = vunpack.c.h.bf16 %v5660_v58 }
 0x134   : > { %797 = vadd.xlane.f32.xlu0 %v796_v40  ;;  %v810_v31 = vadd.f32 %v809_v3, %v743_v32  ;;  %v689_v34 = vunpack.c.l.bf16 %v5657_v57  ;;  %v690_v40 = vunpack.c.h.bf16 %v5657_v57  ;;  %v691_v59 = vunpack.c.l.bf16 %v5671_v0 }
 0x135   : > { %v801_v25 = vadd.f32 %v800_v53, %v736_v46  ;;  %v748_v46 = vmul.f32 %v684_v51, %v684_v51  ;;  %v750_v52 = vmul.f32 %v686_v54, %v686_v54  ;;  %v752_v27 = vmul.f32 %v688_v55, %v688_v55 }
 0x136   : > { %1366 = vmatmul.mubr.bf16.gmra.mrb[8].mxu0 %v3917_v61  ;;  %v805_v61 = vadd.f32 %v804_v44, %v739_v41  ;;  %v811_v33 = vadd.f32 %v810_v31, %v744_v48  ;;  %v751_v41 = vmul.f32 %v687_v47, %v687_v47  ;;  %v753_v16 = vmul.f32 %v689_v34, %v689_v34 }
 0x137   : > { %1463 = vmatmul.mubr.bf16.gmra.mrb[8].mxu1 %v3919_v62  ;;  %1373 = vmatprep.mubr.bf16.mxu0 %v3922_v63  ;;  %v745_v62 = vmul.f32 %v681_v36, %v681_v36  ;;  %v685_v63 = vunpack.c.l.bf16 %v5654_v56  ;;  %v754_v39 = vmul.f32 %v690_v40, %v690_v40  ;;  %v755_v26 = vmul.f32 %v691_v59, %v691_v59 }
 0x138   : > { %1470 = vmatprep.mubr.bf16.mxu1 %v3924_v4  ;;  %802 = vadd.xlane.f32.xlu1 %v801_v25  ;;  %v806_v50 = vadd.f32 %v805_v61, %v740_v60  ;;  %v692_v60 = vunpack.c.h.bf16 %v5671_v0  ;;  %v693_v17 = vunpack.c.l.bf16 %v5674_v1  ;;  %v694_v56 = vunpack.c.h.bf16 %v5674_v1 }
 0x139   : > { %v814_v4 = vadd.f32 %v746_v49, %v745_v62  ;;  %v749_v43 = vmul.f32 %v685_v63, %v685_v63  ;;  %812 = vadd.xlane.f32.xlu0 %v811_v33  ;;  %v824_v36 = vadd.f32 %v754_v39, %v753_v16  ;;  %v695_v58 = vunpack.c.l.bf16 %v5687_v7  ;;  %v4529_v62 = vld [vmem:[#allocation8 + $0x18] sm:$0xff]  }
 0x13a   : > { %v696_v0 = vunpack.c.h.bf16 %v5687_v7  ;;  %v697_v25 = vunpack.c.l.bf16 %v5677_v2  ;;  %v698_v61 = vunpack.c.h.bf16 %v5677_v2  ;;  %v700_v51 = vunpack.c.h.bf16 %v5690_v8  ;;  %4286 = vmatprep.subr.bf16.mxu0 %v4529_v62 }
 0x13b   : > { %v815_v42 = vadd.f32 %v814_v4, %v747_v38  ;;  %v819_v53 = vadd.f32 %v750_v52, %v749_v43  ;;  %v825_v48 = vadd.f32 %v824_v36, %v755_v26  ;;  %v759_v45 = vmul.f32 %v695_v58, %v695_v58  ;;  %4287 = vmatpush3.bf16.msra.mxu0 %v4529_v62 }
 0x13c   : > { %807 = vadd.xlane.f32.xlu1 %v806_v50  ;;  %v760_v3 = vmul.f32 %v696_v0, %v696_v0  ;;  %v761_v63 = vmul.f32 %v697_v25, %v697_v25  ;;  %v762_v54 = vmul.f32 %v698_v61, %v698_v61  ;;  %v701_v50 = vunpack.c.l.bf16 %v5693_v9 }
 0x13d   : > { %v816_v44 = vadd.f32 %v815_v42, %v748_v46  ;;  %v820_v57 = vadd.f32 %v819_v53, %v751_v41  ;;  %v764_v46 = vmul.f32 %v700_v51, %v700_v51  ;;  %v702_v4 = vunpack.c.h.bf16 %v5693_v9 }
 0x13e   : > { %1374 = vmatmul.mubr.bf16.gmra.mrb[12].mxu0 %v3921_v5  ;;  %v756_v5 = vmul.f32 %v692_v60, %v692_v60  ;;  %v834_v47 = vadd.f32 %v762_v54, %v761_v63  ;;  %v703_v55 = vunpack.c.l.bf16 %v5704_v14  ;;  %v704_v43 = vunpack.c.h.bf16 %v5704_v14 }
 0x13f   : > { %1471 = vmatmul.mubr.bf16.gmra.mrb[12].mxu1 %v3923_v6  ;;  %1381 = vmatprep.mubr.bf16.mxu0 %v3926_v11  ;;  %v757_v6 = vmul.f32 %v693_v17, %v693_v17  ;;  %v758_v11 = vmul.f32 %v694_v56, %v694_v56  ;;  %v821_v32 = vadd.f32 %v820_v57, %v752_v27  ;;  %v705_v1 = vunpack.c.l.bf16 %v5701_v13 }
 0x140   : > { %1478 = vmatprep.mubr.bf16.mxu1 %v3928_v18  ;;  %817 = vadd.xlane.f32.xlu1 %v816_v44  ;;  %v699_v18 = vunpack.c.l.bf16 %v5690_v8  ;;  %v826_v49 = vadd.f32 %v825_v48, %v756_v5  ;;  %v765_v33 = vmul.f32 %v701_v50, %v701_v50  ;;  %v766_v34 = vmul.f32 %v702_v4, %v702_v4 }
 0x141   : > { %v829_v10 = vadd.f32 %v758_v11, %v757_v6  ;;  %822 = vadd.xlane.f32.xlu0 %v821_v32  ;;  %v706_v2 = vunpack.c.h.bf16 %v5701_v13  ;;  %v767_v40 = vmul.f32 %v703_v55, %v703_v55  ;;  %v768_v42 = vmul.f32 %v704_v43, %v704_v43 }
 0x142   : > { %v763_v38 = vmul.f32 %v699_v18, %v699_v18  ;;  %v707_v7 = vunpack.c.l.bf16 %v5707_v15  ;;  %v839_v8 = vadd.f32 %v766_v34, %v765_v33  ;;  %v709_v53 = vunpack.c.l.bf16 %v5718_v22 }
 0x143   : > { %v830_v31 = vadd.f32 %v829_v10, %v759_v45  ;;  %v770_v41 = vmul.f32 %v706_v2, %v706_v2  ;;  %v710_v60 = vunpack.c.h.bf16 %v5718_v22  ;;  %v711_v44 = vunpack.c.l.bf16 %v5724_v24 }
 0x144   : > { %827 = vadd.xlane.f32.xlu1 %v826_v49  ;;  %v771_v59 = vmul.f32 %v707_v7, %v707_v7  ;;  %v840_v16 = vadd.f32 %v839_v8, %v767_v40  ;;  %v712_v26 = vunpack.c.h.bf16 %v5724_v24  ;;  %v773_v17 = vmul.f32 %v709_v53, %v709_v53 }
 0x145   : > { %v831_v52 = vadd.f32 %v830_v31, %v760_v3  ;;  %v774_v56 = vmul.f32 %v710_v60, %v710_v60  ;;  %v713_v57 = vunpack.c.l.bf16 %v5721_v23  ;;  %v775_v58 = vmul.f32 %v711_v44, %v711_v44  ;;  %v4531_v60 = vld [vmem:[#allocation8 + $0x28] sm:$0xff]  }
 0x146   : > { %1382 = vmatmul.mubr.bf16.gmra.mrb[16].mxu0 %v3925_v12  ;;  %v835_v12 = vadd.f32 %v834_v47, %v763_v38  ;;  %v841_v5 = vadd.f32 %v840_v16, %v768_v42  ;;  %v714_v0 = vunpack.c.h.bf16 %v5721_v23  ;;  %v7463_v6 = vcombine.low %v5693_v9, %v5701_v13  ;;  %v4532_v16 = vld [vmem:[#allocation8 + $0x30] sm:$0xff]   ;;  %v4540_v44 = vld [vmem:[#allocation10 + $0x20] ss:$8 sps:$4 sm:$0xff]  }
 0x147   : > { %1479 = vmatmul.mubr.bf16.gmra.mrb[16].mxu1 %v3927_v19  ;;  %1389 = vmatprep.mubr.bf16.mxu0 %v3930_v20  ;;  %v708_v19 = vunpack.c.h.bf16 %v5707_v15  ;;  %v769_v20 = vmul.f32 %v705_v1, %v705_v1  ;;  %v776_v11 = vmul.f32 %v712_v26, %v712_v26  ;;  %v849_v25 = vadd.f32 %v774_v56, %v773_v17  ;;  %v4545_v26 = vld [vmem:[#allocation10 + $0x34] ss:$8 sps:$4 sm:$0xff]   ;;  %v4543_v17 = vld [vmem:[#allocation10 + $0x30] ss:$8 sps:$4 sm:$0xff]   ;;  %v4548_v56 = vld [vmem:[#allocation10 + $0x44] ss:$8 sps:$4 sm:$0xff]  }
 0x148   : > { %1486 = vmatprep.mubr.bf16.mxu1 %v3932_v21  ;;  %832 = vadd.xlane.f32.xlu0 %v831_v52  ;;  %v836_v27 = vadd.f32 %v835_v12, %v764_v46  ;;  %v715_v32 = vunpack.c.l.bf16 %v5733_v28  ;;  %v716_v48 = vunpack.c.h.bf16 %v5733_v28  ;;  %v7464_v45 = vcombine.low %v5704_v14, %v5707_v15 }
 0x149   : > { %v772_v21 = vmul.f32 %v708_v19, %v708_v19  ;;  %v844_v39 = vadd.f32 %v770_v41, %v769_v20  ;;  %v7465_v61 = vcombine.high %v5718_v22, %v5721_v23  ;;  %v777_v10 = vmul.f32 %v713_v57, %v713_v57  ;;  %v4546_v57 = vld [vmem:[#allocation10 + $0x40] ss:$8 sps:$4 sm:$0xff]  }
 0x14a   : > { %837 = vadd.xlane.f32.xlu1 %v836_v27  ;;  %v778_v18 = vmul.f32 %v714_v0, %v714_v0  ;;  %v717_v9 = vunpack.c.l.bf16 %v5736_v29  ;;  %v7466_v13 = vcombine.high %v5724_v24, %v5733_v28  ;;  %v850_v51 = vadd.f32 %v849_v25, %v775_v58  ;;  %v4554_v58 = vld [vmem:[#allocation10 + $0x64] ss:$8 sps:$4 sm:$0xff]   ;;  %v4552_v0 = vld [vmem:[#allocation10 + $0x60] ss:$8 sps:$4 sm:$0xff]  }
 0x14b   : > { %v845_v36 = vadd.f32 %v844_v39, %v771_v59  ;;  %v779_v62 = vmul.f32 %v715_v32, %v715_v32  ;;  %v780_v49 = vmul.f32 %v716_v48, %v716_v48  ;;  %v718_v14 = vunpack.c.h.bf16 %v5736_v29  ;;  %v4539_v39 = vld [vmem:[#allocation10 + $0x14] ss:$8 sps:$4 sm:$0xff]  }
 0x14c   : > { %842 = vadd.xlane.f32.xlu0 %v841_v5  ;;  %v854_v15 = vadd.f32 %v778_v18, %v777_v10  ;;  %v719_v63 = vunpack.c.l.bf16 %v5748_v35  ;;  %v720_v54 = vunpack.c.h.bf16 %v5748_v35  ;;  %v781_v50 = vmul.f32 %v717_v9, %v717_v9  ;;  %v4551_v5 = vld [vmem:[#allocation10 + $0x54] ss:$8 sps:$4 sm:$0xff]  }
 0x14d   : > { %v846_v3 = vadd.f32 %v845_v36, %v772_v21  ;;  %v851_v31 = vadd.f32 %v850_v51, %v776_v11  ;;  %v782_v38 = vmul.f32 %v718_v14, %v718_v14  ;;  %v721_v46 = vunpack.c.l.bf16 %v5739_v30  ;;  %v4533_v21 = vld [vmem:[#allocation8 + $0x38] sm:$0xff]  }
 0x14e   : > { %1390 = vmatmul.mubr.bf16.gmra.mrb[20].mxu0 %v7463_v6  ;;  %v722_v4 = vunpack.c.h.bf16 %v5739_v30  ;;  %v855_v47 = vadd.f32 %v854_v15, %v779_v62  ;;  %v783_v55 = vmul.f32 %v719_v63, %v719_v63  ;;  %v784_v43 = vmul.f32 %v720_v54, %v720_v54  ;;  %v4549_v36 = vld [vmem:[#allocation10 + $0x50] ss:$8 sps:$4 sm:$0xff]   ;;  %v4557_v6 = vld [vmem:[#allocation10 + $0x74] ss:$8 sps:$4 sm:$0xff]  }
 0x14f   : > { %1487 = vmatmul.mubr.bf16.gmra.mrb[20].mxu1 %v7464_v45  ;;  %1397 = vmatprep.mubr.bf16.mxu0 %v7465_v61  ;;  %v723_v33 = vunpack.c.l.bf16 %v5751_v37  ;;  %v859_v52 = vadd.f32 %v782_v38, %v781_v50  ;;  %v724_v34 = vunpack.c.h.bf16 %v5751_v37  ;;  %v785_v1 = vmul.f32 %v721_v46, %v721_v46  ;;  %v4555_v11 = vld [vmem:[#allocation10 + $0x70] ss:$8 sps:$4 sm:$0xff]  }
 0x150   : > { %1494 = vmatprep.mubr.bf16.mxu1 %v7466_v13  ;;  %847 = vadd.xlane.f32.xlu1 %v846_v3  ;;  %v786_v2 = vmul.f32 %v722_v4, %v722_v4  ;;  %v856_v12 = vadd.f32 %v855_v47, %v780_v49  ;;  %v7467_v42 = vcombine.low %v5718_v22, %v5721_v23 }
 0x151   : > { %852 = vadd.xlane.f32.xlu0 %v851_v31  ;;  %v787_v40 = vmul.f32 %v723_v33, %v723_v33  ;;  %v860_v7 = vadd.f32 %v859_v52, %v783_v55  ;;  %v788_v8 = vmul.f32 %v724_v34, %v724_v34  ;;  %v7468_v20 = vcombine.low %v5724_v24, %v5733_v28  ;;  %v4530_v28 = vld [vmem:[#allocation8 + $0x20] sm:$0xff]  }
 0x152   : > { %v864_v19 = vadd.f32 %v786_v2, %v785_v1  ;;  %v7469_v41 = vcombine.high %v5736_v29, %v5739_v30  ;;  %v7470_v27 = vcombine.high %v5748_v35, %v5751_v37  ;;  %v3937_v22 = vcombine.low %v5736_v29, %v5739_v30  ;;  %4288 = vmatprep.subr.bf16.mxu0 %v4530_v28  ;;  %v4534_v29 = vld [vmem:[#allocation10] ss:$8 sps:$4 sm:$0xff]   ;;  %v4536_v30 = vld [vmem:[#allocation10 + $0x4] ss:$8 sps:$4 sm:$0xff]  }
 0x153   : > { %v861_v59 = vadd.f32 %v860_v7, %v784_v43  ;;  %v3939_v24 = vcombine.low %v5748_v35, %v5751_v37  ;;  %4289 = vmatpush3.bf16.msra.mxu0 %v4530_v28  ;;  %1858 = vmatprep.subr.bf16.mxu1 %v4536_v30  ;;  %v4537_v35 = vld [vmem:[#allocation10 + $0x10] ss:$8 sps:$4 sm:$0xff]   ;;  %v4542_v37 = vld [vmem:[#allocation10 + $0x24] ss:$8 sps:$4 sm:$0xff]   ;;  %v5891_v33 = vld [vmem:[%s7259_s3] ss:$0 sm:$0xff] }
 0x154   : > { %857 = vadd.xlane.f32.xlu1 %v856_v12  ;;  %v865_v53 = vadd.f32 %v864_v19, %v787_v40  ;;  %4290 = vmatprep.subr.bf16.mxu0 %v4531_v60 }
 0x155   : > { %862 = vadd.xlane.f32.xlu0 %v861_v59  ;;  %1859 = vmatpush1.bf16.msra.mxu1 %v4534_v29 }
 0x156   : > { %1398 = vmatmul.mubr.bf16.gmra.mrb[24].mxu0 %v7467_v42  ;;  %v866_v23 = vadd.f32 %v865_v53, %v788_v8  ;;  %1860 = vmatprep.subr.bf16.mxu1 %v4539_v39 }
 0x157   : > { %1495 = vmatmul.mubr.bf16.gmra.mrb[24].mxu1 %v7468_v20  ;;  %1405 = vmatprep.mubr.bf16.mxu0 %v7469_v41 }
 0x158   : > { %1502 = vmatprep.mubr.bf16.mxu1 %v7470_v27  ;;  %867 = vadd.xlane.f32.xlu1 %v866_v23 }
 0x159   : > { %4291 = vmatpush3.bf16.msra.mxu0 %v4531_v60  ;;  %1861 = vmatpush1.bf16.msra.mxu1 %v4537_v35 }
 0x15a   : > { %4292 = vmatprep.subr.bf16.mxu0 %v4532_v16  ;;  %1862 = vmatprep.subr.bf16.mxu1 %v4542_v37 }
 0x15d   : > { %4293 = vmatpush3.bf16.msra.mxu0 %v4532_v16  ;;  %1863 = vmatpush1.bf16.msra.mxu1 %v4540_v44 }
 0x15e   : > { %1406 = vmatmul.mubr.bf16.gmra.mrb[28].mxu0 %v3937_v22  ;;  %4294 = vmatprep.subr.bf16.mxu0 %v4533_v21 }
 0x15f   : > { %1503 = vmatmul.mubr.bf16.gmra.mrb[28].mxu1 %v3939_v24  ;;  %1864 = vmatprep.subr.bf16.mxu1 %v4545_v26 }
 0x161   : > { %4295 = vmatpush3.bf16.msra.mxu0 %v4533_v21  ;;  %1865 = vmatpush1.bf16.msra.mxu1 %v4543_v17 }
 0x162   : > { %1866 = vmatprep.subr.bf16.mxu1 %v4548_v56 }
 0x165   : > { %1867 = vmatpush1.bf16.msra.mxu1 %v4546_v57 }
 0x166   : > { %1868 = vmatprep.subr.bf16.mxu1 %v4551_v5 }
 0x169   : > { %1869 = vmatpush1.bf16.msra.mxu1 %v4549_v36 }
 0x16a   : > { %1870 = vmatprep.subr.bf16.mxu1 %v4554_v58 }
 0x16d   : > { %1871 = vmatpush1.bf16.msra.mxu1 %v4552_v0 }
 0x16e   : > { %1872 = vmatprep.subr.bf16.mxu1 %v4557_v6 }
 0x171   : > { %1873 = vmatpush1.bf16.msra.mxu1 %v4555_v11 }
 0x1b7   : > { %v793_v25 = vpop.xlane.xlu0 %792 }
 0x1b8   : > { %v869_v48 = vmax.f32 %v793_v25, 1e-24 }
 0x1ba   : > { %4614 = vrsqrt.f32 %v869_v48 }
 0x1c1   : > { %v798_v32 = vpop.xlane.xlu0 %797 }
 0x1c2   : > { %v870_v61 = vmax.f32 %v798_v32, 1e-24 }
 0x1c4   : > { %4616 = vrsqrt.f32 %v870_v61  ;;  %v4615_v31 = vpop.eup %4614 }
 0x1c5   : > { %v803_v45 = vpop.xlane.xlu1 %802 }
 0x1c6   : > { %v871_v10 = vmax.f32 %v803_v45, 1e-24  ;;  %v813_v13 = vpop.xlane.xlu0 %812 }
 0x1c7   : > { %v873_v52 = vmax.f32 %v813_v13, 1e-24 }
 0x1c8   : > { %4618 = vrsqrt.f32 %v871_v10 }
 0x1c9   : > { %v808_v3 = vpop.xlane.xlu1 %807 }
 0x1ca   : > { %v872_v9 = vmax.f32 %v808_v3, 1e-24 }
 0x1cc   : > { %4620 = vrsqrt.f32 %v872_v9 }
 0x1cd   : > { %v818_v4 = vpop.xlane.xlu1 %817  ;;  %4622 = vrsqrt.f32 %v873_v52 }
 0x1ce   : > { %v4617_v43 = vpop.eup %4616  ;;  %v874_v2 = vmax.f32 %v818_v4, 1e-24  ;;  %v823_v40 = vpop.xlane.xlu0 %822 }
 0x1cf   : > { %v875_v39 = vmax.f32 %v823_v40, 1e-24 }
 0x1d0   : > { %4624 = vrsqrt.f32 %v874_v2 }
 0x1d1   : > { %v828_v60 = vpop.xlane.xlu1 %827 }
 0x1d2   : > { %v4619_v16 = vpop.eup %4618  ;;  %v876_v44 = vmax.f32 %v828_v60, 1e-24 }
 0x1d5   : > { %v833_v17 = vpop.xlane.xlu0 %832 }
 0x1d6   : > { %v4621_v30 = vpop.eup %4620 }
 0x1d7   : > { %v4623_v45 = vpop.eup %4622  ;;  %v838_v10 = vpop.xlane.xlu1 %837 }
 0x1f9   : > { %v4136_v18 = vpop.f32.mrb[0].mxu0 }
 0x1fa   : > { %v4200_v51 = vpop.f32.mrb[0].mxu1  ;;  %v4137_v62 = vpop.f32.mrb[1].mxu0 }
 0x1fb   : > { %v4138_v49 = vadd.f32 %v4137_v62, %v4136_v18  ;;  %v4201_v14 = vpop.f32.mrb[1].mxu1  ;;  %v4139_v15 = vpop.f32.mrb[2].mxu0  ;;  %v877_v62 = vmax.f32 %v833_v17, 1e-24 }
 0x1fc   : > { %v4202_v63 = vadd.f32 %v4201_v14, %v4200_v51  ;;  %v4203_v54 = vpop.f32.mrb[2].mxu1  ;;  %v4140_v50 = vpop.f32.mrb[3].mxu0 }
 0x1fd   : > { %v4141_v38 = vadd.f32 %v4140_v50, %v4139_v15  ;;  %v4204_v46 = vpop.f32.mrb[3].mxu1  ;;  %v4625_v18 = vpop.eup %4624 }
 0x1fe   : > { %v1449_v47 = vadd.f32 %v4202_v63, %v4138_v49  ;;  %v4205_v55 = vadd.f32 %v4204_v46, %v4203_v54  ;;  %v878_v63 = vmax.f32 %v838_v10, 1e-24 }
 0x200   : > { %v1511_v34 = vmul.f32 %v4615_v31, %v1449_v47  ;;  %v1452_v1 = vadd.f32 %v4205_v55, %v4141_v38  ;;  %v843_v31 = vpop.xlane.xlu0 %842 }
 0x201   : > { %v4142_v12 = vpop.f32.mrb[4].mxu0 }
 0x202   : > { %v1534_v42 = vadd.f32 %v5891_v33, %v1511_v34  ;;  %v1512_v7 = vmul.f32 %v4617_v43, %v1452_v1  ;;  %v4206_v8 = vpop.f32.mrb[4].mxu1  ;;  %v4143_v19 = vpop.f32.mrb[5].mxu0 }
 0x203   : > { %v4144_v20 = vadd.f32 %v4143_v19, %v4142_v12  ;;  %v4207_v41 = vpop.f32.mrb[5].mxu1  ;;  %v4145_v27 = vpop.f32.mrb[6].mxu0 }
 0x204   : > { %v1535_v59 = vadd.f32 %v5891_v33, %v1512_v7  ;;  %v4208_v53 = vadd.f32 %v4207_v41, %v4206_v8  ;;  %v4209_v22 = vpop.f32.mrb[6].mxu1  ;;  %v4146_v23 = vpop.f32.mrb[7].mxu0  ;;  %4626 = vtanh.f32 %v1534_v42 }
 0x205   : > { %v4147_v24 = vadd.f32 %v4146_v23, %v4145_v27  ;;  %v4210_v28 = vpop.f32.mrb[7].mxu1  ;;  %v848_v8 = vpop.xlane.xlu1 %847 }
 0x206   : > { %4628 = vtanh.f32 %v1535_v59  ;;  %v1457_v21 = vadd.f32 %v4208_v53, %v4144_v20  ;;  %v4211_v29 = vadd.f32 %v4210_v28, %v4209_v22  ;;  %v879_v59 = vmax.f32 %v843_v31, 1e-24 }
 0x207   : > { %4630 = vrsqrt.f32 %v875_v39 }
 0x208   : > { %v1513_v35 = vmul.f32 %v4619_v16, %v1457_v21  ;;  %v1460_v37 = vadd.f32 %v4211_v29, %v4147_v24  ;;  %4632 = vrsqrt.f32 %v876_v44  ;;  %v880_v24 = vmax.f32 %v848_v8, 1e-24  ;;  %v853_v16 = vpop.xlane.xlu0 %852 }
 0x209   : > { %v4148_v26 = vpop.f32.mrb[8].mxu0 }
 0x20a   : > { %v1536_v56 = vadd.f32 %v5891_v33, %v1513_v35  ;;  %v1514_v57 = vmul.f32 %v4621_v30, %v1460_v37  ;;  %v4212_v5 = vpop.f32.mrb[8].mxu1  ;;  %v4149_v36 = vpop.f32.mrb[9].mxu0 }
 0x20b   : > { %v4150_v58 = vadd.f32 %v4149_v36, %v4148_v26  ;;  %v4213_v0 = vpop.f32.mrb[9].mxu1  ;;  %v4151_v6 = vpop.f32.mrb[10].mxu0 }
 0x20c   : > { %v1537_v11 = vadd.f32 %v5891_v33, %v1514_v57  ;;  %v4214_v25 = vadd.f32 %v4213_v0, %v4212_v5  ;;  %v4215_v32 = vpop.f32.mrb[10].mxu1  ;;  %v4152_v48 = vpop.f32.mrb[11].mxu0  ;;  %4634 = vtanh.f32 %v1536_v56 }
 0x20d   : > { %v4153_v61 = vadd.f32 %v4152_v48, %v4151_v6  ;;  %v4216_v3 = vpop.f32.mrb[11].mxu1  ;;  %v858_v0 = vpop.xlane.xlu1 %857  ;;  %v881_v48 = vmax.f32 %v853_v16, 1e-24 }
 0x20e   : > { %4636 = vtanh.f32 %v1537_v11  ;;  %v1465_v9 = vadd.f32 %v4214_v25, %v4150_v58  ;;  %v4217_v13 = vadd.f32 %v4216_v3, %v4215_v32  ;;  %v4627_v51 = vpop.eup %4626  ;;  %v882_v10 = vmax.f32 %v858_v0, 1e-24 }
 0x20f   : > { %4638 = vrsqrt.f32 %v877_v62 }
 0x210   : > { %v4629_v49 = vpop.eup %4628  ;;  %v1515_v14 = vmul.f32 %v4623_v45, %v1465_v9  ;;  %v1468_v15 = vadd.f32 %v4217_v13, %v4153_v61  ;;  %4640 = vrsqrt.f32 %v878_v63  ;;  %v863_v13 = vpop.xlane.xlu0 %862 }
 0x211   : > { %v4154_v54 = vpop.f32.mrb[12].mxu0  ;;  %v1566_v50 = vpack.c.bf16 %v4629_v49, %v4627_v51  ;;  %v4631_v40 = vpop.eup %4630 }
 0x212   : > { %v1538_v38 = vadd.f32 %v5891_v33, %v1515_v14  ;;  %v1516_v46 = vmul.f32 %v4625_v18, %v1468_v15  ;;  %v4218_v4 = vpop.f32.mrb[12].mxu1  ;;  %v4155_v47 = vpop.f32.mrb[13].mxu0 }
 0x213   : > { %v4156_v55 = vadd.f32 %v4155_v47, %v4154_v54  ;;  %v4219_v43 = vpop.f32.mrb[13].mxu1  ;;  %4296 = vmatprep.mubr.bf16.mxu0 %v1566_v50  ;;  %v4157_v52 = vpop.f32.mrb[14].mxu0 }
 0x214   : > { %v1539_v34 = vadd.f32 %v5891_v33, %v1516_v46  ;;  %v4220_v1 = vadd.f32 %v4219_v43, %v4218_v4  ;;  %v4221_v2 = vpop.f32.mrb[14].mxu1  ;;  %v4158_v12 = vpop.f32.mrb[15].mxu0  ;;  %4642 = vtanh.f32 %v1538_v38 }
 0x215   : > { %v4159_v42 = vadd.f32 %v4158_v12, %v4157_v52  ;;  %v4222_v7 = vpop.f32.mrb[15].mxu1  ;;  %v4633_v19 = vpop.eup %4632  ;;  %v883_v12 = vmax.f32 %v863_v13, 1e-24 }
 0x216   : > { %4644 = vtanh.f32 %v1539_v34  ;;  %v1473_v20 = vadd.f32 %v4220_v1, %v4156_v55  ;;  %v4223_v41 = vadd.f32 %v4222_v7, %v4221_v2  ;;  %v4635_v27 = vpop.eup %4634  ;;  %v868_v43 = vpop.xlane.xlu1 %867 }
 0x217   : > { %4646 = vrsqrt.f32 %v879_v59  ;;  %v884_v8 = vmax.f32 %v868_v43, 1e-24 }
 0x218   : > { %v4637_v53 = vpop.eup %4636  ;;  %v1517_v22 = vmul.f32 %v4631_v40, %v1473_v20  ;;  %v1476_v23 = vadd.f32 %v4223_v41, %v4159_v42  ;;  %4648 = vrsqrt.f32 %v880_v24 }
 0x219   : > { %v4160_v28 = vpop.f32.mrb[16].mxu0  ;;  %v1567_v60 = vpack.c.bf16 %v4637_v53, %v4635_v27  ;;  %v4639_v5 = vpop.eup %4638 }
 0x21a   : > { %v1540_v21 = vadd.f32 %v5891_v33, %v1517_v22  ;;  %v1518_v29 = vmul.f32 %v4633_v19, %v1476_v23  ;;  %v4224_v30 = vpop.f32.mrb[16].mxu1  ;;  %v4161_v39 = vpop.f32.mrb[17].mxu0 }
 0x21b   : > { %v4162_v35 = vadd.f32 %v4161_v39, %v4160_v28  ;;  %v4225_v37 = vpop.f32.mrb[17].mxu1  ;;  %4297 = vmatmul.mubr.bf16.vlgmr.msra.gmra.mrb[32].mxu0 %v1567_v60  ;;  %v4163_v44 = vpop.f32.mrb[18].mxu0 }
 0x21c   : > { %v1541_v26 = vadd.f32 %v5891_v33, %v1518_v29  ;;  %v4226_v17 = vadd.f32 %v4225_v37, %v4224_v30  ;;  %v4227_v56 = vpop.f32.mrb[18].mxu1  ;;  %v4164_v57 = vpop.f32.mrb[19].mxu0  ;;  %4650 = vtanh.f32 %v1540_v21 }
 0x21d   : > { %v4165_v36 = vadd.f32 %v4164_v57, %v4163_v44  ;;  %v4228_v58 = vpop.f32.mrb[19].mxu1  ;;  %v4641_v6 = vpop.eup %4640 }
 0x21e   : > { %4652 = vtanh.f32 %v1541_v26  ;;  %v1481_v11 = vadd.f32 %v4226_v17, %v4162_v35  ;;  %v4229_v25 = vadd.f32 %v4228_v58, %v4227_v56  ;;  %v4643_v32 = vpop.eup %4642 }
 0x21f   : > { %4654 = vrsqrt.f32 %v881_v48 }
 0x220   : > { %v4645_v45 = vpop.eup %4644  ;;  %v1519_v61 = vmul.f32 %v4639_v5, %v1481_v11  ;;  %v1484_v3 = vadd.f32 %v4229_v25, %v4165_v36  ;;  %4656 = vrsqrt.f32 %v882_v10 }
 0x221   : > { %v4166_v18 = vpop.f32.mrb[20].mxu0  ;;  %v1568_v9 = vpack.c.bf16 %v4645_v45, %v4643_v32  ;;  %v4647_v4 = vpop.eup %4646 }
 0x222   : > { %v1542_v51 = vadd.f32 %v5891_v33, %v1519_v61  ;;  %v1520_v62 = vmul.f32 %v4641_v6, %v1484_v3  ;;  %v4230_v49 = vpop.f32.mrb[20].mxu1  ;;  %v4167_v14 = vpop.f32.mrb[21].mxu0 }
 0x223   : > { %v4168_v15 = vadd.f32 %v4167_v14, %v4166_v18  ;;  %v4231_v63 = vpop.f32.mrb[21].mxu1  ;;  %4300 = vmatprep.mubr.bf16.mxu0 %v1568_v9  ;;  %v4169_v54 = vpop.f32.mrb[22].mxu0 }
 0x224   : > { %v1543_v50 = vadd.f32 %v5891_v33, %v1520_v62  ;;  %v4232_v31 = vadd.f32 %v4231_v63, %v4230_v49  ;;  %v4233_v38 = vpop.f32.mrb[22].mxu1  ;;  %v4170_v46 = vpop.f32.mrb[23].mxu0  ;;  %4658 = vtanh.f32 %v1542_v51 }
 0x225   : > { %v4171_v47 = vadd.f32 %v4170_v46, %v4169_v54  ;;  %v4234_v55 = vpop.f32.mrb[23].mxu1  ;;  %v4649_v52 = vpop.eup %4648 }
 0x226   : > { %4660 = vtanh.f32 %v1543_v50  ;;  %v1489_v34 = vadd.f32 %v4232_v31, %v4168_v15  ;;  %v4235_v1 = vadd.f32 %v4234_v55, %v4233_v38  ;;  %v4651_v2 = vpop.eup %4650 }
 0x227   : > { %4662 = vrsqrt.f32 %v883_v12  ;;  %v4570_v12 = vld [vmem:[#allocation11] ss:$16 sps:$4 sm:$0xff]  }
 0x228   : > { %v4653_v40 = vpop.eup %4652  ;;  %v1521_v42 = vmul.f32 %v4647_v4, %v1489_v34  ;;  %v1492_v7 = vadd.f32 %v4235_v1, %v4171_v47  ;;  %4664 = vrsqrt.f32 %v884_v8  ;;  %v5199_v1 = vmov 0   ;;  %v4579_v8 = vld [vmem:[#allocation11 + $0x40] ss:$16 sps:$4 sm:$0xff]  }
 0x229   : > { %v4172_v19 = vpop.f32.mrb[24].mxu0  ;;  %v1569_v20 = vpack.c.bf16 %v4653_v40, %v4651_v2  ;;  %v4655_v29 = vpop.eup %4654  ;;  %1890 = vmatprep.mubr.bf16.mxu1 %v5199_v1  ;;  %v4560_v2 = vld [vmem:[#allocation11 + $0xc] ss:$16 sps:$4 sm:$0xff]   ;;  %v4572_v40 = vld [vmem:[#allocation11 + $0x4] ss:$16 sps:$4 sm:$0xff]  }
 0x22a   : > { %v1544_v41 = vadd.f32 %v5891_v33, %v1521_v42  ;;  %v1522_v27 = vmul.f32 %v4649_v52, %v1492_v7  ;;  %v4236_v59 = vpop.f32.mrb[24].mxu1  ;;  %v4173_v53 = vpop.f32.mrb[25].mxu0  ;;  %2338 = vmatprep.subr.bf16.mxu1 %v4560_v2  ;;  %2225 = vmatprep.subr.bf16.mxu0 %v4572_v40  ;;  %v4576_v42 = vld [vmem:[#allocation11 + $0x20] ss:$16 sps:$4 sm:$0xff]   ;;  %v4581_v7 = vld [vmem:[#allocation11 + $0x44] ss:$16 sps:$4 sm:$0xff]  }
 0x22b   : > { %v4174_v22 = vadd.f32 %v4173_v53, %v4172_v19  ;;  %v4237_v23 = vpop.f32.mrb[25].mxu1  ;;  %4301 = vmatmul.mubr.bf16.gmra.mrb[36].mxu0 %v1569_v20  ;;  %v4175_v24 = vpop.f32.mrb[26].mxu0  ;;  %v4587_v19 = vld [vmem:[#allocation11 + $0x64] ss:$16 sps:$4 sm:$0xff]   ;;  %v4585_v20 = vld [vmem:[#allocation11 + $0x60] ss:$16 sps:$4 sm:$0xff]  }
 0x22c   : > { %v1545_v28 = vadd.f32 %v5891_v33, %v1522_v27  ;;  %v4238_v60 = vadd.f32 %v4237_v23, %v4236_v59  ;;  %v4239_v16 = vpop.f32.mrb[26].mxu1  ;;  %v4176_v21 = vpop.f32.mrb[27].mxu0  ;;  %4666 = vtanh.f32 %v1544_v41  ;;  %2226 = vmatpush1.bf16.msra.mxu0 %v4570_v12  ;;  %v5914_v27 = vld [vmem:[%s7261_s5] ss:$0 sm:$0xff]  ;;  %v4596_v2 = vld [vmem:[#allocation11 + $0xa4] ss:$16 sps:$4 sm:$0xff]  }
 0x22d   : > { %v4177_v30 = vadd.f32 %v4176_v21, %v4175_v24  ;;  %v4240_v39 = vpop.f32.mrb[27].mxu1  ;;  %v4657_v35 = vpop.eup %4656  ;;  %v4558_v21 = vld [vmem:[#allocation11 + $0x8] ss:$16 sps:$4 sm:$0xff]   ;;  %v4594_v12 = vld [vmem:[#allocation11 + $0xa0] ss:$16 sps:$4 sm:$0xff]  }
 0x22e   : > { %4668 = vtanh.f32 %v1545_v28  ;;  %v1497_v37 = vadd.f32 %v4238_v60, %v4174_v22  ;;  %v4241_v44 = vadd.f32 %v4240_v39, %v4239_v16  ;;  %v4659_v26 = vpop.eup %4658  ;;  %v4561_v39 = vld [vmem:[#allocation11 + $0x28] ss:$16 sps:$4 sm:$0xff]  }
 0x22f   : > { %v4591_v40 = vld [vmem:[#allocation11 + $0xc8] ss:$16 sps:$4 sm:$0xff]  }
 0x230   : > { %v4661_v17 = vpop.eup %4660  ;;  %v1523_v56 = vmul.f32 %v4655_v29, %v1497_v37  ;;  %v1500_v57 = vadd.f32 %v4241_v44, %v4177_v30  ;;  %v4563_v30 = vld [vmem:[#allocation11 + $0x2c] ss:$16 sps:$4 sm:$0xff]   ;;  %v4564_v37 = vld [vmem:[#allocation11 + $0x48] ss:$16 sps:$4 sm:$0xff]  }
 0x231   : > { %v4178_v5 = vpop.f32.mrb[28].mxu0  ;;  %v1570_v36 = vpack.c.bf16 %v4661_v17, %v4659_v26  ;;  %v4663_v18 = vpop.eup %4662  ;;  %v4569_v44 = vld [vmem:[#allocation11 + $0x6c] ss:$16 sps:$4 sm:$0xff]  }
 0x232   : > { %v1546_v58 = vadd.f32 %v5891_v33, %v1523_v56  ;;  %v1524_v0 = vmul.f32 %v4657_v35, %v1500_v57  ;;  %v4242_v6 = vpop.f32.mrb[28].mxu1  ;;  %v4179_v11 = vpop.f32.mrb[29].mxu0  ;;  %v4566_v35 = vld [vmem:[#allocation11 + $0x4c] ss:$16 sps:$4 sm:$0xff]   ;;  %v4567_v56 = vld [vmem:[#allocation11 + $0x68] ss:$16 sps:$4 sm:$0xff]  }
 0x233   : > { %v4180_v25 = vadd.f32 %v4179_v11, %v4178_v5  ;;  %v4243_v32 = vpop.f32.mrb[29].mxu1  ;;  %4304 = vmatprep.mubr.bf16.mxu0 %v1570_v36  ;;  %v4181_v48 = vpop.f32.mrb[30].mxu0  ;;  %v4575_v5 = vld [vmem:[#allocation11 + $0x8c] ss:$16 sps:$4 sm:$0xff]  }
 0x234   : > { %v1547_v45 = vadd.f32 %v5891_v33, %v1524_v0  ;;  %v4244_v61 = vadd.f32 %v4243_v32, %v4242_v6  ;;  %v4245_v3 = vpop.f32.mrb[30].mxu1  ;;  %v4182_v10 = vpop.f32.mrb[31].mxu0  ;;  %4670 = vtanh.f32 %v1546_v58  ;;  %v4573_v32 = vld [vmem:[#allocation11 + $0x88] ss:$16 sps:$4 sm:$0xff]  }
 0x235   : > { %v4183_v9 = vadd.f32 %v4182_v10, %v4181_v48  ;;  %v4246_v13 = vpop.f32.mrb[31].mxu1  ;;  %v4665_v51 = vpop.eup %4664 }
 0x236   : > { %4672 = vtanh.f32 %v1547_v45  ;;  %v1505_v62 = vadd.f32 %v4244_v61, %v4180_v25  ;;  %v4247_v49 = vadd.f32 %v4246_v13, %v4245_v3  ;;  %v4667_v14 = vpop.eup %4666  ;;  %v4584_v45 = vld [vmem:[#allocation11 + $0xac] ss:$16 sps:$4 sm:$0xff]   ;;  %v4582_v61 = vld [vmem:[#allocation11 + $0xa8] ss:$16 sps:$4 sm:$0xff]  }
 0x238   : > { %v4669_v15 = vpop.eup %4668  ;;  %v1525_v63 = vmul.f32 %v4663_v18, %v1505_v62  ;;  %v1508_v54 = vadd.f32 %v4247_v49, %v4183_v9 }
 0x239   : > { %v1571_v50 = vpack.c.bf16 %v4669_v15, %v4667_v14 }
 0x23a   : > { %v1548_v31 = vadd.f32 %v5891_v33, %v1525_v63  ;;  %v1526_v38 = vmul.f32 %v4665_v51, %v1508_v54 }
 0x23b   : > { %4305 = vmatmul.mubr.bf16.gmra.mrb[40].mxu0 %v1571_v50 }
 0x23c   : > { %v1549_v46 = vadd.f32 %v5891_v33, %v1526_v38  ;;  %4674 = vtanh.f32 %v1548_v31  ;;  %v4578_v33 = vld [vmem:[#allocation11 + $0x24] ss:$16 sps:$4 sm:$0xff]  }
 0x23d   : > { %2227 = vmatprep.subr.bf16.mxu0 %v4578_v33  ;;  %v4593_v33 = vld [vmem:[#allocation11 + $0xcc] ss:$16 sps:$4 sm:$0xff]  }
 0x23e   : > { %4676 = vtanh.f32 %v1549_v46  ;;  %v4671_v4 = vpop.eup %4670  ;;  %2228 = vmatpush1.bf16.msra.mxu0 %v4576_v42  ;;  %v4599_v42 = vld [vmem:[#allocation11 + $0xc4] ss:$16 sps:$4 sm:$0xff]  }
 0x23f   : > { %2229 = vmatprep.subr.bf16.mxu0 %v4581_v7  ;;  %v4597_v7 = vld [vmem:[#allocation11 + $0xc0] ss:$16 sps:$4 sm:$0xff]  }
 0x240   : > { %v4673_v47 = vpop.eup %4672 }
 0x241   : > { %v1572_v55 = vpack.c.bf16 %v4673_v47, %v4671_v4 }
 0x242   : > { %2230 = vmatpush1.bf16.msra.mxu0 %v4579_v8  ;;  %v4602_v8 = vld [vmem:[#allocation11 + $0xec] ss:$16 sps:$4 sm:$0xff]  }
 0x243   : > { %4308 = vmatprep.mubr.bf16.mxu0 %v1572_v55  ;;  %2231 = vmatprep.subr.bf16.mxu0 %v4587_v19  ;;  %v4605_v19 = vld [vmem:[#allocation11 + $0xe4] ss:$16 sps:$4 sm:$0xff]  }
 0x246   : > { %v4675_v43 = vpop.eup %4674  ;;  %2232 = vmatpush1.bf16.msra.mxu0 %v4585_v20  ;;  %v4600_v20 = vld [vmem:[#allocation11 + $0xe8] ss:$16 sps:$4 sm:$0xff]  }
 0x248   : > { %v4677_v52 = vpop.eup %4676 }
 0x249   : > { %v1573_v34 = vpack.c.bf16 %v4677_v52, %v4675_v43  ;;  %v4590_v52 = vld [vmem:[#allocation11 + $0x84] ss:$16 sps:$4 sm:$0xff]  }
 0x24a   : > { %2233 = vmatprep.subr.bf16.mxu0 %v4590_v52 }
 0x24b   : > { %4309 = vmatmul.mubr.bf16.gmra.mrb[44].mxu0 %v1573_v34  ;;  %v4588_v34 = vld [vmem:[#allocation11 + $0x80] ss:$16 sps:$4 sm:$0xff]  }
 0x24c   : > { %2257 = vmatprep.mubr.bf16.mxu0 %v5199_v1  ;;  %2234 = vmatpush1.bf16.msra.mxu0 %v4588_v34  ;;  %v4609_v34 = vld [vmem:[#allocation13 + $0x18] sm:$0xff]  }
 0x24d   : > { %2235 = vmatprep.subr.bf16.mxu0 %v4596_v2 }
 0x250   : > { %2236 = vmatpush1.bf16.msra.mxu0 %v4594_v12 }
 0x251   : > { %2237 = vmatprep.subr.bf16.mxu0 %v4599_v42 }
 0x254   : > { %2238 = vmatpush1.bf16.msra.mxu0 %v4597_v7  ;;  %v4610_v7 = vld [vmem:[#allocation13 + $0x20] sm:$0xff]  }
 0x255   : > { %2239 = vmatprep.subr.bf16.mxu0 %v4605_v19 }
 0x2ee   : > { %v4298_v41 = vpop.f32.mrb[32].mxu0 }
 0x2ef   : > { %v1679_v59 = vpop.f32.mrb[33].mxu0  ;;  %v1688_v22 = vadd.f32 %v4298_v41, %v5914_v27  ;;  %v4603_v41 = vld [vmem:[#allocation11 + $0xe0] ss:$16 sps:$4 sm:$0xff]  }
 0x2f0   : > { %v4299_v53 = vpop.f32.mrb[34].mxu0  ;;  %v1680_v28 = vadd.f32 %v5914_v27, %v1679_v59  ;;  %2240 = vmatpush1.bf16.msra.mxu0 %v4603_v41  ;;  %v1768_v59 = vlaneseq }
 0x2f1   : > { %v1691_v23 = vadd.f32 %v4299_v53, %v5914_v27  ;;  %v1682_v24 = vpop.f32.mrb[35].mxu0 }
 0x2f2   : > { %v1683_v60 = vadd.f32 %v5914_v27, %v1682_v24  ;;  %v5940_v53 = vshrl.u32 %v1768_v59, 7 }
 0x2f3   : > { %v1743_v16 = vpack.c.bf16 %v1691_v23, %v1688_v22  ;;  %v1766_v23 = vld [vmem:[%s7471_s4] sm:$0x3]  ;;  %s5074_s4 = sshll.u32 %s5200_s24, 4  ;;  %s5075_s4 = int_to_ptr.vmem [resolvable:$false] %s5074_s4 }
 0x2f4   : > { %v1742_v29 = vpack.c.bf16 %v1683_v60, %v1680_v28  ;;  %v1770_v22 = vsub.s32 0, %v5940_v53  ;;  %v1774_v24 = vsub.s32 1, %v5940_v53  ;;  %s5076_s25 = scalar_lea.vmem %s5075_s4, 8192  ;;  %p5077_p5 = scmp.lt.s32.totalorder %s7089_s26, %s5075_s4 }
 0x2f5   : > { %p5078_p9 = scmp.lt.s32.totalorder %s5076_s25, %s5070_s18 }
 0x2f6   : > { %1891 = vmatmul.mubr.bf16.vlgmr.msra.gmra.mrb[32].mxu1 %v1742_v29  ;;  %v5949_v28 = vrot.slane %v1766_v23, %v1770_v22  ;;  %v5953_v60 = vrot.slane %v1766_v23, %v1774_v24 }
 0x2f7   : > { %1900 = vmatprep.mubr.bf16.mxu1 %v5199_v1  ;;  %2339 = vmatpush1.bf16.msra.mxu1 %v4558_v21  ;;  %p5079_p4 = por %p5078_p9, %p5077_p5 }
 0x2f8   : > { %2340 = vmatprep.subr.bf16.mxu1 %v4563_v30 }
 0x2f9   : > { %p5080_p8 = pnand %p5079_p4, %p5073_p10 }
 0x2fb   : > { %2341 = vmatpush1.bf16.msra.mxu1 %v4561_v39 }
 0x2fc   : > { %2342 = vmatprep.subr.bf16.mxu1 %v4566_v35 }
 0x2fe   : > { %v4302_v26 = vpop.f32.mrb[36].mxu0  ;;  %1901 = vmatmul.mubr.bf16.gmra.mrb[36].mxu1 %v1743_v16 }
 0x2ff   : > { %v1695_v17 = vpop.f32.mrb[37].mxu0  ;;  %1910 = vmatprep.mubr.bf16.mxu1 %v5199_v1  ;;  %2343 = vmatpush1.bf16.msra.mxu1 %v4564_v37  ;;  %v1704_v36 = vadd.f32 %v4302_v26, %v5914_v27 }
 0x300   : > { %v4303_v57 = vpop.f32.mrb[38].mxu0  ;;  %2344 = vmatprep.subr.bf16.mxu1 %v4569_v44  ;;  %v1696_v6 = vadd.f32 %v5914_v27, %v1695_v17 }
 0x301   : > { %v1707_v58 = vadd.f32 %v4303_v57, %v5914_v27  ;;  %v1698_v0 = vpop.f32.mrb[39].mxu0 }
 0x302   : > { %v1699_v11 = vadd.f32 %v5914_v27, %v1698_v0 }
 0x303   : > { %v1745_v25 = vpack.c.bf16 %v1707_v58, %v1704_v36  ;;  %2345 = vmatpush1.bf16.msra.mxu1 %v4567_v56 }
 0x304   : > { %v1744_v48 = vpack.c.bf16 %v1699_v11, %v1696_v6  ;;  %2346 = vmatprep.subr.bf16.mxu1 %v4575_v5 }
 0x306   : > { %1911 = vmatmul.mubr.bf16.gmra.mrb[40].mxu1 %v1744_v48 }
 0x307   : > { %1920 = vmatprep.mubr.bf16.mxu1 %v5199_v1  ;;  %2347 = vmatpush1.bf16.msra.mxu1 %v4573_v32 }
 0x308   : > { %2348 = vmatprep.subr.bf16.mxu1 %v4584_v45 }
 0x30b   : > { %2349 = vmatpush1.bf16.msra.mxu1 %v4582_v61 }
 0x30c   : > { %2350 = vmatprep.subr.bf16.mxu1 %v4593_v33 }
 0x30e   : > { %v4306_v3 = vpop.f32.mrb[40].mxu0  ;;  %1921 = vmatmul.mubr.bf16.gmra.mrb[44].mxu1 %v1745_v25 }
 0x30f   : > { %v1711_v10 = vpop.f32.mrb[41].mxu0  ;;  %1930 = vmatprep.mubr.bf16.mxu1 %v5199_v1  ;;  %v1720_v9 = vadd.f32 %v4306_v3, %v5914_v27  ;;  %2351 = vmatpush1.bf16.msra.mxu1 %v4591_v40 }
 0x310   : > { %v4307_v18 = vpop.f32.mrb[42].mxu0  ;;  %v1712_v62 = vadd.f32 %v5914_v27, %v1711_v10  ;;  %2352 = vmatprep.subr.bf16.mxu1 %v4602_v8 }
 0x311   : > { %v1723_v13 = vadd.f32 %v4307_v18, %v5914_v27  ;;  %v1714_v51 = vpop.f32.mrb[43].mxu0 }
 0x312   : > { %v1715_v49 = vadd.f32 %v5914_v27, %v1714_v51  ;;  %v4607_v51 = vld [vmem:[#allocation13 + $0x8] sm:$0xff]  }
 0x313   : > { %v1747_v14 = vpack.c.bf16 %v1723_v13, %v1720_v9  ;;  %2353 = vmatpush1.bf16.msra.mxu1 %v4600_v20 }
 0x314   : > { %v1746_v15 = vpack.c.bf16 %v1715_v49, %v1712_v62 }
 0x316   : > { %1931 = vmatmul.mubr.bf16.gmra.mrb[48].mxu1 %v1746_v15 }
 0x317   : > { %1940 = vmatprep.mubr.bf16.mxu1 %v5199_v1 }
 0x31e   : > { %v4310_v63 = vpop.f32.mrb[44].mxu0  ;;  %1941 = vmatmul.mubr.bf16.gmra.mrb[52].mxu1 %v1747_v14 }
 0x31f   : > { %v1727_v54 = vpop.f32.mrb[45].mxu0  ;;  %1950 = vmatprep.mubr.bf16.mxu1 %v5199_v1  ;;  %v1736_v31 = vadd.f32 %v4310_v63, %v5914_v27 }
 0x320   : > { %v4311_v50 = vpop.f32.mrb[46].mxu0  ;;  %v1728_v4 = vadd.f32 %v5914_v27, %v1727_v54  ;;  %v4608_v54 = vld [vmem:[#allocation13 + $0x10] sm:$0xff]  }
 0x321   : > { %v1739_v38 = vadd.f32 %v4311_v50, %v5914_v27  ;;  %v1730_v46 = vpop.f32.mrb[47].mxu0 }
 0x322   : > { %v1731_v47 = vadd.f32 %v5914_v27, %v1730_v46  ;;  %v4606_v27 = vld [vmem:[#allocation13] sm:$0xff]  }
 0x323   : > { %v1749_v55 = vpack.c.bf16 %v1739_v38, %v1736_v31  ;;  %4312 = vmatprep.subr.bf16.mxu0 %v4606_v27 }
 0x324   : > { %v1748_v43 = vpack.c.bf16 %v1731_v47, %v1728_v4 }
 0x326   : > { %1951 = vmatmul.mubr.bf16.gmra.mrb[56].mxu1 %v1748_v43 }
 0x327   : > { %1960 = vmatprep.mubr.bf16.mxu1 %v5199_v1 }
 0x32e   : > { %1961 = vmatmul.mubr.bf16.gmra.mrb[60].mxu1 %v1749_v55 }
 0x32f   : > { %2370 = vmatprep.mubr.bf16.mxu1 %v5199_v1 }
 0x3c9   : > { %v1892_v16 = vpop.f32.mrb[32].mxu1 }
 0x3ca   : > { %v1893_v21 = vadd.f32 %v1892_v16, %v5949_v28  ;;  %v1894_v29 = vpop.f32.mrb[33].mxu1 }
 0x3cb   : > { %v1895_v30 = vadd.f32 %v1894_v29, %v5953_v60  ;;  %v1896_v39 = vpop.f32.mrb[34].mxu1  ;;  %v4611_v29 = vld [vmem:[#allocation13 + $0x28] sm:$0xff]  }
 0x3cc   : > { %v1897_v35 = vadd.f32 %v1896_v39, %v5949_v28  ;;  %v1898_v37 = vpop.f32.mrb[35].mxu1  ;;  %4678 = vtanh.f32 %v1893_v21 }
 0x3cd   : > { %v1899_v44 = vadd.f32 %v1898_v37, %v5953_v60  ;;  %v1987_v26 = vmax.f32 %v1895_v30, 0.0 }
 0x3ce   : > { %4680 = vtanh.f32 %v1897_v35 }
 0x3cf   : > { %v1988_v17 = vmax.f32 %v1899_v44, 0.0 }
 0x3d1   : > { %v5959_v56 = vpack.c.bf16 %v1988_v17, %v1987_v26  ;;  %v1902_v57 = vpop.f32.mrb[36].mxu1  ;;  %v4612_v26 = vld [vmem:[#allocation13 + $0x30] sm:$0xff]  }
 0x3d2   : > { %v1903_v5 = vadd.f32 %v1902_v57, %v5949_v28  ;;  %v1904_v36 = vpop.f32.mrb[37].mxu1 }
 0x3d3   : > { %v1905_v58 = vadd.f32 %v1904_v36, %v5953_v60  ;;  %v1906_v0 = vpop.f32.mrb[38].mxu1 }
 0x3d4   : > { %v1907_v6 = vadd.f32 %v1906_v0, %v5949_v28  ;;  %v1908_v11 = vpop.f32.mrb[39].mxu1  ;;  %4682 = vtanh.f32 %v1903_v5 }
 0x3d5   : > { %v1909_v25 = vadd.f32 %v1908_v11, %v5953_v60  ;;  %v1989_v48 = vmax.f32 %v1905_v58, 0.0 }
 0x3d6   : > { %4684 = vtanh.f32 %v1907_v6  ;;  %v4679_v32 = vpop.eup %4678 }
 0x3d7   : > { %v1990_v45 = vmax.f32 %v1909_v25, 0.0 }
 0x3d8   : > { %v4681_v61 = vpop.eup %4680 }
 0x3d9   : > { %v5965_v3 = vpack.c.bf16 %v1990_v45, %v1989_v48  ;;  %v1912_v10 = vpop.f32.mrb[40].mxu1  ;;  %v2003_v18 = vpack.c.bf16 %v4681_v61, %v4679_v32  ;;  %v4613_v32 = vld [vmem:[#allocation13 + $0x38] sm:$0xff]  }
 0x3da   : > { %v1913_v9 = vadd.f32 %v1912_v10, %v5949_v28  ;;  %v1914_v13 = vpop.f32.mrb[41].mxu1 }
 0x3db   : > { %v1915_v62 = vadd.f32 %v1914_v13, %v5953_v60  ;;  %v1916_v49 = vpop.f32.mrb[42].mxu1  ;;  %2258 = vmatmul.mubr.bf16.vlgmr.msra.gmra.mrb[48].mxu0 %v2003_v18  ;;  %2371 = vmatmul.mubr.bf16.vlgmr.msra.gmra.mrb[64].mxu1 %v2003_v18 }
 0x3dc   : > { %v1917_v14 = vadd.f32 %v1916_v49, %v5949_v28  ;;  %v1918_v15 = vpop.f32.mrb[43].mxu1  ;;  %2267 = vmatprep.mubr.bf16.mxu0 %v5199_v1  ;;  %2380 = vmatprep.mubr.bf16.mxu1 %v5199_v1  ;;  %4686 = vtanh.f32 %v1913_v9 }
 0x3dd   : > { %v1919_v63 = vadd.f32 %v1918_v15, %v5953_v60  ;;  %4313 = vmatpush3.bf16.msra.mxu0 %v4606_v27  ;;  %v1991_v31 = vmax.f32 %v1915_v62, 0.0 }
 0x3de   : > { %4688 = vtanh.f32 %v1917_v14  ;;  %4314 = vmatprep.subr.bf16.mxu0 %v4607_v51  ;;  %v4683_v50 = vpop.eup %4682 }
 0x3df   : > { %v1992_v38 = vmax.f32 %v1919_v63, 0.0 }
 0x3e0   : > { %v4685_v46 = vpop.eup %4684 }
 0x3e1   : > { %v5973_v4 = vpack.c.bf16 %v1992_v38, %v1991_v31  ;;  %v1922_v47 = vpop.f32.mrb[44].mxu1  ;;  %v2004_v55 = vpack.c.bf16 %v4685_v46, %v4683_v50  ;;  %4315 = vmatpush3.bf16.msra.mxu0 %v4607_v51 }
 0x3e2   : > { %v1923_v43 = vadd.f32 %v1922_v47, %v5949_v28  ;;  %v1924_v52 = vpop.f32.mrb[45].mxu1  ;;  %4316 = vmatprep.subr.bf16.mxu0 %v4608_v54 }
 0x3e3   : > { %v1925_v2 = vadd.f32 %v1924_v52, %v5953_v60  ;;  %v1926_v12 = vpop.f32.mrb[46].mxu1  ;;  %2268 = vmatmul.mubr.bf16.gmra.mrb[52].mxu0 %v2004_v55  ;;  %2381 = vmatmul.mubr.bf16.gmra.mrb[68].mxu1 %v2004_v55 }
 0x3e4   : > { %v1927_v40 = vadd.f32 %v1926_v12, %v5949_v28  ;;  %v1928_v33 = vpop.f32.mrb[47].mxu1  ;;  %2277 = vmatprep.mubr.bf16.mxu0 %v5199_v1  ;;  %2390 = vmatprep.mubr.bf16.mxu1 %v5199_v1  ;;  %4690 = vtanh.f32 %v1923_v43 }
 0x3e5   : > { %v1929_v42 = vadd.f32 %v1928_v33, %v5953_v60  ;;  %4317 = vmatpush3.bf16.msra.mxu0 %v4608_v54  ;;  %v1993_v19 = vmax.f32 %v1925_v2, 0.0 }
 0x3e6   : > { %4692 = vtanh.f32 %v1927_v40  ;;  %4318 = vmatprep.subr.bf16.mxu0 %v4609_v34  ;;  %v4687_v8 = vpop.eup %4686 }
 0x3e7   : > { %v1994_v20 = vmax.f32 %v1929_v42, 0.0 }
 0x3e8   : > { %v4689_v41 = vpop.eup %4688 }
 0x3e9   : > { %v5981_v27 = vpack.c.bf16 %v1994_v20, %v1993_v19  ;;  %v1932_v59 = vpop.f32.mrb[48].mxu1  ;;  %v2005_v23 = vpack.c.bf16 %v4689_v41, %v4687_v8  ;;  %4319 = vmatpush3.bf16.msra.mxu0 %v4609_v34 }
 0x3ea   : > { %v1933_v16 = vadd.f32 %v1932_v59, %v5949_v28  ;;  %v1934_v21 = vpop.f32.mrb[49].mxu1  ;;  %4320 = vmatprep.subr.bf16.mxu0 %v4610_v7 }
 0x3eb   : > { %v1935_v30 = vadd.f32 %v1934_v21, %v5953_v60  ;;  %v1936_v39 = vpop.f32.mrb[50].mxu1  ;;  %2278 = vmatmul.mubr.bf16.gmra.mrb[56].mxu0 %v2005_v23  ;;  %2391 = vmatmul.mubr.bf16.gmra.mrb[72].mxu1 %v2005_v23 }
 0x3ec   : > { %v1937_v35 = vadd.f32 %v1936_v39, %v5949_v28  ;;  %v1938_v37 = vpop.f32.mrb[51].mxu1  ;;  %2287 = vmatprep.mubr.bf16.mxu0 %v5199_v1  ;;  %2400 = vmatprep.mubr.bf16.mxu1 %v5199_v1  ;;  %4694 = vtanh.f32 %v1933_v16 }
 0x3ed   : > { %v1939_v44 = vadd.f32 %v1938_v37, %v5953_v60  ;;  %4321 = vmatpush3.bf16.msra.mxu0 %v4610_v7  ;;  %v1995_v57 = vmax.f32 %v1935_v30, 0.0  ;;  %v2059_v37 = vsub.s32 3, %v5940_v53 }
 0x3ee   : > { %4696 = vtanh.f32 %v1937_v35  ;;  %4322 = vmatprep.subr.bf16.mxu0 %v4611_v29  ;;  %v4691_v17 = vpop.eup %4690 }
 0x3ef   : > { %v1996_v5 = vmax.f32 %v1939_v44, 0.0 }
 0x3f0   : > { %v4693_v36 = vpop.eup %4692 }
 0x3f1   : > { %v5989_v58 = vpack.c.bf16 %v1996_v5, %v1995_v57  ;;  %v1942_v0 = vpop.f32.mrb[52].mxu1  ;;  %v2006_v6 = vpack.c.bf16 %v4693_v36, %v4691_v17  ;;  %4323 = vmatpush3.bf16.msra.mxu0 %v4611_v29 }
 0x3f2   : > { %v1943_v11 = vadd.f32 %v1942_v0, %v5949_v28  ;;  %v1944_v25 = vpop.f32.mrb[53].mxu1  ;;  %4324 = vmatprep.subr.bf16.mxu0 %v4612_v26 }
 0x3f3   : > { %v1945_v48 = vadd.f32 %v1944_v25, %v5953_v60  ;;  %v1946_v45 = vpop.f32.mrb[54].mxu1  ;;  %2288 = vmatmul.mubr.bf16.gmra.mrb[60].mxu0 %v2006_v6  ;;  %2401 = vmatmul.mubr.bf16.gmra.mrb[76].mxu1 %v2006_v6 }
 0x3f4   : > { %v1947_v61 = vadd.f32 %v1946_v45, %v5949_v28  ;;  %v1948_v10 = vpop.f32.mrb[55].mxu1  ;;  %2297 = vmatprep.mubr.bf16.mxu0 %v5199_v1  ;;  %2410 = vmatprep.mubr.bf16.mxu1 %v5199_v1  ;;  %4698 = vtanh.f32 %v1943_v11 }
 0x3f5   : > { %v1949_v18 = vadd.f32 %v1948_v10, %v5953_v60  ;;  %4325 = vmatpush3.bf16.msra.mxu0 %v4612_v26  ;;  %v1997_v13 = vmax.f32 %v1945_v48, 0.0 }
 0x3f6   : > { %4700 = vtanh.f32 %v1947_v61  ;;  %4326 = vmatprep.subr.bf16.mxu0 %v4613_v32  ;;  %v4695_v9 = vpop.eup %4694 }
 0x3f7   : > { %v1998_v51 = vmax.f32 %v1949_v18, 0.0 }
 0x3f8   : > { %v4697_v62 = vpop.eup %4696 }
 0x3f9   : > { %v3449_v49 = vpack.c.bf16 %v1998_v51, %v1997_v13  ;;  %v1952_v14 = vpop.f32.mrb[56].mxu1  ;;  %v2007_v15 = vpack.c.bf16 %v4697_v62, %v4695_v9  ;;  %4327 = vmatpush3.bf16.msra.mxu0 %v4613_v32 }
 0x3fa   : > { %v1953_v63 = vadd.f32 %v1952_v14, %v5949_v28  ;;  %v1954_v54 = vpop.f32.mrb[57].mxu1 }
 0x3fb   : > { %v1955_v50 = vadd.f32 %v1954_v54, %v5953_v60  ;;  %v1956_v31 = vpop.f32.mrb[58].mxu1  ;;  %2298 = vmatmul.mubr.bf16.gmra.mrb[64].mxu0 %v2007_v15  ;;  %2411 = vmatmul.mubr.bf16.gmra.mrb[80].mxu1 %v2007_v15 }
 0x3fc   : > { %v1957_v38 = vadd.f32 %v1956_v31, %v5949_v28  ;;  %v1958_v46 = vpop.f32.mrb[59].mxu1  ;;  %2307 = vmatprep.mubr.bf16.mxu0 %v5199_v1  ;;  %2420 = vmatprep.mubr.bf16.mxu1 %v5199_v1  ;;  %4702 = vtanh.f32 %v1953_v63 }
 0x3fd   : > { %v1959_v47 = vadd.f32 %v1958_v46, %v5953_v60  ;;  %v1999_v43 = vmax.f32 %v1955_v50, 0.0 }
 0x3fe   : > { %4704 = vtanh.f32 %v1957_v38  ;;  %v4699_v55 = vpop.eup %4698 }
 0x3ff   : > { %v2000_v52 = vmax.f32 %v1959_v47, 0.0 }
 0x400   : > { %v4701_v34 = vpop.eup %4700 }
 0x401   : > { %v3450_v2 = vpack.c.bf16 %v2000_v52, %v1999_v43  ;;  %v1962_v12 = vpop.f32.mrb[60].mxu1  ;;  %v2008_v40 = vpack.c.bf16 %v4701_v34, %v4699_v55 }
 0x402   : > { %v1963_v33 = vadd.f32 %v1962_v12, %v5949_v28  ;;  %v1964_v42 = vpop.f32.mrb[61].mxu1 }
 0x403   : > { %v1965_v7 = vadd.f32 %v1964_v42, %v5953_v60  ;;  %v1966_v8 = vpop.f32.mrb[62].mxu1  ;;  %2308 = vmatmul.mubr.bf16.gmra.mrb[68].mxu0 %v2008_v40  ;;  %2421 = vmatmul.mubr.bf16.gmra.mrb[84].mxu1 %v2008_v40 }
 0x404   : > { %v1967_v19 = vadd.f32 %v1966_v8, %v5949_v28  ;;  %v1968_v20 = vpop.f32.mrb[63].mxu1  ;;  %2317 = vmatprep.mubr.bf16.mxu0 %v5199_v1  ;;  %2430 = vmatprep.mubr.bf16.mxu1 %v5199_v1  ;;  %4706 = vtanh.f32 %v1963_v33 }
 0x405   : > { %v1969_v41 = vadd.f32 %v1968_v20, %v5953_v60  ;;  %v2001_v23 = vmax.f32 %v1965_v7, 0.0  ;;  %v2043_v60 = vld [vmem:[%s7472_s22] sm:$0xf] }
 0x406   : > { %4708 = vtanh.f32 %v1967_v19  ;;  %v4703_v59 = vpop.eup %4702 }
 0x407   : > { %v2002_v16 = vmax.f32 %v1969_v41, 0.0 }
 0x408   : > { %v4705_v21 = vpop.eup %4704 }
 0x409   : > { %v3451_v29 = vpack.c.bf16 %v2002_v16, %v2001_v23  ;;  %v2009_v30 = vpack.c.bf16 %v4705_v21, %v4703_v59 }
 0x40b   : > { %2318 = vmatmul.mubr.bf16.gmra.mrb[72].mxu0 %v2009_v30  ;;  %2431 = vmatmul.mubr.bf16.gmra.mrb[88].mxu1 %v2009_v30 }
 0x40c   : > { %2327 = vmatprep.mubr.bf16.mxu0 %v5199_v1  ;;  %2440 = vmatprep.mubr.bf16.mxu1 %v5199_v1  ;;  %v2055_v1 = vsub.s32 2, %v5940_v53 }
 0x40e   : > { %v4707_v28 = vpop.eup %4706 }
 0x410   : > { %v4709_v39 = vpop.eup %4708 }
 0x411   : > { %v2010_v35 = vpack.c.bf16 %v4709_v39, %v4707_v28 }
 0x413   : > { %2328 = vmatmul.mubr.bf16.gmra.mrb[76].mxu0 %v2010_v35  ;;  %2441 = vmatmul.mubr.bf16.gmra.mrb[92].mxu1 %v2010_v35 }
 0x414   : > { %4328 = vmatprep.mubr.bf16.mxu0 %v5959_v56  ;;  %v6023_v56 = vrot.slane %v2043_v60, %v1770_v22 }
 0x41b   : > { %4329 = vmatmul.mubr.bf16.vlgmr.msra.gmra.mrb[80].mxu0 %v5965_v3  ;;  %v6025_v3 = vrot.slane %v2043_v60, %v2055_v1 }
 0x41c   : > { %4332 = vmatprep.mubr.bf16.mxu0 %v5973_v4  ;;  %v6029_v4 = vrot.slane %v2043_v60, %v1774_v24 }
 0x423   : > { %4333 = vmatmul.mubr.bf16.gmra.mrb[84].mxu0 %v5981_v27  ;;  %v6031_v27 = vrot.slane %v2043_v60, %v2059_v37 }
 0x424   : > { %4336 = vmatprep.mubr.bf16.mxu0 %v5989_v58 }
 0x42b   : > { %4337 = vmatmul.mubr.bf16.gmra.mrb[88].mxu0 %v3449_v49 }
 0x42c   : > { %4340 = vmatprep.mubr.bf16.mxu0 %v3450_v2 }
 0x433   : > { %4341 = vmatmul.mubr.bf16.gmra.mrb[92].mxu0 %v3451_v29 }
 0x4ae   : > { %v2259_v44 = vpop.f32.mrb[48].mxu0  ;;  %v2372_v26 = vpop.f32.mrb[64].mxu1 }
 0x4af   : > { %v6034_v17 = vadd.f32 %v2259_v44, %v6023_v56  ;;  %v6037_v57 = vadd.f32 %v2372_v26, %v6025_v3  ;;  %v2261_v5 = vpop.f32.mrb[49].mxu0  ;;  %v2374_v22 = vpop.f32.mrb[65].mxu1 }
 0x4b0   : > { %v6040_v36 = vadd.f32 %v2261_v5, %v6029_v4  ;;  %v6043_v53 = vadd.f32 %v2374_v22, %v6031_v27  ;;  %v2263_v24 = vpop.f32.mrb[50].mxu0  ;;  %v2376_v58 = vpop.f32.mrb[66].mxu1 }
 0x4b1   : > { %v6046_v0 = vadd.f32 %v2263_v24, %v6023_v56  ;;  %v6049_v6 = vadd.f32 %v2376_v58, %v6025_v3  ;;  %v2265_v11 = vpop.f32.mrb[51].mxu0  ;;  %v2378_v25 = vpop.f32.mrb[67].mxu1 }
 0x4b2   : > { %v4085_v32 = vpack.c.bf16 %v6040_v36, %v6034_v17  ;;  %v4086_v48 = vpack.c.bf16 %v6043_v53, %v6037_v57  ;;  %v6056_v45 = vadd.f32 %v2265_v11, %v6029_v4  ;;  %v6059_v61 = vadd.f32 %v2378_v25, %v6031_v27 }
 0x4b3   : > { %v2675_v10 = vmax.f32 %v6034_v17, %v6040_v36 }
 0x4b4   : > { %2643 = vst [vmem:[%s6064_s11] sm:$0xff] %v4085_v32  ;;  %2644 = vst [vmem:[%s6064_s11 + $0x8] sm:$0xff] %v4086_v48  ;;  %v4087_v18 = vpack.c.bf16 %v6056_v45, %v6046_v0  ;;  %v4088_v9 = vpack.c.bf16 %v6059_v61, %v6049_v6  ;;  %v2680_v13 = vmax.f32 %v6046_v0, %v6056_v45 }
 0x4b5   : > { %v2676_v51 = vmax.f32 %v2675_v10, %v6037_v57 }
 0x4b6   : > { %2645 = vst [vmem:[%s6064_s11 + $0x10] sm:$0xff] %v4087_v18  ;;  %2646 = vst [vmem:[%s6064_s11 + $0x18] sm:$0xff] %v4088_v9  ;;  %v2269_v62 = vpop.f32.mrb[52].mxu0  ;;  %v2382_v49 = vpop.f32.mrb[68].mxu1  ;;  %v2681_v14 = vmax.f32 %v2680_v13, %v6049_v6 }
 0x4b7   : > { %v6079_v15 = vadd.f32 %v2269_v62, %v6023_v56  ;;  %v6082_v63 = vadd.f32 %v2382_v49, %v6025_v3  ;;  %v2271_v54 = vpop.f32.mrb[53].mxu0  ;;  %v2384_v50 = vpop.f32.mrb[69].mxu1  ;;  %v2677_v31 = vmax.f32 %v2676_v51, %v6043_v53 }
 0x4b8   : > { %v6086_v38 = vadd.f32 %v2271_v54, %v6029_v4  ;;  %v6089_v46 = vadd.f32 %v2384_v50, %v6031_v27  ;;  %v2273_v47 = vpop.f32.mrb[54].mxu0  ;;  %v2386_v55 = vpop.f32.mrb[70].mxu1  ;;  %v2682_v43 = vmax.f32 %v2681_v14, %v6059_v61 }
 0x4b9   : > { %v6093_v52 = vadd.f32 %v2273_v47, %v6023_v56  ;;  %v6096_v34 = vadd.f32 %v2386_v55, %v6025_v3  ;;  %2678 = vmax.xlane.f32.xlu0 %v2677_v31  ;;  %v2275_v2 = vpop.f32.mrb[55].mxu0  ;;  %v2388_v12 = vpop.f32.mrb[71].mxu1 }
 0x4ba   : > { %v4089_v40 = vpack.c.bf16 %v6086_v38, %v6079_v15  ;;  %v4090_v33 = vpack.c.bf16 %v6089_v46, %v6082_v63  ;;  %v6103_v42 = vadd.f32 %v2275_v2, %v6029_v4  ;;  %v6106_v7 = vadd.f32 %v2388_v12, %v6031_v27  ;;  %2683 = vmax.xlane.f32.xlu1 %v2682_v43 }
 0x4bb   : > { %v2685_v8 = vmax.f32 %v6079_v15, %v6086_v38 }
 0x4bc   : > { %2647 = vst [vmem:[%s6064_s11 + $0x20] sm:$0xff] %v4089_v40  ;;  %2648 = vst [vmem:[%s6064_s11 + $0x28] sm:$0xff] %v4090_v33  ;;  %v4091_v19 = vpack.c.bf16 %v6103_v42, %v6093_v52  ;;  %v4092_v20 = vpack.c.bf16 %v6106_v7, %v6096_v34  ;;  %v2690_v41 = vmax.f32 %v6093_v52, %v6103_v42 }
 0x4bd   : > { %v2686_v59 = vmax.f32 %v2685_v8, %v6082_v63 }
 0x4be   : > { %2649 = vst [vmem:[%s6064_s11 + $0x30] sm:$0xff] %v4091_v19  ;;  %2650 = vst [vmem:[%s6064_s11 + $0x38] sm:$0xff] %v4092_v20  ;;  %v2279_v23 = vpop.f32.mrb[56].mxu0  ;;  %v2392_v16 = vpop.f32.mrb[72].mxu1  ;;  %v2691_v21 = vmax.f32 %v2690_v41, %v6096_v34 }
 0x4bf   : > { %v6123_v29 = vadd.f32 %v2279_v23, %v6023_v56  ;;  %v6126_v30 = vadd.f32 %v2392_v16, %v6025_v3  ;;  %v2281_v28 = vpop.f32.mrb[57].mxu0  ;;  %v2394_v39 = vpop.f32.mrb[73].mxu1  ;;  %v2687_v35 = vmax.f32 %v2686_v59, %v6089_v46 }
 0x4c0   : > { %v6130_v1 = vadd.f32 %v2281_v28, %v6029_v4  ;;  %v6133_v60 = vadd.f32 %v2394_v39, %v6031_v27  ;;  %v2283_v37 = vpop.f32.mrb[58].mxu0  ;;  %v2396_v44 = vpop.f32.mrb[74].mxu1  ;;  %v2692_v26 = vmax.f32 %v2691_v21, %v6106_v7 }
 0x4c1   : > { %v6137_v5 = vadd.f32 %v2283_v37, %v6023_v56  ;;  %v6140_v22 = vadd.f32 %v2396_v44, %v6025_v3  ;;  %2688 = vmax.xlane.f32.xlu0 %v2687_v35  ;;  %v2285_v24 = vpop.f32.mrb[59].mxu0  ;;  %v2398_v58 = vpop.f32.mrb[75].mxu1 }
 0x4c2   : > { %v4093_v11 = vpack.c.bf16 %v6130_v1, %v6123_v29  ;;  %v4094_v25 = vpack.c.bf16 %v6133_v60, %v6126_v30  ;;  %v6147_v32 = vadd.f32 %v2285_v24, %v6029_v4  ;;  %v6150_v48 = vadd.f32 %v2398_v58, %v6031_v27  ;;  %2693 = vmax.xlane.f32.xlu1 %v2692_v26 }
 0x4c3   : > { %v2695_v10 = vmax.f32 %v6123_v29, %v6130_v1 }
 0x4c4   : > { %2651 = vst [vmem:[%s6064_s11 + $0x40] sm:$0xff] %v4093_v11  ;;  %2652 = vst [vmem:[%s6064_s11 + $0x48] sm:$0xff] %v4094_v25  ;;  %v4095_v18 = vpack.c.bf16 %v6147_v32, %v6137_v5  ;;  %v4096_v9 = vpack.c.bf16 %v6150_v48, %v6140_v22  ;;  %v2700_v13 = vmax.f32 %v6137_v5, %v6147_v32 }
 0x4c5   : > { %v2696_v51 = vmax.f32 %v2695_v10, %v6126_v30 }
 0x4c6   : > { %2653 = vst [vmem:[%s6064_s11 + $0x50] sm:$0xff] %v4095_v18  ;;  %2654 = vst [vmem:[%s6064_s11 + $0x58] sm:$0xff] %v4096_v9  ;;  %v2289_v62 = vpop.f32.mrb[60].mxu0  ;;  %v2402_v49 = vpop.f32.mrb[76].mxu1  ;;  %v2701_v14 = vmax.f32 %v2700_v13, %v6140_v22 }
 0x4c7   : > { %v6167_v54 = vadd.f32 %v2289_v62, %v6023_v56  ;;  %v6170_v50 = vadd.f32 %v2402_v49, %v6025_v3  ;;  %v2291_v31 = vpop.f32.mrb[61].mxu0  ;;  %v2404_v47 = vpop.f32.mrb[77].mxu1  ;;  %v2697_v55 = vmax.f32 %v2696_v51, %v6133_v60 }
 0x4c8   : > { %v6174_v43 = vadd.f32 %v2291_v31, %v6029_v4  ;;  %v6177_v2 = vadd.f32 %v2404_v47, %v6031_v27  ;;  %v2293_v12 = vpop.f32.mrb[62].mxu0  ;;  %v2406_v40 = vpop.f32.mrb[78].mxu1  ;;  %v2702_v33 = vmax.f32 %v2701_v14, %v6150_v48 }
 0x4c9   : > { %7473 = vst [vmem:[#allocation25_spill] sm:$0xff] %v6167_v54  ;;  %7474 = vst [vmem:[#allocation26_spill] sm:$0xff] %v6170_v50  ;;  %v6181_v8 = vadd.f32 %v2293_v12, %v6023_v56  ;;  %v6184_v19 = vadd.f32 %v2406_v40, %v6025_v3  ;;  %2698 = vmax.xlane.f32.xlu0 %v2697_v55  ;;  %v2295_v20 = vpop.f32.mrb[63].mxu0  ;;  %v2408_v41 = vpop.f32.mrb[79].mxu1 }
 0x4ca   : > { %7475 = vst [vmem:[#allocation27_spill] sm:$0xff] %v6174_v43  ;;  %7476 = vst [vmem:[#allocation28_spill] sm:$0xff] %v6177_v2  ;;  %v4097_v59 = vpack.c.bf16 %v6174_v43, %v6167_v54  ;;  %v4098_v23 = vpack.c.bf16 %v6177_v2, %v6170_v50  ;;  %v6191_v16 = vadd.f32 %v2295_v20, %v6029_v4  ;;  %2703 = vmax.xlane.f32.xlu1 %v2702_v33 }
 0x4cb   : > { %7477 = vst [vmem:[#allocation29_spill] sm:$0xff] %v6181_v8  ;;  %7478 = vst [vmem:[#allocation30_spill] sm:$0xff] %v6184_v19  ;;  %v6194_v21 = vadd.f32 %v2408_v41, %v6031_v27  ;;  %v2705_v28 = vmax.f32 %v6167_v54, %v6174_v43  ;;  %v6645_v54 = vld [vmem:[%s5583_s2 + $0xd8] sm:$0xff] }
 0x4cc   : > { %7479 = vst [vmem:[#allocation31_spill] sm:$0xff] %v6191_v16  ;;  %2655 = vst [vmem:[%s6064_s11 + $0x60] sm:$0xff] %v4097_v59  ;;  %v4099_v39 = vpack.c.bf16 %v6191_v16, %v6181_v8  ;;  %v2710_v37 = vmax.f32 %v6181_v8, %v6191_v16 }
 0x4cd   : > { %7480 = vst [vmem:[#allocation32_spill] sm:$0xff] %v6194_v21  ;;  %2656 = vst [vmem:[%s6064_s11 + $0x68] sm:$0xff] %v4098_v23  ;;  %v4100_v35 = vpack.c.bf16 %v6194_v21, %v6184_v19  ;;  %v2706_v44 = vmax.f32 %v2705_v28, %v6170_v50  ;;  %v6565_v50 = vld [vmem:[%s5583_s2 + $0x98] sm:$0xff] }
 0x4ce   : > { %2657 = vst [vmem:[%s6064_s11 + $0x70] sm:$0xff] %v4099_v39  ;;  %v2299_v26 = vpop.f32.mrb[64].mxu0  ;;  %v2412_v24 = vpop.f32.mrb[80].mxu1  ;;  %v2711_v58 = vmax.f32 %v2710_v37, %v6184_v19  ;;  %v6526_v19 = vld [vmem:[%s5583_s2 + $0x78] sm:$0xff]  ;;  %7566 = vst [vmem:[#allocation78_spill] sm:$0xff] %v6645_v54 }
 0x4cf   : > { %2658 = vst [vmem:[%s6064_s11 + $0x78] sm:$0xff] %v4100_v35  ;;  %v6211_v11 = vadd.f32 %v2299_v26, %v6023_v56  ;;  %v6214_v25 = vadd.f32 %v2412_v24, %v6025_v3  ;;  %v2301_v10 = vpop.f32.mrb[65].mxu0  ;;  %v2414_v18 = vpop.f32.mrb[81].mxu1  ;;  %v2707_v9 = vmax.f32 %v2706_v44, %v6177_v2  ;;  %7536 = vst [vmem:[#allocation69_spill] sm:$0xff] %v6526_v19 }
 0x4d0   : > { %v6218_v13 = vadd.f32 %v2301_v10, %v6029_v4  ;;  %v6221_v51 = vadd.f32 %v2414_v18, %v6031_v27  ;;  %v2303_v62 = vpop.f32.mrb[66].mxu0  ;;  %v2416_v49 = vpop.f32.mrb[82].mxu1  ;;  %v2712_v14 = vmax.f32 %v2711_v58, %v6194_v21 }
 0x4d1   : > { %7481 = vst [vmem:[#allocation33_spill] sm:$0xff] %v6211_v11  ;;  %7482 = vst [vmem:[#allocation34_spill] sm:$0xff] %v6214_v25  ;;  %v6225_v31 = vadd.f32 %v2303_v62, %v6023_v56  ;;  %v6228_v47 = vadd.f32 %v2416_v49, %v6025_v3  ;;  %2708 = vmax.xlane.f32.xlu0 %v2707_v9  ;;  %v2305_v55 = vpop.f32.mrb[67].mxu0  ;;  %v2418_v12 = vpop.f32.mrb[83].mxu1 }
 0x4d2   : > { %7483 = vst [vmem:[#allocation35_spill] sm:$0xff] %v6218_v13  ;;  %7484 = vst [vmem:[#allocation36_spill] sm:$0xff] %v6221_v51  ;;  %v4101_v40 = vpack.c.bf16 %v6218_v13, %v6211_v11  ;;  %v4102_v33 = vpack.c.bf16 %v6221_v51, %v6214_v25  ;;  %v6235_v20 = vadd.f32 %v2305_v55, %v6029_v4  ;;  %2713 = vmax.xlane.f32.xlu1 %v2712_v14 }
 0x4d3   : > { %7485 = vst [vmem:[#allocation37_spill] sm:$0xff] %v6225_v31  ;;  %7486 = vst [vmem:[#allocation38_spill] sm:$0xff] %v6228_v47  ;;  %v6238_v41 = vadd.f32 %v2418_v12, %v6031_v27  ;;  %v2715_v59 = vmax.f32 %v6211_v11, %v6218_v13  ;;  %v6444_v13 = vld [vmem:[%s5583_s2 + $0x50] sm:$0xff]  ;;  %v6485_v11 = vld [vmem:[%s5583_s2 + $0x58] sm:$0xff] }
 0x4d4   : > { %7487 = vst [vmem:[#allocation39_spill] sm:$0xff] %v6235_v20  ;;  %2659 = vst [vmem:[%s6064_s11 + $0x80] sm:$0xff] %v4101_v40  ;;  %v4103_v23 = vpack.c.bf16 %v6235_v20, %v6225_v31  ;;  %v2720_v39 = vmax.f32 %v6225_v31, %v6235_v20  ;;  %v6415_v31 = vld [vmem:[%s5583_s2 + $0x38] sm:$0xff] }
 0x4d5   : > { %7488 = vst [vmem:[#allocation40_spill] sm:$0xff] %v6238_v41  ;;  %2660 = vst [vmem:[%s6064_s11 + $0x88] sm:$0xff] %v4102_v33  ;;  %v4104_v28 = vpack.c.bf16 %v6238_v41, %v6228_v47  ;;  %v2716_v35 = vmax.f32 %v2715_v59, %v6214_v25 }
 0x4d6   : > { %2661 = vst [vmem:[%s6064_s11 + $0x90] sm:$0xff] %v4103_v23  ;;  %v2309_v37 = vpop.f32.mrb[68].mxu0  ;;  %v2422_v44 = vpop.f32.mrb[84].mxu1  ;;  %v2721_v26 = vmax.f32 %v2720_v39, %v6228_v47 }
 0x4d7   : > { %2662 = vst [vmem:[%s6064_s11 + $0x98] sm:$0xff] %v4104_v28  ;;  %v6255_v24 = vadd.f32 %v2309_v37, %v6023_v56  ;;  %v6258_v58 = vadd.f32 %v2422_v44, %v6025_v3  ;;  %v2311_v10 = vpop.f32.mrb[69].mxu0  ;;  %v2424_v18 = vpop.f32.mrb[85].mxu1  ;;  %v2717_v9 = vmax.f32 %v2716_v35, %v6221_v51 }
 0x4d8   : > { %v6262_v62 = vadd.f32 %v2311_v10, %v6029_v4  ;;  %v6265_v49 = vadd.f32 %v2424_v18, %v6031_v27  ;;  %v2313_v14 = vpop.f32.mrb[70].mxu0  ;;  %v2426_v55 = vpop.f32.mrb[86].mxu1  ;;  %v2722_v12 = vmax.f32 %v2721_v26, %v6238_v41 }
 0x4d9   : > { %7489 = vst [vmem:[#allocation41_spill] sm:$0xff] %v6255_v24  ;;  %7490 = vst [vmem:[#allocation42_spill] sm:$0xff] %v6258_v58  ;;  %v6269_v40 = vadd.f32 %v2313_v14, %v6023_v56  ;;  %v6272_v33 = vadd.f32 %v2426_v55, %v6025_v3  ;;  %2718 = vmax.xlane.f32.xlu0 %v2717_v9  ;;  %v2315_v59 = vpop.f32.mrb[71].mxu0  ;;  %v2428_v23 = vpop.f32.mrb[87].mxu1 }
 0x4da   : > { %7491 = vst [vmem:[#allocation43_spill] sm:$0xff] %v6262_v62  ;;  %7492 = vst [vmem:[#allocation44_spill] sm:$0xff] %v6265_v49  ;;  %v4105_v28 = vpack.c.bf16 %v6262_v62, %v6255_v24  ;;  %v4106_v39 = vpack.c.bf16 %v6265_v49, %v6258_v58  ;;  %v6279_v35 = vadd.f32 %v2315_v59, %v6029_v4  ;;  %2723 = vmax.xlane.f32.xlu1 %v2722_v12 }
 0x4db   : > { %7493 = vst [vmem:[#allocation45_spill] sm:$0xff] %v6269_v40  ;;  %7494 = vst [vmem:[#allocation46_spill] sm:$0xff] %v6272_v33  ;;  %v6282_v37 = vadd.f32 %v2428_v23, %v6031_v27  ;;  %v2725_v44 = vmax.f32 %v6255_v24, %v6262_v62 }
 0x4dc   : > { %7495 = vst [vmem:[#allocation47_spill] sm:$0xff] %v6279_v35  ;;  %2663 = vst [vmem:[%s6064_s11 + $0xa0] sm:$0xff] %v4105_v28  ;;  %v4107_v26 = vpack.c.bf16 %v6279_v35, %v6269_v40  ;;  %v2730_v18 = vmax.f32 %v6269_v40, %v6279_v35 }
 0x4dd   : > { %7496 = vst [vmem:[#allocation48_spill] sm:$0xff] %v6282_v37  ;;  %2664 = vst [vmem:[%s6064_s11 + $0xa8] sm:$0xff] %v4106_v39  ;;  %v4108_v10 = vpack.c.bf16 %v6282_v37, %v6272_v33  ;;  %v2726_v9 = vmax.f32 %v2725_v44, %v6258_v58 }
 0x4de   : > { %2665 = vst [vmem:[%s6064_s11 + $0xb0] sm:$0xff] %v4107_v26  ;;  %v2319_v14 = vpop.f32.mrb[72].mxu0  ;;  %v2432_v55 = vpop.f32.mrb[88].mxu1  ;;  %v2731_v12 = vmax.f32 %v2730_v18, %v6272_v33 }
 0x4df   : > { %2666 = vst [vmem:[%s6064_s11 + $0xb8] sm:$0xff] %v4108_v10  ;;  %v6299_v59 = vadd.f32 %v2319_v14, %v6023_v56  ;;  %v6302_v23 = vadd.f32 %v2432_v55, %v6025_v3  ;;  %v2321_v28 = vpop.f32.mrb[73].mxu0  ;;  %v2434_v39 = vpop.f32.mrb[89].mxu1  ;;  %v2727_v62 = vmax.f32 %v2726_v9, %v6265_v49  ;;  %v6340_v49 = vld [vmem:[%s5583_s2 + $0x18] sm:$0xff] }
 0x4e0   : > { %v6306_v35 = vadd.f32 %v2321_v28, %v6029_v4  ;;  %v6309_v44 = vadd.f32 %v2434_v39, %v6031_v27  ;;  %v2323_v26 = vpop.f32.mrb[74].mxu0  ;;  %v2436_v10 = vpop.f32.mrb[90].mxu1  ;;  %v2732_v18 = vmax.f32 %v2731_v12, %v6282_v37  ;;  %v6329_v12 = vld [vmem:[%s5583_s2] sm:$0xff]  ;;  %v6337_v37 = vld [vmem:[%s5583_s2 + $0x10] sm:$0xff] }
 0x4e1   : > { %7497 = vst [vmem:[#allocation49_spill] sm:$0xff] %v6299_v59  ;;  %7498 = vst [vmem:[#allocation50_spill] sm:$0xff] %v6302_v23  ;;  %2728 = vmax.xlane.f32.xlu0 %v2727_v62  ;;  %v6313_v14 = vadd.f32 %v2323_v26, %v6023_v56  ;;  %v6316_v9 = vadd.f32 %v2436_v10, %v6025_v3  ;;  %v2325_v55 = vpop.f32.mrb[75].mxu0  ;;  %v2438_v28 = vpop.f32.mrb[91].mxu1  ;;  %v6332_v26 = vld [vmem:[%s5583_s2 + $0x8] sm:$0xff]  ;;  %v7514_v20 = vunpack.c.h.bf16 %v6337_v37 }
 0x4e2   : > { %7499 = vst [vmem:[#allocation51_spill] sm:$0xff] %v6306_v35  ;;  %7500 = vst [vmem:[#allocation52_spill] sm:$0xff] %v6309_v44  ;;  %v4109_v39 = vpack.c.bf16 %v6306_v35, %v6299_v59  ;;  %v4110_v33 = vpack.c.bf16 %v6309_v44, %v6302_v23  ;;  %v6323_v40 = vadd.f32 %v2325_v55, %v6029_v4  ;;  %2733 = vmax.xlane.f32.xlu1 %v2732_v18 }
 0x4e3   : > { %7501 = vst [vmem:[#allocation53_spill] sm:$0xff] %v6313_v14  ;;  %7502 = vst [vmem:[#allocation54_spill] sm:$0xff] %v6316_v9  ;;  %v6326_v62 = vadd.f32 %v2438_v28, %v6031_v27  ;;  %v2735_v10 = vmax.f32 %v6299_v59, %v6306_v35 }
 0x4e4   : > { %7503 = vst [vmem:[#allocation55_spill] sm:$0xff] %v6323_v40  ;;  %2667 = vst [vmem:[%s6064_s11 + $0xc0] sm:$0xff] %v4109_v39  ;;  %v4111_v55 = vpack.c.bf16 %v6323_v40, %v6313_v14  ;;  %v2740_v28 = vmax.f32 %v6313_v14, %v6323_v40  ;;  %v6377_v14 = vld [vmem:[%s5583_s2 + $0x20] sm:$0xff] }
 0x4e5   : > { %7504 = vst [vmem:[#allocation56_spill] sm:$0xff] %v6326_v62  ;;  %2668 = vst [vmem:[%s6064_s11 + $0xc8] sm:$0xff] %v4110_v33  ;;  %v4112_v18 = vpack.c.bf16 %v6326_v62, %v6316_v9  ;;  %v2736_v58 = vmax.f32 %v2735_v10, %v6302_v23  ;;  %v6380_v23 = vld [vmem:[%s5583_s2 + $0x30] sm:$0xff]  ;;  %v7520_v51 = vunpack.c.h.bf16 %v6377_v14 }
 0x4e6   : > { %2669 = vst [vmem:[%s6064_s11 + $0xd0] sm:$0xff] %v4111_v55  ;;  %v2329_v33 = vpop.f32.mrb[76].mxu0  ;;  %v2442_v39 = vpop.f32.mrb[92].mxu1  ;;  %v2741_v41 = vmax.f32 %v2740_v28, %v6316_v9 }
 0x4e7   : > { %2670 = vst [vmem:[%s6064_s11 + $0xd8] sm:$0xff] %v4112_v18  ;;  %v6361_v24 = vadd.f32 %v2329_v33, %v6023_v56  ;;  %v6364_v35 = vadd.f32 %v2442_v39, %v6025_v3  ;;  %v2331_v55 = vpop.f32.mrb[77].mxu0  ;;  %v2444_v18 = vpop.f32.mrb[93].mxu1  ;;  %v2737_v59 = vmax.f32 %v2736_v58, %v6309_v44  ;;  %v7512_v39 = vunpack.c.h.bf16 %v6329_v12 }
 0x4e8   : > { %v6369_v9 = vadd.f32 %v2331_v55, %v6029_v4  ;;  %v6372_v47 = vadd.f32 %v2444_v18, %v6031_v27  ;;  %v2333_v40 = vpop.f32.mrb[78].mxu0  ;;  %v2446_v10 = vpop.f32.mrb[94].mxu1  ;;  %v2742_v33 = vmax.f32 %v2741_v41, %v6326_v62  ;;  %v7511_v41 = vunpack.c.l.bf16 %v6329_v12 }
 0x4e9   : > { %7505 = vst [vmem:[#allocation57_spill] sm:$0xff] %v6361_v24  ;;  %7506 = vst [vmem:[#allocation58_spill] sm:$0xff] %v6364_v35  ;;  %v6383_v58 = vadd.f32 %v2333_v40, %v6023_v56  ;;  %v6386_v55 = vadd.f32 %v2446_v10, %v6025_v3  ;;  %2738 = vmax.xlane.f32.xlu0 %v2737_v59  ;;  %v2335_v18 = vpop.f32.mrb[79].mxu0  ;;  %v2448_v28 = vpop.f32.mrb[95].mxu1  ;;  %v7513_v44 = vunpack.c.l.bf16 %v6337_v37 }
 0x4ea   : > { %7507 = vst [vmem:[#allocation59_spill] sm:$0xff] %v6369_v9  ;;  %7508 = vst [vmem:[#allocation60_spill] sm:$0xff] %v6372_v47  ;;  %v3171_v62 = vadd.f32 %v7512_v39, %v7511_v41  ;;  %v4113_v3 = vpack.c.bf16 %v6369_v9, %v6361_v24  ;;  %v4114_v40 = vpack.c.bf16 %v6372_v47, %v6364_v35  ;;  %2743 = vmax.xlane.f32.xlu1 %v2742_v33  ;;  %v6407_v39 = vld [vmem:[%s5583_s2 + $0x28] sm:$0xff]  ;;  %v6427_v33 = vld [vmem:[%s7517_s23] ss:$0 sm:$0xff] }
 0x4eb   : > { %7509 = vst [vmem:[#allocation61_spill] sm:$0xff] %v6383_v58  ;;  %7510 = vst [vmem:[#allocation62_spill] sm:$0xff] %v6386_v55  ;;  %v3176_v56 = vadd.f32 %v7514_v20, %v7513_v44  ;;  %v6401_v59 = vadd.f32 %v2335_v18, %v6029_v4  ;;  %v6404_v10 = vadd.f32 %v2448_v28, %v6031_v27  ;;  %v6433_v44 = vld [vmem:[%s5583_s2 + $0x40] sm:$0xff]  ;;  %v7351_v21 = vunpack.c.h.bf16 %v6407_v39 }
 0x4ec   : > { %v2745_v20 = vmax.f32 %v6361_v24, %v6369_v9  ;;  %2671 = vst [vmem:[%s6064_s11 + $0xe0] sm:$0xff] %v4113_v3  ;;  %2672 = vst [vmem:[%s6064_s11 + $0xe8] sm:$0xff] %v4114_v40  ;;  %v7518_v40 = vunpack.c.l.bf16 %v6332_v26  ;;  %v7519_v24 = vunpack.c.l.bf16 %v6377_v14  ;;  %v7522_v9 = vunpack.c.l.bf16 %v6380_v23 }
 0x4ed   : > { %7515 = vst [vmem:[#allocation63_spill] sm:$0xff] %v6401_v59  ;;  %7516 = vst [vmem:[#allocation64_spill] sm:$0xff] %v6404_v10  ;;  %v4115_v27 = vpack.c.bf16 %v6401_v59, %v6383_v58  ;;  %v4116_v28 = vpack.c.bf16 %v6404_v10, %v6386_v55  ;;  %v2750_v18 = vmax.f32 %v6383_v58, %v6401_v59  ;;  %v7523_v58 = vunpack.c.h.bf16 %v6380_v23 }
 0x4ee   : > { %v2746_v3 = vmax.f32 %v2745_v20, %v6364_v35  ;;  %v3172_v4 = vadd.f32 %v3171_v62, %v7518_v40  ;;  %v3181_v25 = vadd.f32 %v7520_v51, %v7519_v24  ;;  %v4330_v41 = vpop.f32.mrb[80].mxu0  ;;  %v7521_v20 = vunpack.c.l.bf16 %v6340_v49  ;;  %v6463_v40 = vld [vmem:[%s5583_s2 + $0x48] sm:$0xff] }
 0x4ef   : > { %2673 = vst [vmem:[%s6064_s11 + $0xf0] sm:$0xff] %v4115_v27  ;;  %2674 = vst [vmem:[%s6064_s11 + $0xf8] sm:$0xff] %v4116_v28  ;;  %v2751_v59 = vmax.f32 %v2750_v18, %v6386_v55  ;;  %v3186_v51 = vadd.f32 %v7523_v58, %v7522_v9  ;;  %v3566_v24 = vadd.f32 %v4330_v41, %v6427_v33  ;;  %v3557_v35 = vpop.f32.mrb[81].mxu0  ;;  %v7346_v28 = vunpack.c.l.bf16 %v6433_v44  ;;  %v6468_v41 = vld [vmem:[%s5583_s2 + $0x60] sm:$0xff] }
 0x4f0   : > { %v3177_v62 = vadd.f32 %v3176_v56, %v7521_v20  ;;  %v2747_v27 = vmax.f32 %v2746_v3, %v6372_v47  ;;  %v3558_v55 = vadd.f32 %v6427_v33, %v3557_v35  ;;  %v4331_v56 = vpop.f32.mrb[82].mxu0  ;;  %7524 = vst [vmem:[#allocation65_spill] sm:$0xff] %v6468_v41  ;;  %v7526_v9 = vunpack.c.l.bf16 %v6407_v39 }
 0x4f1   : > { %v2752_v20 = vmax.f32 %v2751_v59, %v6404_v10  ;;  %3622 = vst [vmem:[%s6472_s10 + $0x10] sm:$0xff] %v3566_v24  ;;  %v3569_v35 = vadd.f32 %v4331_v56, %v6427_v33  ;;  %v3560_v3 = vpop.f32.mrb[83].mxu0  ;;  %v7525_v59 = vunpack.c.h.bf16 %v6332_v26  ;;  %v7527_v10 = vunpack.c.h.bf16 %v6433_v44  ;;  %v6488_v24 = vld [vmem:[%s5583_s2 + $0x70] sm:$0xff] }
 0x4f2   : > { %2748 = vmax.xlane.f32.xlu0 %v2747_v27  ;;  %v3182_v58 = vadd.f32 %v3181_v25, %v7526_v9  ;;  %7528 = vst [vmem:[#allocation66_spill] sm:$0xff] %v6488_v24  ;;  %3620 = vst [vmem:[%s6472_s10] sm:$0xff] %v3558_v55  ;;  %v3561_v27 = vadd.f32 %v6427_v33, %v3560_v3  ;;  %v7530_v25 = vunpack.c.l.bf16 %v6415_v31  ;;  %v7352_v55 = vunpack.c.l.bf16 %v6463_v40 }
 0x4f3   : > { %v3173_v18 = vadd.f32 %v3172_v4, %v7525_v59  ;;  %v3191_v47 = vadd.f32 %v7527_v10, %v7346_v28  ;;  %2753 = vmax.xlane.f32.xlu1 %v2752_v20  ;;  %v7529_v4 = vunpack.c.h.bf16 %v6340_v49  ;;  %v7531_v59 = vunpack.c.l.bf16 %v6444_v13  ;;  %3623 = vst [vmem:[%s6472_s10 + $0x18] sm:$0xff] %v3569_v35  ;;  %v6529_v35 = vld [vmem:[%s5583_s2 + $0x90] sm:$0xff] }
 0x4f4   : > { %v3187_v9 = vadd.f32 %v3186_v51, %v7530_v25  ;;  %v7532_v10 = vunpack.c.h.bf16 %v6444_v13  ;;  %v7353_v3 = vunpack.c.h.bf16 %v6468_v41  ;;  %3621 = vst [vmem:[%s6472_s10 + $0x8] sm:$0xff] %v3561_v27  ;;  %7537 = vst [vmem:[#allocation70_spill] sm:$0xff] %v6529_v35  ;;  %v7540_v20 = vunpack.c.l.bf16 %v6488_v24 }
 0x4f5   : > { %v3178_v56 = vadd.f32 %v3177_v62, %v7529_v4  ;;  %v6509_v4 = vld [vmem:[%s5583_s2 + $0x68] sm:$0xff]  ;;  %v3192_v27 = vadd.f32 %v3191_v47, %v7352_v55  ;;  %v7535_v62 = vunpack.c.l.bf16 %v6468_v41  ;;  %v7539_v47 = vunpack.c.l.bf16 %v6485_v11 }
 0x4f6   : > { %v3196_v28 = vadd.f32 %v7532_v10, %v7531_v59  ;;  %7533 = vst [vmem:[#allocation67_spill] sm:$0xff] %v6509_v4  ;;  %v6514_v59 = vld [vmem:[%s5583_s2 + $0x80] sm:$0xff]  ;;  %3174 = vadd.xlane.f32.xlu0 %v3173_v18  ;;  %v3183_v10 = vadd.f32 %v3182_v58, %v7351_v21  ;;  %v4334_v25 = vpop.f32.mrb[84].mxu0  ;;  %v7538_v18 = vunpack.c.h.bf16 %v6415_v31  ;;  %v6547_v21 = vld [vmem:[%s5583_s2 + $0x88] sm:$0xff] }
 0x4f7   : > { %7534 = vst [vmem:[#allocation68_spill] sm:$0xff] %v6514_v59  ;;  %v3201_v51 = vadd.f32 %v7353_v3, %v7535_v62  ;;  %3179 = vadd.xlane.f32.xlu1 %v3178_v56  ;;  %v7541_v62 = vunpack.c.h.bf16 %v6488_v24  ;;  %v3582_v41 = vadd.f32 %v4334_v25, %v6427_v33  ;;  %v3573_v16 = vpop.f32.mrb[85].mxu0  ;;  %v7544_v24 = vunpack.c.l.bf16 %v6509_v4 }
 0x4f8   : > { %v3188_v58 = vadd.f32 %v3187_v9, %v7538_v18  ;;  %v3197_v55 = vadd.f32 %v3196_v28, %v7539_v47  ;;  %v3574_v18 = vadd.f32 %v6427_v33, %v3573_v16  ;;  %v4335_v28 = vpop.f32.mrb[86].mxu0  ;;  %v7543_v16 = vunpack.c.h.bf16 %v6463_v40 }
 0x4f9   : > { %v3206_v3 = vadd.f32 %v7541_v62, %v7540_v20  ;;  %v6552_v62 = vld [vmem:[%s5583_s2 + $0xa0] sm:$0xff]  ;;  %3626 = vst [vmem:[%s6472_s10 + $0x30] sm:$0xff] %v3582_v41  ;;  %v3585_v8 = vadd.f32 %v4335_v28, %v6427_v33  ;;  %v3576_v9 = vpop.f32.mrb[87].mxu0  ;;  %v3202_v47 = vadd.f32 %v3201_v51, %v7544_v24  ;;  %v7545_v2 = vunpack.c.l.bf16 %v6514_v59  ;;  %v6568_v41 = vld [vmem:[%s5583_s2 + $0xb0] sm:$0xff] }
 0x4fa   : > { %7542 = vst [vmem:[#allocation71_spill] sm:$0xff] %v6552_v62  ;;  %3184 = vadd.xlane.f32.xlu0 %v3183_v10  ;;  %v3193_v56 = vadd.f32 %v3192_v27, %v7543_v16  ;;  %v7546_v20 = vunpack.c.h.bf16 %v6514_v59  ;;  %7547 = vst [vmem:[#allocation72_spill] sm:$0xff] %v6568_v41  ;;  %v3577_v10 = vadd.f32 %v6427_v33, %v3576_v9  ;;  %v7548_v27 = vunpack.c.h.bf16 %v6485_v11 }
 0x4fb   : > { %3624 = vst [vmem:[%s6472_s10 + $0x20] sm:$0xff] %v3574_v18  ;;  %3189 = vadd.xlane.f32.xlu1 %v3188_v58  ;;  %v7549_v24 = vunpack.c.l.bf16 %v6526_v19  ;;  %v7550_v16 = vunpack.c.l.bf16 %v6529_v35  ;;  %3627 = vst [vmem:[%s6472_s10 + $0x38] sm:$0xff] %v3585_v8  ;;  %v7370_v59 = vunpack.c.h.bf16 %v6509_v4  ;;  %v7371_v18 = vunpack.c.l.bf16 %v6547_v21  ;;  %v6609_v8 = vld [vmem:[%s5583_s2 + $0xd0] sm:$0xff] }
 0x4fc   : > { %v3211_v25 = vadd.f32 %v7546_v20, %v7545_v2  ;;  %v3198_v28 = vadd.f32 %v3197_v55, %v7548_v27  ;;  %v7551_v2 = vunpack.c.h.bf16 %v6529_v35  ;;  %v7372_v9 = vunpack.c.h.bf16 %v6552_v62  ;;  %3625 = vst [vmem:[%s6472_s10 + $0x28] sm:$0xff] %v3577_v10  ;;  %v6589_v27 = vld [vmem:[%s5583_s2 + $0xa8] sm:$0xff]  ;;  %v6606_v35 = vld [vmem:[%s5583_s2 + $0xb8] sm:$0xff]  ;;  %7556 = vst [vmem:[#allocation76_spill] sm:$0xff] %v6609_v8 }
 0x4fd   : > { %v3207_v51 = vadd.f32 %v3206_v3, %v7549_v24  ;;  %7552 = vst [vmem:[#allocation73_spill] sm:$0xff] %v6589_v27  ;;  %v7554_v55 = vunpack.c.l.bf16 %v6552_v62  ;;  %7555 = vst [vmem:[#allocation75_spill] sm:$0xff] %v6606_v35  ;;  %v7559_v58 = vunpack.c.l.bf16 %v6568_v41 }
 0x4fe   : > { %v3216_v20 = vadd.f32 %v7551_v2, %v7550_v16  ;;  %v6594_v16 = vld [vmem:[%s5583_s2 + $0xc0] sm:$0xff]  ;;  %3194 = vadd.xlane.f32.xlu0 %v3193_v56  ;;  %v3203_v2 = vadd.f32 %v3202_v47, %v7370_v59  ;;  %v3212_v10 = vadd.f32 %v3211_v25, %v7371_v18  ;;  %v4338_v24 = vpop.f32.mrb[88].mxu0  ;;  %v7557_v56 = vunpack.c.h.bf16 %v6526_v19  ;;  %v6627_v59 = vld [vmem:[%s5583_s2 + $0xc8] sm:$0xff] }
 0x4ff   : > { %7553 = vst [vmem:[#allocation74_spill] sm:$0xff] %v6594_v16  ;;  %v3221_v3 = vadd.f32 %v7372_v9, %v7554_v55  ;;  %3199 = vadd.xlane.f32.xlu1 %v3198_v28  ;;  %v7558_v25 = vunpack.c.l.bf16 %v6565_v50  ;;  %v7560_v55 = vunpack.c.h.bf16 %v6568_v41  ;;  %v3598_v62 = vadd.f32 %v4338_v24, %v6427_v33  ;;  %v3589_v4 = vpop.f32.mrb[89].mxu0 }
 0x500   : > { %v3208_v47 = vadd.f32 %v3207_v51, %v7557_v56  ;;  %v3590_v56 = vadd.f32 %v6427_v33, %v3589_v4  ;;  %v7562_v4 = vunpack.c.h.bf16 %v6547_v21  ;;  %v7563_v41 = vunpack.c.l.bf16 %v6589_v27 }
 0x501   : > { %v3217_v18 = vadd.f32 %v3216_v20, %v7558_v25  ;;  %v3226_v9 = vadd.f32 %v7560_v55, %v7559_v58  ;;  %v4339_v20 = vpop.f32.mrb[90].mxu0  ;;  %v6632_v55 = vld [vmem:[%s5583_s2 + $0xe0] sm:$0xff]  ;;  %3630 = vst [vmem:[%s6472_s10 + $0x50] sm:$0xff] %v3598_v62  ;;  %v7564_v43 = vunpack.c.l.bf16 %v6594_v16  ;;  %v7565_v58 = vunpack.c.h.bf16 %v6594_v16  ;;  %v6648_v62 = vld [vmem:[%s5583_s2 + $0xf0] sm:$0xff] }
 0x502   : > { %7561 = vst [vmem:[#allocation77_spill] sm:$0xff] %v6632_v55  ;;  %v3601_v19 = vadd.f32 %v4339_v20, %v6427_v33  ;;  %3204 = vadd.xlane.f32.xlu0 %v3203_v2  ;;  %v3592_v51 = vpop.f32.mrb[91].mxu0  ;;  %v3213_v28 = vadd.f32 %v3212_v10, %v7562_v4  ;;  %v3222_v25 = vadd.f32 %v3221_v3, %v7563_v41  ;;  %7567 = vst [vmem:[#allocation79_spill] sm:$0xff] %v6648_v62 }
 0x503   : > { %v3231_v24 = vadd.f32 %v7565_v58, %v7564_v43  ;;  %3628 = vst [vmem:[%s6472_s10 + $0x40] sm:$0xff] %v3590_v56  ;;  %v3593_v2 = vadd.f32 %v6427_v33, %v3592_v51  ;;  %3209 = vadd.xlane.f32.xlu1 %v3208_v47  ;;  %v7568_v10 = vunpack.c.h.bf16 %v6565_v50  ;;  %v7569_v4 = vunpack.c.l.bf16 %v6606_v35 }
 0x504   : > { %v7570_v3 = vunpack.c.l.bf16 %v6609_v8  ;;  %v7571_v16 = vunpack.c.h.bf16 %v6609_v8  ;;  %3631 = vst [vmem:[%s6472_s10 + $0x58] sm:$0xff] %v3601_v19  ;;  %v7389_v58 = vunpack.c.h.bf16 %v6589_v27  ;;  %v7390_v56 = vunpack.c.l.bf16 %v6627_v59 }
 0x505   : > { %v3218_v20 = vadd.f32 %v3217_v18, %v7568_v10  ;;  %v3227_v41 = vadd.f32 %v3226_v9, %v7569_v4  ;;  %v7391_v51 = vunpack.c.l.bf16 %v6632_v55  ;;  %3629 = vst [vmem:[%s6472_s10 + $0x48] sm:$0xff] %v3593_v2  ;;  %v6669_v10 = vld [vmem:[%s5583_s2 + $0xe8] sm:$0xff]  ;;  %v7394_v4 = vunpack.c.l.bf16 %v6648_v62  ;;  %v6683_v18 = vld [vmem:[%s5583_s2 + $0xf8] sm:$0xff] }
 0x506   : > { %v3236_v43 = vadd.f32 %v7571_v16, %v7570_v3  ;;  %7572 = vst [vmem:[#allocation80_spill] sm:$0xff] %v6669_v10  ;;  %3214 = vadd.xlane.f32.xlu0 %v3213_v28  ;;  %v3223_v16 = vadd.f32 %v3222_v25, %v7389_v58  ;;  %v3232_v47 = vadd.f32 %v3231_v24, %v7390_v56  ;;  %v7573_v2 = vunpack.c.h.bf16 %v6632_v55  ;;  %v4342_v8 = vpop.f32.mrb[92].mxu0 }
 0x507   : > { %7574 = vst [vmem:[#allocation81_spill] sm:$0xff] %v6683_v18  ;;  %3219 = vadd.xlane.f32.xlu1 %v3218_v20  ;;  %v7575_v28 = vunpack.c.h.bf16 %v6606_v35  ;;  %v7576_v58 = vunpack.c.l.bf16 %v6645_v54  ;;  %v7577_v24 = vunpack.c.h.bf16 %v6648_v62  ;;  %v7578_v20 = vunpack.c.l.bf16 %v6329_v12 }
 0x508   : > { %v3241_v9 = vadd.f32 %v7573_v2, %v7391_v51  ;;  %v3614_v2 = vadd.f32 %v4342_v8, %v6427_v33  ;;  %v3605_v51 = vpop.f32.mrb[93].mxu0  ;;  %v7580_v8 = vunpack.c.l.bf16 %v6337_v37  ;;  %v7581_v55 = vunpack.c.h.bf16 %v6337_v37 }
 0x509   : > { %v3228_v19 = vadd.f32 %v3227_v41, %v7575_v28  ;;  %v3237_v3 = vadd.f32 %v3236_v43, %v7576_v58  ;;  %v3246_v56 = vadd.f32 %v7577_v24, %v7394_v4  ;;  %v3251_v41 = vmul.f32 %v7578_v20, %v6034_v17  ;;  %v4343_v58 = vpop.f32.mrb[94].mxu0 }
 0x50a   : > { %v7579_v28 = vunpack.c.h.bf16 %v6329_v12  ;;  %v3606_v43 = vadd.f32 %v6427_v33, %v3605_v51  ;;  %v3255_v4 = vmul.f32 %v7580_v8, %v6046_v0  ;;  %v3256_v62 = vmul.f32 %v7581_v55, %v6056_v45  ;;  %3634 = vst [vmem:[%s6472_s10 + $0x70] sm:$0xff] %v3614_v2  ;;  %3224 = vadd.xlane.f32.xlu0 %v3223_v16  ;;  %v3608_v12 = vpop.f32.mrb[95].mxu0 }
 0x50b   : > { %v3617_v20 = vadd.f32 %v4343_v58, %v6427_v33  ;;  %v7582_v51 = vunpack.c.h.bf16 %v6627_v59  ;;  %v7583_v35 = vunpack.c.l.bf16 %v6669_v10  ;;  %v3609_v27 = vadd.f32 %v6427_v33, %v3608_v12  ;;  %3229 = vadd.xlane.f32.xlu1 %v3228_v19 }
 0x50c   : > { %v3252_v25 = vmul.f32 %v7579_v28, %v6040_v36  ;;  %3632 = vst [vmem:[%s6472_s10 + $0x60] sm:$0xff] %v3606_v43  ;;  %v7584_v8 = vunpack.c.h.bf16 %v6645_v54  ;;  %v7585_v55 = vunpack.c.l.bf16 %v6683_v18  ;;  %v7402_v16 = vunpack.c.h.bf16 %v6669_v10 }
 0x50d   : > { %v3233_v28 = vadd.f32 %v3232_v47, %v7582_v51  ;;  %v3242_v24 = vadd.f32 %v3241_v9, %v7583_v35  ;;  %3635 = vst [vmem:[%s6472_s10 + $0x78] sm:$0xff] %v3617_v20  ;;  %v7586_v47 = vunpack.c.l.bf16 %v6377_v14  ;;  %v7587_v35 = vunpack.c.h.bf16 %v6377_v14  ;;  %3633 = vst [vmem:[%s6472_s10 + $0x68] sm:$0xff] %v3609_v27 }
 0x50e   : > { %v3238_v37 = vadd.f32 %v3237_v3, %v7584_v8  ;;  %v3247_v2 = vadd.f32 %v3246_v56, %v7585_v55  ;;  %v3315_v58 = vadd.f32 %v3252_v25, %v3251_v41  ;;  %v7401_v33 = vunpack.c.h.bf16 %v6683_v18 }
 0x50f   : > { %v3259_v51 = vmul.f32 %v7586_v47, %v6079_v15  ;;  %v3260_v9 = vmul.f32 %v7587_v35, %v6086_v38  ;;  %v3320_v19 = vadd.f32 %v3256_v62, %v3255_v4  ;;  %v7588_v3 = vunpack.c.l.bf16 %v6380_v23  ;;  %3234 = vadd.xlane.f32.xlu0 %v3233_v28 }
 0x510   : > { %v7589_v43 = vunpack.c.h.bf16 %v6380_v23  ;;  %v3243_v41 = vadd.f32 %v3242_v24, %v7402_v16  ;;  %v7590_v14 = vunpack.c.l.bf16 %v6332_v26  ;;  %3239 = vadd.xlane.f32.xlu1 %v3238_v37  ;;  %v3248_v27 = vadd.f32 %v3247_v2, %v7401_v33 }
 0x511   : > { %v3263_v56 = vmul.f32 %v7588_v3, %v6093_v52  ;;  %v7591_v62 = vunpack.c.l.bf16 %v6340_v49  ;;  %v3325_v8 = vadd.f32 %v3260_v9, %v3259_v51  ;;  %v7592_v23 = vunpack.c.l.bf16 %v6433_v44 }
 0x512   : > { %v3264_v25 = vmul.f32 %v7589_v43, %v6103_v42  ;;  %v3253_v20 = vmul.f32 %v7590_v14, %v6037_v57  ;;  %v7593_v24 = vunpack.c.h.bf16 %v6433_v44  ;;  %v7594_v37 = vunpack.c.l.bf16 %v6444_v13 }
 0x513   : > { %v3257_v4 = vmul.f32 %v7591_v62, %v6049_v6  ;;  %v3267_v28 = vmul.f32 %v7592_v23, %v6123_v29  ;;  %v7595_v3 = vunpack.c.h.bf16 %v6444_v13  ;;  %3244 = vadd.xlane.f32.xlu0 %v3243_v41  ;;  %v7597_v9 = vunpack.c.l.bf16 %v6407_v39 }
 0x514   : > { %v3316_v12 = vadd.f32 %v3315_v58, %v3253_v20  ;;  %v3268_v55 = vmul.f32 %v7593_v24, %v6130_v1  ;;  %v3330_v35 = vadd.f32 %v3264_v25, %v3263_v56  ;;  %v3271_v2 = vmul.f32 %v7594_v37, %v6137_v5  ;;  %3249 = vadd.xlane.f32.xlu1 %v3248_v27 }
 0x515   : > { %v3321_v47 = vadd.f32 %v3320_v19, %v3257_v4  ;;  %v3272_v43 = vmul.f32 %v7595_v3, %v6147_v32  ;;  %v7596_v58 = vunpack.c.h.bf16 %v6332_v26  ;;  %v3261_v44 = vmul.f32 %v7597_v9, %v6082_v63 }
 0x516   : > { %v7598_v19 = vunpack.c.h.bf16 %v6340_v49  ;;  %v7599_v25 = vunpack.c.l.bf16 %v6415_v31  ;;  %v3335_v41 = vadd.f32 %v3268_v55, %v3267_v28  ;;  %v7600_v23 = vunpack.c.h.bf16 %v6407_v39 }
 0x517   : > { %v3254_v51 = vmul.f32 %v7596_v58, %v6043_v53  ;;  %v3326_v20 = vadd.f32 %v3325_v8, %v3261_v44  ;;  %v3340_v26 = vadd.f32 %v3272_v43, %v3271_v2  ;;  %v7601_v27 = vunpack.c.l.bf16 %v6463_v40 }
 0x518   : > { %v3258_v56 = vmul.f32 %v7598_v19, %v6059_v61  ;;  %v3265_v14 = vmul.f32 %v7599_v25, %v6096_v34  ;;  %v3262_v24 = vmul.f32 %v7600_v23, %v6089_v46  ;;  %v7602_v37 = vunpack.c.h.bf16 %v6415_v31 }
 0x519   : > { %v3317_v13 = vadd.f32 %v3316_v12, %v3254_v51  ;;  %v3269_v49 = vmul.f32 %v7601_v27, %v6126_v30  ;;  %v7603_v12 = vunpack.c.l.bf16 %v6485_v11  ;;  %v7604_v39 = vunpack.c.h.bf16 %v6463_v40 }
 0x51a   : > { %v3322_v62 = vadd.f32 %v3321_v47, %v3258_v56  ;;  %v3331_v4 = vadd.f32 %v3330_v35, %v3265_v14  ;;  %v3266_v3 = vmul.f32 %v7602_v37, %v6106_v7  ;;  %v3327_v28 = vadd.f32 %v3326_v20, %v3262_v24 }
 0x51b   : > { %3318 = vadd.xlane.f32.xlu0 %v3317_v13  ;;  %v3273_v8 = vmul.f32 %v7603_v12, %v6140_v22  ;;  %v3336_v55 = vadd.f32 %v3335_v41, %v3269_v49  ;;  %v3270_v2 = vmul.f32 %v7604_v39, %v6133_v60  ;;  %v7605_v43 = vunpack.c.h.bf16 %v6485_v11 }
 0x51c   : > { %3323 = vadd.xlane.f32.xlu1 %v3322_v62  ;;  %v3332_v47 = vadd.f32 %v3331_v4, %v3266_v3 }
 0x51d   : > { %v3341_v35 = vadd.f32 %v3340_v26, %v3273_v8  ;;  %v3274_v58 = vmul.f32 %v7605_v43, %v6150_v48  ;;  %v3337_v31 = vadd.f32 %v3336_v55, %v3270_v2 }
 0x51f   : > { %3328 = vadd.xlane.f32.xlu0 %v3327_v28  ;;  %v3342_v51 = vadd.f32 %v3341_v35, %v3274_v58 }
 0x520   : > { %3333 = vadd.xlane.f32.xlu1 %v3332_v47 }
 0x523   : > { %3338 = vadd.xlane.f32.xlu0 %v3337_v31 }
 0x524   : > { %3343 = vadd.xlane.f32.xlu1 %v3342_v51 }
 0x546   : > { %v6790_v9 = vpop.xlane.xlu0 %2678 }
 0x547   : > { %7606 = vst [vmem:[#allocation82_spill] sm:$0xff] %v6790_v9  ;;  %v2755_v44 = vsub.f32 %v6034_v17, %v6790_v9  ;;  %v2756_v19 = vsub.f32 %v6040_v36, %v6790_v9  ;;  %v2757_v40 = vsub.f32 %v6037_v57, %v6790_v9  ;;  %v2758_v56 = vsub.f32 %v6043_v53, %v6790_v9  ;;  %v6800_v11 = vpop.xlane.xlu1 %2683 }
 0x548   : > { %7607 = vst [vmem:[#allocation83_spill] sm:$0xff] %v6800_v11  ;;  %v2759_v25 = vsub.f32 %v6046_v0, %v6800_v11  ;;  %v2760_v14 = vsub.f32 %v6056_v45, %v6800_v11  ;;  %v2761_v36 = vsub.f32 %v6049_v6, %v6800_v11  ;;  %v2762_v57 = vsub.f32 %v6059_v61, %v6800_v11 }
 0x549   : > { %v2819_v13 = vmul.f32 1.442695, %v2755_v44  ;;  %v2821_v20 = vmul.f32 1.442695, %v2756_v19  ;;  %v2823_v17 = vmul.f32 1.442695, %v2757_v40 }
 0x54a   : > { %v2825_v41 = vmul.f32 1.442695, %v2758_v56  ;;  %v2827_v53 = vmul.f32 1.442695, %v2759_v25  ;;  %v2829_v62 = vmul.f32 1.442695, %v2760_v14 }
 0x54b   : > { %4710 = vpow2.f32 %v2819_v13  ;;  %v2831_v4 = vmul.f32 1.442695, %v2761_v36  ;;  %v2833_v0 = vmul.f32 1.442695, %v2762_v57 }
 0x54c   : > { %4712 = vpow2.f32 %v2821_v20 }
 0x54d   : > { %4714 = vpow2.f32 %v2823_v17 }
 0x54e   : > { %4716 = vpow2.f32 %v2825_v41  ;;  %v6810_v26 = vpop.xlane.xlu0 %2688 }
 0x54f   : > { %7608 = vst [vmem:[#allocation84_spill] sm:$0xff] %v6810_v26  ;;  %4718 = vpow2.f32 %v2827_v53  ;;  %v2763_v45 = vsub.f32 %v6079_v15, %v6810_v26  ;;  %v2764_v6 = vsub.f32 %v6086_v38, %v6810_v26  ;;  %v2765_v61 = vsub.f32 %v6082_v63, %v6810_v26  ;;  %v6818_v23 = vpop.xlane.xlu1 %2693 }
 0x550   : > { %7609 = vst [vmem:[#allocation85_spill] sm:$0xff] %v6818_v23  ;;  %4720 = vpow2.f32 %v2829_v62  ;;  %v2766_v24 = vsub.f32 %v6089_v46, %v6810_v26  ;;  %v2767_v27 = vsub.f32 %v6093_v52, %v6818_v23  ;;  %v2768_v49 = vsub.f32 %v6103_v42, %v6818_v23 }
 0x551   : > { %4722 = vpow2.f32 %v2831_v4  ;;  %v2835_v15 = vmul.f32 1.442695, %v2763_v45  ;;  %v2837_v37 = vmul.f32 1.442695, %v2764_v6  ;;  %v2839_v3 = vmul.f32 1.442695, %v2765_v61 }
 0x552   : > { %4724 = vpow2.f32 %v2833_v0  ;;  %v2841_v38 = vmul.f32 1.442695, %v2766_v24  ;;  %v2769_v63 = vsub.f32 %v6096_v34, %v6818_v23  ;;  %v2770_v12 = vsub.f32 %v6106_v7, %v6818_v23  ;;  %v7613_v0 = vld [vmem:[#allocation25_spill] sm:$0xff]  ;;  %v7614_v6 = vld [vmem:[#allocation27_spill] sm:$0xff] }
 0x553   : > { %4726 = vpow2.f32 %v2835_v15  ;;  %v2843_v46 = vmul.f32 1.442695, %v2767_v27  ;;  %v2845_v8 = vmul.f32 1.442695, %v2768_v49  ;;  %v7616_v49 = vld [vmem:[#allocation26_spill] sm:$0xff] }
 0x554   : > { %4728 = vpow2.f32 %v2837_v37  ;;  %v2847_v28 = vmul.f32 1.442695, %v2769_v63  ;;  %v2849_v55 = vmul.f32 1.442695, %v2770_v12  ;;  %v7617_v37 = vld [vmem:[#allocation28_spill] sm:$0xff] }
 0x555   : > { %v4711_v52 = vpop.eup %4710  ;;  %4730 = vpow2.f32 %v2839_v3 }
 0x556   : > { %v4713_v42 = vpop.eup %4712  ;;  %4732 = vpow2.f32 %v2841_v38  ;;  %v6830_v47 = vpop.xlane.xlu0 %2698 }
 0x557   : > { %7610 = vst [vmem:[#allocation86_spill] sm:$0xff] %v6830_v47  ;;  %v4715_v35 = vpop.eup %4714  ;;  %4734 = vpow2.f32 %v2843_v46  ;;  %v2771_v34 = vsub.f32 %v6123_v29, %v6830_v47  ;;  %v2772_v7 = vsub.f32 %v6130_v1, %v6830_v47  ;;  %v2773_v39 = vsub.f32 %v6126_v30, %v6830_v47  ;;  %v6838_v2 = vpop.xlane.xlu1 %2703 }
 0x558   : > { %7611 = vst [vmem:[#allocation87_spill] sm:$0xff] %v6838_v2  ;;  %v4717_v43 = vpop.eup %4716  ;;  %4736 = vpow2.f32 %v2845_v8  ;;  %v2774_v58 = vsub.f32 %v6133_v60, %v6830_v47  ;;  %v2775_v31 = vsub.f32 %v6137_v5, %v6838_v2  ;;  %v2776_v51 = vsub.f32 %v6147_v32, %v6838_v2  ;;  %v7618_v8 = vld [vmem:[#allocation29_spill] sm:$0xff] }
 0x559   : > { %v4719_v29 = vpop.eup %4718  ;;  %4738 = vpow2.f32 %v2847_v28  ;;  %v2851_v44 = vmul.f32 1.442695, %v2771_v34  ;;  %v2853_v1 = vmul.f32 1.442695, %v2772_v7  ;;  %v2855_v19 = vmul.f32 1.442695, %v2773_v39 }
 0x55a   : > { %v4721_v40 = vpop.eup %4720  ;;  %4740 = vpow2.f32 %v2849_v55  ;;  %v2857_v30 = vmul.f32 1.442695, %v2774_v58  ;;  %v2777_v56 = vsub.f32 %v6140_v22, %v6838_v2  ;;  %v2778_v60 = vsub.f32 %v6150_v48, %v6838_v2  ;;  %v7620_v39 = vld [vmem:[#allocation30_spill] sm:$0xff]  ;;  %v7621_v58 = vld [vmem:[#allocation32_spill] sm:$0xff]  ;;  %v7648_v47 = vld [vmem:[#allocation53_spill] sm:$0xff] }
 0x55b   : > { %v4723_v25 = vpop.eup %4722  ;;  %4742 = vpow2.f32 %v2851_v44  ;;  %v2859_v5 = vmul.f32 1.442695, %v2775_v31  ;;  %v2947_v14 = vadd.f32 %v4713_v42, %v4711_v52  ;;  %v2861_v32 = vmul.f32 1.442695, %v2776_v51 }
 0x55c   : > { %v4725_v13 = vpop.eup %4724  ;;  %4744 = vpow2.f32 %v2853_v1  ;;  %v2952_v20 = vadd.f32 %v4721_v40, %v4719_v29  ;;  %v2863_v36 = vmul.f32 1.442695, %v2777_v56  ;;  %v2865_v53 = vmul.f32 1.442695, %v2778_v60 }
 0x55d   : > { %v4727_v17 = vpop.eup %4726  ;;  %4746 = vpow2.f32 %v2855_v19  ;;  %v2948_v41 = vadd.f32 %v4715_v35, %v2947_v14  ;;  %v7619_v35 = vld [vmem:[#allocation31_spill] sm:$0xff] }
 0x55e   : > { %v4729_v57 = vpop.eup %4728  ;;  %4748 = vpow2.f32 %v2857_v30  ;;  %v6850_v62 = vpop.xlane.xlu0 %2708  ;;  %v2953_v22 = vadd.f32 %v4723_v25, %v2952_v20 }
 0x55f   : > { %7612 = vst [vmem:[#allocation88_spill] sm:$0xff] %v6850_v62  ;;  %v4731_v4 = vpop.eup %4730  ;;  %4750 = vpow2.f32 %v2859_v5  ;;  %v2949_v48 = vadd.f32 %v4717_v43, %v2948_v41  ;;  %v2779_v45 = vsub.f32 %v7613_v0, %v6850_v62  ;;  %v2780_v61 = vsub.f32 %v7614_v6, %v6850_v62  ;;  %v6856_v24 = vpop.xlane.xlu1 %2713 }
 0x560   : > { %7615 = vst [vmem:[#allocation25_spill] sm:$0xff] %v6856_v24  ;;  %v4733_v27 = vpop.eup %4732  ;;  %4752 = vpow2.f32 %v2861_v32  ;;  %v2781_v15 = vsub.f32 %v7616_v49, %v6850_v62  ;;  %v2782_v3 = vsub.f32 %v7617_v37, %v6850_v62  ;;  %v2954_v38 = vadd.f32 %v4725_v13, %v2953_v22  ;;  %v7623_v32 = vld [vmem:[#allocation33_spill] sm:$0xff] }
 0x561   : > { %v4735_v63 = vpop.eup %4734  ;;  %4754 = vpow2.f32 %v2863_v36  ;;  %2950 = vadd.xlane.f32.xlu0 %v2949_v48  ;;  %v2867_v12 = vmul.f32 1.442695, %v2779_v45  ;;  %v2869_v46 = vmul.f32 1.442695, %v2780_v61  ;;  %v2783_v52 = vsub.f32 %v7618_v8, %v6856_v24  ;;  %v7624_v36 = vld [vmem:[#allocation35_spill] sm:$0xff] }
 0x562   : > { %v4737_v28 = vpop.eup %4736  ;;  %4756 = vpow2.f32 %v2865_v53  ;;  %v2871_v42 = vmul.f32 1.442695, %v2781_v15  ;;  %v2873_v55 = vmul.f32 1.442695, %v2782_v3  ;;  %2955 = vadd.xlane.f32.xlu1 %v2954_v38  ;;  %v2784_v34 = vsub.f32 %v7619_v35, %v6856_v24 }
 0x563   : > { %v4739_v7 = vpop.eup %4738  ;;  %4758 = vpow2.f32 %v2867_v12  ;;  %v2785_v43 = vsub.f32 %v7620_v39, %v6856_v24  ;;  %v2786_v31 = vsub.f32 %v7621_v58, %v6856_v24  ;;  %v2875_v51 = vmul.f32 1.442695, %v2783_v52  ;;  %v7628_v52 = vld [vmem:[#allocation37_spill] sm:$0xff] }
 0x564   : > { %v4741_v29 = vpop.eup %4740  ;;  %4760 = vpow2.f32 %v2869_v46  ;;  %v2877_v44 = vmul.f32 1.442695, %v2784_v34  ;;  %v2957_v1 = vadd.f32 %v4729_v57, %v4727_v17  ;;  %v2962_v19 = vadd.f32 %v4737_v28, %v4735_v63  ;;  %v7625_v17 = vld [vmem:[#allocation34_spill] sm:$0xff] }
 0x565   : > { %v4743_v40 = vpop.eup %4742  ;;  %4762 = vpow2.f32 %v2871_v42  ;;  %v2879_v30 = vmul.f32 1.442695, %v2785_v43  ;;  %v2881_v60 = vmul.f32 1.442695, %v2786_v31  ;;  %v7629_v42 = vld [vmem:[#allocation39_spill] sm:$0xff]  ;;  %v7630_v34 = vld [vmem:[#allocation38_spill] sm:$0xff] }
 0x566   : > { %v4745_v56 = vpop.eup %4744  ;;  %4764 = vpow2.f32 %v2873_v55  ;;  %v2958_v25 = vadd.f32 %v4731_v4, %v2957_v1  ;;  %v6870_v5 = vpop.xlane.xlu0 %2718  ;;  %v2963_v14 = vadd.f32 %v4739_v7, %v2962_v19  ;;  %v7627_v4 = vld [vmem:[#allocation36_spill] sm:$0xff] }
 0x567   : > { %7622 = vst [vmem:[#allocation27_spill] sm:$0xff] %v6870_v5  ;;  %v4747_v13 = vpop.eup %4746  ;;  %4766 = vpow2.f32 %v2875_v51  ;;  %v2787_v20 = vsub.f32 %v7623_v32, %v6870_v5  ;;  %v2788_v41 = vsub.f32 %v7624_v36, %v6870_v5  ;;  %v2789_v57 = vsub.f32 %v7625_v17, %v6870_v5  ;;  %v6878_v53 = vpop.xlane.xlu1 %2723  ;;  %v7631_v43 = vld [vmem:[#allocation40_spill] sm:$0xff] }
 0x568   : > { %7626 = vst [vmem:[#allocation26_spill] sm:$0xff] %v6878_v53  ;;  %v4749_v22 = vpop.eup %4748  ;;  %4768 = vpow2.f32 %v2877_v44  ;;  %v2959_v48 = vadd.f32 %v4733_v27, %v2958_v25  ;;  %v2790_v45 = vsub.f32 %v7627_v4, %v6870_v5  ;;  %v2964_v61 = vadd.f32 %v4741_v29, %v2963_v14 }
 0x569   : > { %v4751_v15 = vpop.eup %4750  ;;  %4770 = vpow2.f32 %v2879_v30  ;;  %v2883_v3 = vmul.f32 1.442695, %v2787_v20  ;;  %v2885_v38 = vmul.f32 1.442695, %v2788_v41  ;;  %v2887_v63 = vmul.f32 1.442695, %v2789_v57 }
 0x56a   : > { %v4753_v12 = vpop.eup %4752  ;;  %4772 = vpow2.f32 %v2881_v60  ;;  %2960 = vadd.xlane.f32.xlu0 %v2959_v48  ;;  %v2889_v46 = vmul.f32 1.442695, %v2790_v45  ;;  %2965 = vadd.xlane.f32.xlu1 %v2964_v61  ;;  %v2791_v28 = vsub.f32 %v7628_v52, %v6878_v53  ;;  %v2792_v27 = vsub.f32 %v7629_v42, %v6878_v53  ;;  %v7634_v61 = vld [vmem:[#allocation43_spill] sm:$0xff] }
 0x56b   : > { %v4755_v55 = vpop.eup %4754  ;;  %4774 = vpow2.f32 %v2883_v3  ;;  %v2793_v7 = vsub.f32 %v7630_v34, %v6878_v53  ;;  %v2794_v31 = vsub.f32 %v7631_v43, %v6878_v53  ;;  %v2967_v51 = vadd.f32 %v4745_v56, %v4743_v40  ;;  %v7633_v40 = vld [vmem:[#allocation41_spill] sm:$0xff] }
 0x56c   : > { %v4757_v29 = vpop.eup %4756  ;;  %4776 = vpow2.f32 %v2885_v38  ;;  %v2891_v44 = vmul.f32 1.442695, %v2791_v28  ;;  %v2893_v1 = vmul.f32 1.442695, %v2792_v27  ;;  %v2972_v19 = vadd.f32 %v4753_v12, %v4751_v15  ;;  %v7637_v12 = vld [vmem:[#allocation44_spill] sm:$0xff] }
 0x56d   : > { %v4759_v30 = vpop.eup %4758  ;;  %4778 = vpow2.f32 %v2887_v63  ;;  %v2895_v60 = vmul.f32 1.442695, %v2793_v7  ;;  %v2968_v25 = vadd.f32 %v4747_v13, %v2967_v51  ;;  %v2897_v20 = vmul.f32 1.442695, %v2794_v31  ;;  %v7636_v13 = vld [vmem:[#allocation42_spill] sm:$0xff]  ;;  %v7638_v7 = vld [vmem:[#allocation45_spill] sm:$0xff] }
 0x56e   : > { %v4761_v14 = vpop.eup %4760  ;;  %4780 = vpow2.f32 %v2889_v46  ;;  %v6890_v41 = vpop.xlane.xlu0 %2728  ;;  %v2973_v57 = vadd.f32 %v4755_v55, %v2972_v19 }
 0x56f   : > { %7632 = vst [vmem:[#allocation28_spill] sm:$0xff] %v6890_v41  ;;  %v4763_v48 = vpop.eup %4762  ;;  %4782 = vpow2.f32 %v2891_v44  ;;  %v2969_v45 = vadd.f32 %v4749_v22, %v2968_v25  ;;  %v2795_v56 = vsub.f32 %v7633_v40, %v6890_v41  ;;  %v2796_v3 = vsub.f32 %v7634_v61, %v6890_v41  ;;  %v6896_v15 = vpop.xlane.xlu1 %2733 }
 0x570   : > { %7635 = vst [vmem:[#allocation29_spill] sm:$0xff] %v6896_v15  ;;  %v4765_v38 = vpop.eup %4764  ;;  %4784 = vpow2.f32 %v2893_v1  ;;  %v2797_v63 = vsub.f32 %v7636_v13, %v6890_v41  ;;  %v2798_v46 = vsub.f32 %v7637_v12, %v6890_v41  ;;  %v2974_v28 = vadd.f32 %v4757_v29, %v2973_v57  ;;  %v7639_v1 = vld [vmem:[#allocation47_spill] sm:$0xff]  ;;  %v7640_v29 = vld [vmem:[#allocation46_spill] sm:$0xff] }
 0x571   : > { %v4767_v27 = vpop.eup %4766  ;;  %4786 = vpow2.f32 %v2895_v60  ;;  %2970 = vadd.xlane.f32.xlu0 %v2969_v45  ;;  %v2899_v22 = vmul.f32 1.442695, %v2795_v56  ;;  %v2901_v55 = vmul.f32 1.442695, %v2796_v3  ;;  %v2799_v31 = vsub.f32 %v7638_v7, %v6896_v15  ;;  %v7641_v60 = vld [vmem:[#allocation48_spill] sm:$0xff] }
 0x572   : > { %v4769_v51 = vpop.eup %4768  ;;  %4788 = vpow2.f32 %v2897_v20  ;;  %v2903_v44 = vmul.f32 1.442695, %v2797_v63  ;;  %v2905_v19 = vmul.f32 1.442695, %v2798_v46  ;;  %2975 = vadd.xlane.f32.xlu1 %v2974_v28  ;;  %v2800_v25 = vsub.f32 %v7639_v1, %v6896_v15 }
 0x573   : > { %v4771_v33 = vpop.eup %4770  ;;  %4790 = vpow2.f32 %v2899_v22  ;;  %v2801_v57 = vsub.f32 %v7640_v29, %v6896_v15  ;;  %v2802_v45 = vsub.f32 %v7641_v60, %v6896_v15  ;;  %v2907_v56 = vmul.f32 1.442695, %v2799_v31  ;;  %v7643_v15 = vld [vmem:[#allocation49_spill] sm:$0xff] }
 0x574   : > { %v4773_v3 = vpop.eup %4772  ;;  %4792 = vpow2.f32 %v2901_v55  ;;  %v2909_v16 = vmul.f32 1.442695, %v2800_v25  ;;  %v2977_v41 = vadd.f32 %v4761_v14, %v4759_v30  ;;  %v2982_v20 = vadd.f32 %v4769_v51, %v4767_v27  ;;  %v7644_v55 = vld [vmem:[#allocation51_spill] sm:$0xff]  ;;  %v7645_v30 = vld [vmem:[#allocation50_spill] sm:$0xff] }
 0x575   : > { %v4775_v63 = vpop.eup %4774  ;;  %4794 = vpow2.f32 %v2903_v44  ;;  %v2911_v46 = vmul.f32 1.442695, %v2801_v57  ;;  %v2913_v53 = vmul.f32 1.442695, %v2802_v45 }
 0x576   : > { %v4777_v28 = vpop.eup %4776  ;;  %4796 = vpow2.f32 %v2905_v19  ;;  %v2978_v5 = vadd.f32 %v4763_v48, %v2977_v41  ;;  %v2983_v22 = vadd.f32 %v4771_v33, %v2982_v20  ;;  %v6910_v24 = vpop.xlane.xlu0 %2738  ;;  %v7647_v33 = vld [vmem:[#allocation52_spill] sm:$0xff] }
 0x577   : > { %7642 = vst [vmem:[#allocation31_spill] sm:$0xff] %v6910_v24  ;;  %v4779_v62 = vpop.eup %4778  ;;  %4798 = vpow2.f32 %v2907_v56  ;;  %v2803_v31 = vsub.f32 %v7643_v15, %v6910_v24  ;;  %v2804_v25 = vsub.f32 %v7644_v55, %v6910_v24  ;;  %v2805_v14 = vsub.f32 %v7645_v30, %v6910_v24  ;;  %v6918_v27 = vpop.xlane.xlu1 %2743 }
 0x578   : > { %7646 = vst [vmem:[#allocation30_spill] sm:$0xff] %v6918_v27  ;;  %v4781_v51 = vpop.eup %4780  ;;  %4800 = vpow2.f32 %v2909_v16  ;;  %v2979_v44 = vadd.f32 %v4765_v38, %v2978_v5  ;;  %v2984_v41 = vadd.f32 %v4773_v3, %v2983_v22  ;;  %v2806_v48 = vsub.f32 %v7647_v33, %v6910_v24  ;;  %v7649_v16 = vld [vmem:[#allocation55_spill] sm:$0xff]  ;;  %v7650_v3 = vld [vmem:[#allocation54_spill] sm:$0xff] }
 0x579   : > { %v4783_v19 = vpop.eup %4782  ;;  %4802 = vpow2.f32 %v2911_v46  ;;  %v2915_v57 = vmul.f32 1.442695, %v2803_v31  ;;  %v2917_v45 = vmul.f32 1.442695, %v2804_v25  ;;  %v2919_v56 = vmul.f32 1.442695, %v2805_v14 }
 0x57a   : > { %v4785_v20 = vpop.eup %4784  ;;  %4804 = vpow2.f32 %v2913_v53  ;;  %2980 = vadd.xlane.f32.xlu0 %v2979_v44  ;;  %2985 = vadd.xlane.f32.xlu1 %v2984_v41  ;;  %v2921_v2 = vmul.f32 1.442695, %v2806_v48  ;;  %v2807_v23 = vsub.f32 %v7648_v47, %v6918_v27  ;;  %v2808_v5 = vsub.f32 %v7649_v16, %v6918_v27  ;;  %v7651_v46 = vld [vmem:[#allocation56_spill] sm:$0xff] }
 0x57b   : > { %v4787_v38 = vpop.eup %4786  ;;  %4806 = vpow2.f32 %v2915_v57  ;;  %v2809_v22 = vsub.f32 %v7650_v3, %v6918_v27  ;;  %v2810_v31 = vsub.f32 %v7651_v46, %v6918_v27  ;;  %v2987_v25 = vadd.f32 %v4777_v28, %v4775_v63  ;;  %v7653_v63 = vld [vmem:[#allocation57_spill] sm:$0xff] }
 0x57c   : > { %v4789_v14 = vpop.eup %4788  ;;  %4808 = vpow2.f32 %v2917_v45  ;;  %v2923_v53 = vmul.f32 1.442695, %v2807_v23  ;;  %v2925_v44 = vmul.f32 1.442695, %v2808_v5  ;;  %v2992_v41 = vadd.f32 %v4785_v20, %v4783_v19  ;;  %v7654_v23 = vld [vmem:[#allocation59_spill] sm:$0xff]  ;;  %v7657_v5 = vld [vmem:[#allocation60_spill] sm:$0xff] }
 0x57d   : > { %v4791_v48 = vpop.eup %4790  ;;  %4810 = vpow2.f32 %v2919_v56  ;;  %v2927_v24 = vmul.f32 1.442695, %v2809_v22  ;;  %v2988_v26 = vadd.f32 %v4779_v62, %v2987_v25  ;;  %v2929_v9 = vmul.f32 1.442695, %v2810_v31  ;;  %v7658_v31 = vld [vmem:[#allocation61_spill] sm:$0xff] }
 0x57e   : > { %v4793_v11 = vpop.eup %4792  ;;  %4812 = vpow2.f32 %v2921_v2  ;;  %v2993_v57 = vadd.f32 %v4787_v38, %v2992_v41  ;;  %v7656_v2 = vld [vmem:[#allocation58_spill] sm:$0xff] }
 0x57f   : > { %v6930_v18 = vpop.xlane.xlu0 %2748  ;;  %v4795_v10 = vpop.eup %4794  ;;  %4814 = vpow2.f32 %v2923_v53  ;;  %v2989_v54 = vadd.f32 %v4781_v51, %v2988_v26 }
 0x580   : > { %7652 = vst [vmem:[#allocation32_spill] sm:$0xff] %v6930_v18  ;;  %v2811_v28 = vsub.f32 %v7653_v63, %v6930_v18  ;;  %v2812_v45 = vsub.f32 %v7654_v23, %v6930_v18  ;;  %v6936_v19 = vpop.xlane.xlu1 %2753  ;;  %v4797_v56 = vpop.eup %4796  ;;  %4816 = vpow2.f32 %v2925_v44  ;;  %v2994_v62 = vadd.f32 %v4789_v14, %v2993_v57  ;;  %v7659_v14 = vld [vmem:[#allocation63_spill] sm:$0xff] }
 0x581   : > { %7655 = vst [vmem:[#allocation33_spill] sm:$0xff] %v6936_v19  ;;  %v2813_v20 = vsub.f32 %v7656_v2, %v6930_v18  ;;  %v2814_v38 = vsub.f32 %v7657_v5, %v6930_v18  ;;  %v4799_v22 = vpop.eup %4798  ;;  %4818 = vpow2.f32 %v2927_v24  ;;  %2990 = vadd.xlane.f32.xlu0 %v2989_v54  ;;  %v2815_v25 = vsub.f32 %v7658_v31, %v6936_v19  ;;  %v7660_v18 = vld [vmem:[#allocation62_spill] sm:$0xff]  ;;  %v7661_v54 = vld [vmem:[#allocation64_spill] sm:$0xff] }
 0x582   : > { %v2931_v26 = vmul.f32 1.442695, %v2811_v28  ;;  %v2933_v51 = vmul.f32 1.442695, %v2812_v45  ;;  %v4801_v53 = vpop.eup %4800  ;;  %4820 = vpow2.f32 %v2929_v9  ;;  %2995 = vadd.xlane.f32.xlu1 %v2994_v62  ;;  %v2816_v57 = vsub.f32 %v7659_v14, %v6936_v19 }
 0x583   : > { %v2935_v41 = vmul.f32 1.442695, %v2813_v20  ;;  %v2937_v44 = vmul.f32 1.442695, %v2814_v38  ;;  %v4803_v27 = vpop.eup %4802  ;;  %v2817_v5 = vsub.f32 %v7660_v18, %v6936_v19  ;;  %v2818_v24 = vsub.f32 %v7661_v54, %v6936_v19 }
 0x584   : > { %4822 = vpow2.f32 %v2931_v26  ;;  %v2939_v28 = vmul.f32 1.442695, %v2815_v25  ;;  %v4805_v45 = vpop.eup %4804  ;;  %v2941_v46 = vmul.f32 1.442695, %v2816_v57  ;;  %v2997_v2 = vadd.f32 %v4793_v11, %v4791_v48  ;;  %v7662_v11 = vld [vmem:[#allocation65_spill] sm:$0xff] }
 0x585   : > { %4824 = vpow2.f32 %v2933_v51  ;;  %v3002_v9 = vadd.f32 %v4801_v53, %v4799_v22  ;;  %v4807_v62 = vpop.eup %4806  ;;  %v2943_v38 = vmul.f32 1.442695, %v2817_v5  ;;  %v2945_v14 = vmul.f32 1.442695, %v2818_v24 }
 0x586   : > { %4826 = vpow2.f32 %v2935_v41  ;;  %v4809_v20 = vpop.eup %4808  ;;  %v2998_v3 = vadd.f32 %v4795_v10, %v2997_v2  ;;  %v7663_v48 = vunpack.c.l.bf16 %v7662_v11  ;;  %v7664_v22 = vunpack.c.h.bf16 %v7662_v11  ;;  %v7668_v41 = vld [vmem:[#allocation68_spill] sm:$0xff] }
 0x587   : > { %4828 = vpow2.f32 %v2937_v44  ;;  %v3003_v33 = vadd.f32 %v4803_v27, %v3002_v9  ;;  %v4811_v26 = vpop.eup %4810  ;;  %v3007_v60 = vadd.f32 %v4809_v20, %v4807_v62  ;;  %v7671_v20 = vld [vmem:[#allocation67_spill] sm:$0xff] }
 0x588   : > { %4830 = vpow2.f32 %v2939_v28  ;;  %v4813_v18 = vpop.eup %4812  ;;  %v2999_v19 = vadd.f32 %v4797_v56, %v2998_v3  ;;  %v3275_v5 = vmul.f32 %v7663_v48, %v7613_v0  ;;  %v7665_v3 = vld [vmem:[#allocation66_spill] sm:$0xff]  ;;  %v7669_v0 = vunpack.c.l.bf16 %v7668_v41 }
 0x589   : > { %4832 = vpow2.f32 %v2941_v46  ;;  %v3004_v25 = vadd.f32 %v4805_v45, %v3003_v33  ;;  %v4815_v54 = vpop.eup %4814  ;;  %v3008_v51 = vadd.f32 %v4811_v26, %v3007_v60  ;;  %v3276_v46 = vmul.f32 %v7664_v22, %v7614_v6 }
 0x58a   : > { %v4817_v57 = vpop.eup %4816  ;;  %4834 = vpow2.f32 %v2943_v38  ;;  %3000 = vadd.xlane.f32.xlu0 %v2999_v19  ;;  %v7666_v33 = vunpack.c.l.bf16 %v7665_v3  ;;  %v7667_v19 = vunpack.c.h.bf16 %v7665_v3  ;;  %v3283_v44 = vmul.f32 %v7669_v0, %v7623_v32  ;;  %v7673_v32 = vld [vmem:[#allocation70_spill] sm:$0xff]  ;;  %v7679_v3 = vld [vmem:[#allocation69_spill] sm:$0xff] }
 0x58b   : > { %3005 = vadd.xlane.f32.xlu1 %v3004_v25  ;;  %v4819_v10 = vpop.eup %4818  ;;  %v3009_v27 = vadd.f32 %v4813_v18, %v3008_v51  ;;  %v3012_v2 = vadd.f32 %v4817_v57, %v4815_v54  ;;  %4836 = vpow2.f32 %v2945_v14  ;;  %v7670_v18 = vunpack.c.h.bf16 %v7668_v41 }
 0x58c   : > { %v3279_v56 = vmul.f32 %v7666_v33, %v7618_v8  ;;  %v4821_v60 = vpop.eup %4820  ;;  %v3280_v53 = vmul.f32 %v7667_v19, %v7619_v35  ;;  %v3345_v14 = vadd.f32 %v3276_v46, %v3275_v5  ;;  %v7672_v35 = vunpack.c.l.bf16 %v7671_v20  ;;  %v7676_v5 = vld [vmem:[#allocation71_spill] sm:$0xff] }
 0x58d   : > { %v3284_v54 = vmul.f32 %v7670_v18, %v7624_v36  ;;  %v3013_v6 = vadd.f32 %v4819_v10, %v3012_v2  ;;  %v7674_v51 = vunpack.c.l.bf16 %v7673_v32  ;;  %v7675_v48 = vunpack.c.h.bf16 %v7673_v32 }
 0x58e   : > { %v4823_v24 = vpop.eup %4822  ;;  %3010 = vadd.xlane.f32.xlu0 %v3009_v27  ;;  %v3277_v38 = vmul.f32 %v7672_v35, %v7616_v49  ;;  %v3350_v26 = vadd.f32 %v3280_v53, %v3279_v56  ;;  %v7677_v27 = vunpack.c.l.bf16 %v7676_v5  ;;  %v7678_v49 = vunpack.c.h.bf16 %v7676_v5 }
 0x58f   : > { %v4825_v28 = vpop.eup %4824  ;;  %v3014_v8 = vadd.f32 %v4821_v60, %v3013_v6  ;;  %v3355_v25 = vadd.f32 %v3284_v54, %v3283_v44  ;;  %v3287_v57 = vmul.f32 %v7674_v51, %v7628_v52  ;;  %v3288_v10 = vmul.f32 %v7675_v48, %v7629_v42 }
 0x590   : > { %v4827_v45 = vpop.eup %4826  ;;  %v3017_v9 = vadd.f32 %v4825_v28, %v4823_v24  ;;  %v3291_v2 = vmul.f32 %v7677_v27, %v7633_v40  ;;  %v3292_v22 = vmul.f32 %v7678_v49, %v7634_v61  ;;  %v7680_v33 = vunpack.c.l.bf16 %v7679_v3  ;;  %v7694_v27 = vld [vmem:[#allocation76_spill] sm:$0xff]  ;;  %v7697_v49 = vld [vmem:[#allocation77_spill] sm:$0xff] }
 0x591   : > { %v4829_v62 = vpop.eup %4828  ;;  %3015 = vadd.xlane.f32.xlu1 %v3014_v8  ;;  %v3346_v19 = vadd.f32 %v3345_v14, %v3277_v38  ;;  %v7681_v53 = vunpack.c.l.bf16 %v6547_v21  ;;  %v7682_v40 = vunpack.c.h.bf16 %v7671_v20  ;;  %v3360_v54 = vadd.f32 %v3288_v10, %v3287_v57 }
 0x592   : > { %v4831_v36 = vpop.eup %4830  ;;  %v3018_v11 = vadd.f32 %v4827_v45, %v3017_v9  ;;  %v3281_v52 = vmul.f32 %v7680_v33, %v7620_v39  ;;  %v3365_v24 = vadd.f32 %v3292_v22, %v3291_v2  ;;  %v7683_v39 = vld [vmem:[#allocation72_spill] sm:$0xff]  ;;  %v7686_v9 = vld [vmem:[#allocation74_spill] sm:$0xff]  ;;  %v7696_v2 = vunpack.c.h.bf16 %v7694_v27 }
 0x593   : > { %v4833_v46 = vpop.eup %4832  ;;  %v3285_v42 = vmul.f32 %v7681_v53, %v7625_v17  ;;  %v3278_v0 = vmul.f32 %v7682_v40, %v7617_v37  ;;  %v7684_v28 = vunpack.c.l.bf16 %v7683_v39  ;;  %v7685_v8 = vunpack.c.h.bf16 %v7683_v39 }
 0x594   : > { %v3019_v56 = vadd.f32 %v4829_v62, %v3018_v11  ;;  %v3022_v60 = vadd.f32 %v4833_v46, %v4831_v36  ;;  %v4835_v41 = vpop.eup %4834  ;;  %v3351_v44 = vadd.f32 %v3350_v26, %v3281_v52  ;;  %v7687_v14 = vunpack.c.l.bf16 %v7686_v9 }
 0x595   : > { %v3356_v18 = vadd.f32 %v3355_v25, %v3285_v42  ;;  %v4837_v6 = vpop.eup %4836  ;;  %v3295_v45 = vmul.f32 %v7684_v28, %v7638_v7  ;;  %v3296_v17 = vmul.f32 %v7685_v8, %v7639_v1  ;;  %v7688_v37 = vunpack.c.h.bf16 %v7686_v9  ;;  %v7714_v8 = vld [vmem:[#allocation78_spill] sm:$0xff] }
 0x596   : > { %3020 = vadd.xlane.f32.xlu0 %v3019_v56  ;;  %v3023_v61 = vadd.f32 %v4835_v41, %v3022_v60  ;;  %v3299_v62 = vmul.f32 %v7687_v14, %v7643_v15  ;;  %v3347_v38 = vadd.f32 %v3346_v19, %v3278_v0  ;;  %v7689_v26 = vunpack.c.h.bf16 %v7679_v3  ;;  %v7692_v15 = vld [vmem:[#allocation73_spill] sm:$0xff]  ;;  %v7702_v60 = vld [vmem:[#allocation75_spill] sm:$0xff]  ;;  %v7716_v14 = vld [vmem:[#allocation58_spill] sm:$0xff] }
 0x597   : > { %v3300_v20 = vmul.f32 %v7688_v37, %v7644_v55  ;;  %v7690_v7 = vunpack.c.h.bf16 %v6547_v21  ;;  %v7691_v1 = vunpack.c.l.bf16 %v6565_v50  ;;  %v7693_v57 = vunpack.c.l.bf16 %v7692_v15  ;;  %v7705_v0 = vld [vmem:[#allocation79_spill] sm:$0xff] }
 0x598   : > { %v3024_v35 = vadd.f32 %v4837_v6, %v3023_v61  ;;  %v3282_v25 = vmul.f32 %v7689_v26, %v7621_v58  ;;  %v3370_v5 = vadd.f32 %v3296_v17, %v3295_v45  ;;  %v7695_v21 = vunpack.c.l.bf16 %v7694_v27  ;;  %v7707_v61 = vld [vmem:[#allocation63_spill] sm:$0xff]  ;;  %v7711_v6 = vld [vmem:[#allocation52_spill] sm:$0xff]  ;;  %v7713_v45 = vld [vmem:[#allocation54_spill] sm:$0xff] }
 0x599   : > { %v3286_v32 = vmul.f32 %v7690_v7, %v7627_v4  ;;  %v3289_v51 = vmul.f32 %v7691_v1, %v7630_v34  ;;  %v3293_v36 = vmul.f32 %v7693_v57, %v7636_v13  ;;  %v3375_v58 = vadd.f32 %v3300_v20, %v3299_v62  ;;  %v7719_v7 = vld [vmem:[#allocation56_spill] sm:$0xff]  ;;  %v7723_v57 = vld [vmem:[#allocation62_spill] sm:$0xff] }
 0x59a   : > { %3025 = vadd.xlane.f32.xlu1 %v3024_v35  ;;  %3348 = vadd.xlane.f32.xlu0 %v3347_v38  ;;  %v3352_v55 = vadd.f32 %v3351_v44, %v3282_v25  ;;  %v3303_v4 = vmul.f32 %v7695_v21, %v7648_v47  ;;  %v3304_v34 = vmul.f32 %v7696_v2, %v7649_v16  ;;  %v7698_v22 = vunpack.c.l.bf16 %v7697_v49  ;;  %v7721_v1 = vld [vmem:[#allocation60_spill] sm:$0xff]  ;;  %v7070_v2 = vpop.xlane.xlu0 %3174 }
 0x59b   : > { %v3357_v11 = vadd.f32 %v3356_v18, %v3286_v32  ;;  %v3361_v48 = vadd.f32 %v3360_v54, %v3289_v51  ;;  %v3366_v10 = vadd.f32 %v3365_v24, %v3293_v36  ;;  %v7699_v46 = vunpack.c.h.bf16 %v7697_v49  ;;  %v7709_v54 = vld [vmem:[#allocation48_spill] sm:$0xff]  ;;  %v7724_v36 = vld [vmem:[#allocation81_spill] sm:$0xff] }
 0x59c   : > { %v3307_v13 = vmul.f32 %v7698_v22, %v7653_v63  ;;  %v7700_v33 = vunpack.c.h.bf16 %v6565_v50  ;;  %v7701_v56 = vunpack.c.h.bf16 %v7692_v15  ;;  %v7703_v19 = vunpack.c.l.bf16 %v7702_v60 }
 0x59d   : > { %v3308_v3 = vmul.f32 %v7699_v46, %v7654_v23  ;;  %v7704_v53 = vunpack.c.l.bf16 %v6627_v59  ;;  %v3380_v50 = vadd.f32 %v3304_v34, %v3303_v4  ;;  %v7706_v44 = vunpack.c.l.bf16 %v7705_v0  ;;  %v7072_v34 = vpop.xlane.xlu1 %3179 }
 0x59e   : > { %v3290_v52 = vmul.f32 %v7700_v33, %v7631_v43  ;;  %v3294_v47 = vmul.f32 %v7701_v56, %v7637_v12  ;;  %v3297_v16 = vmul.f32 %v7703_v19, %v7640_v29  ;;  %3353 = vadd.xlane.f32.xlu1 %v3352_v55  ;;  %3358 = vadd.xlane.f32.xlu0 %v3357_v11  ;;  %v7708_v18 = vunpack.c.h.bf16 %v7705_v0  ;;  %v7074_v49 = vpop.xlane.xlu0 %3184 }
 0x59f   : > { %v3301_v63 = vmul.f32 %v7704_v53, %v7645_v30  ;;  %v3385_v43 = vadd.f32 %v3308_v3, %v3307_v13  ;;  %v3311_v12 = vmul.f32 %v7706_v44, %v7658_v31  ;;  %v7710_v24 = vunpack.c.h.bf16 %v7702_v60  ;;  %v7717_v31 = vld [vmem:[#allocation80_spill] sm:$0xff] }
 0x5a0   : > { %v3362_v42 = vadd.f32 %v3361_v48, %v3290_v52  ;;  %v3367_v23 = vadd.f32 %v3366_v10, %v3294_v47  ;;  %v3371_v41 = vadd.f32 %v3370_v5, %v3297_v16  ;;  %v3312_v29 = vmul.f32 %v7708_v18, %v7707_v61 }
 0x5a1   : > { %v3376_v40 = vadd.f32 %v3375_v58, %v3301_v63  ;;  %v3298_v30 = vmul.f32 %v7710_v24, %v7709_v54  ;;  %v7712_v39 = vunpack.c.h.bf16 %v6627_v59  ;;  %v7715_v17 = vunpack.c.l.bf16 %v7714_v8  ;;  %v7726_v58 = vld [vmem:[#allocation64_spill] sm:$0xff]  ;;  %v7076_v22 = vpop.xlane.xlu1 %3189 }
 0x5a2   : > { %3363 = vadd.xlane.f32.xlu1 %v3362_v42  ;;  %3368 = vadd.xlane.f32.xlu0 %v3367_v23  ;;  %v7718_v62 = vunpack.c.l.bf16 %v7717_v31  ;;  %v3390_v25 = vadd.f32 %v3312_v29, %v3311_v12  ;;  %v7720_v32 = vunpack.c.h.bf16 %v7714_v8  ;;  %v7722_v51 = vunpack.c.h.bf16 %v7717_v31  ;;  %v7078_v13 = vpop.xlane.xlu0 %3194 }
 0x5a3   : > { %v3302_v28 = vmul.f32 %v7712_v39, %v7711_v6  ;;  %v3305_v9 = vmul.f32 %v7715_v17, %v7713_v45  ;;  %v3372_v20 = vadd.f32 %v3371_v41, %v3298_v30  ;;  %v7725_v55 = vunpack.c.l.bf16 %v7724_v36 }
 0x5a4   : > { %v3309_v37 = vmul.f32 %v7718_v62, %v7716_v14  ;;  %v3306_v59 = vmul.f32 %v7720_v32, %v7719_v7  ;;  %v3310_v15 = vmul.f32 %v7722_v51, %v7721_v1  ;;  %v7727_v27 = vunpack.c.h.bf16 %v7724_v36 }
 0x5a5   : > { %v3377_v35 = vadd.f32 %v3376_v40, %v3302_v28  ;;  %v3381_v38 = vadd.f32 %v3380_v50, %v3305_v9  ;;  %v3313_v11 = vmul.f32 %v7725_v55, %v7723_v57  ;;  %v7080_v46 = vpop.xlane.xlu1 %3199 }
 0x5a6   : > { %v3386_v26 = vadd.f32 %v3385_v43, %v3309_v37  ;;  %3373 = vadd.xlane.f32.xlu1 %v3372_v20  ;;  %v3314_v21 = vmul.f32 %v7727_v27, %v7726_v58  ;;  %v7091_v3 = vpop.xlane.xlu0 %3204 }
 0x5a7   : > { %3378 = vadd.xlane.f32.xlu0 %v3377_v35  ;;  %v3382_v48 = vadd.f32 %v3381_v38, %v3306_v59  ;;  %v3391_v5 = vadd.f32 %v3390_v25, %v3313_v11 }
 0x5a8   : > { %v3387_v10 = vadd.f32 %v3386_v26, %v3310_v15 }
 0x5a9   : > { %v3392_v4 = vadd.f32 %v3391_v5, %v3314_v21  ;;  %v7093_v33 = vpop.xlane.xlu1 %3209 }
 0x5aa   : > { %3383 = vadd.xlane.f32.xlu1 %v3382_v48 }
 0x5ab   : > { %3388 = vadd.xlane.f32.xlu0 %v3387_v10 }
 0x5ae   : > { %3393 = vadd.xlane.f32.xlu1 %v3392_v4 }
 0x5af   : > { %5083 = shalt.err (!%p5080_p8)
}
 0x5b0   : > { %s5084_s8 = scalar_lea.hbm %s7086_s6, 4096  ;;  %s5088_s7 = scalar_lea.hbm %s7728_s17, 8192 }
 0x5b1   : > { %p5085_p11 = scmp.ne.s32.totalorder %s7086_s6, %s5084_s8  ;;  %p5089_p1 = scmp.lt.u32.totalorder %s7086_s6, %s7728_s17 }
 0x5b2   : > { %p5090_p13 = scmp.lt.u32.totalorder %s5088_s7, %s5084_s8  ;;  %p5092_p7 = scmp.lt.u32.totalorder %s5084_s8, %s7086_s6 }
 0x5b3   : > { %p5086_p3 = pnand %p5085_p11, %p7729_p2 }
 0x5b4   : > { %p5091_p0 = por %p5090_p13, %p5089_p1 }
 0x5b5   : > { %p5087_p12 = pneg %p5086_p3 }
 0x5b6   : > { %p5093_p6 = por %p5092_p7, %p5091_p0 }
 0x5b8   : > { %p5094_p10 = pnand %p5093_p6, %p5087_p12 }
 0x5ba   : > { %5097 = shalt.err (!%p5094_p10)
}
 0x5bb   : > { %s5201_s23 = smov 256   ;;  %s5202_s20 = smov 16  }
 0x5bc   : > { %4368 = dma.vmem_to_hbm [thread:$0]  (%p7729_p2), %s7089_s26, 4096, %s7086_s6, %s3637_s14, %s5201_s23, %s5201_s23, %s5202_s20  }
 0x5bd   : > { %s4119_s27 = sshll.u32 %s5302_s19, 11  ;;  %s3681_s2 = sshll.u32 %s6472_s10, 4  ;;  %s7126_s2 = int_to_ptr.vmem [resolvable:$true] %s3681_s2 }
 0x5be   : > { %s7730_s4 = sld [smem:[#allocation100_spill]]  ;;  %s3647_s8 = scalar_lea.sflag [#allocation16], %s5568_s12 }
 0x5bf   : > { %s5098_s22 = scalar_lea.vmem %s7126_s2, 2048  ;;  %s5203_s11 = smov [#allocation15]  }
 0x5c0   : > { %p5099_p5 = scmp.ne.s32.totalorder %s7126_s2, %s5098_s22  ;;  %s5102_s6 = sshll.u32 %s5203_s11, 4  ;;  %s5103_s6 = int_to_ptr.vmem [resolvable:$false] %s5102_s6 }
 0x5c1   : > { %s5104_s10 = scalar_lea.vmem %s5103_s6, 4096  ;;  %p5105_p8 = scmp.lt.s32.totalorder %s7126_s2, %s5103_s6 }
 0x5c2   : > { %p5100_p9 = pnand %p5099_p5, %p7729_p2  ;;  %p5106_p11 = scmp.lt.s32.totalorder %s5104_s10, %s5098_s22 }
 0x5c4   : > { %s7124_s25 = scalar_lea.hbm %s7730_s4, %s4119_s27  ;;  %p5101_p4 = pneg %p5100_p9 }
 0x5c5   : > { %p5107_p3 = por %p5106_p11, %p5105_p8 }
 0x5c7   : > { %p5108_p12 = pnand %p5107_p3, %p5101_p4 }
 0x5c9   : > { %5111 = shalt.err (!%p5108_p12)
}
 0x5ca   : > { %s5112_s26 = scalar_lea.hbm %s7124_s25, 2048  ;;  %s5116_s0 = scalar_lea.hbm %s7730_s4, 4096 }
 0x5cb   : > { %p5113_p1 = scmp.ne.s32.totalorder %s7124_s25, %s5112_s26  ;;  %p5117_p7 = scmp.lt.u32.totalorder %s7124_s25, %s7730_s4 }
 0x5cc   : > { %p5118_p6 = scmp.lt.u32.totalorder %s5116_s0, %s5112_s26  ;;  %p5120_p5 = scmp.lt.u32.totalorder %s5112_s26, %s7124_s25 }
 0x5cd   : > { %p5114_p13 = pnand %p5113_p1, %p7729_p2 }
 0x5ce   : > { %p5119_p10 = por %p5118_p6, %p5117_p7 }
 0x5cf   : > { %p5115_p0 = pneg %p5114_p13 }
 0x5d0   : > { %p5121_p9 = por %p5120_p5, %p5119_p10 }
 0x5d2   : > { %p5122_p4 = pnand %p5121_p9, %p5115_p0 }
 0x5d4   : > { %5125 = shalt.err (!%p5122_p4)
}
 0x5d5   : > { %s5204_s20 = smov 128   ;;  %s5205_s27 = smov 8   ;;  %v7152_v52 = vpop.xlane.xlu0 %3214  ;;  %v7154_v56 = vpop.xlane.xlu1 %3219  ;;  %v7731_v30 = vld [vmem:[#allocation82_spill] sm:$0xff]  ;;  %v7732_v39 = vld [vmem:[#allocation83_spill] sm:$0xff]  ;;  %vm3427_vm0 = vcmask 7168   ;;  %v7734_v38 = vld [vmem:[#allocation84_spill] sm:$0xff] }
 0x5d6   : > { %4369 = dma.vmem_to_hbm [thread:$0]  (%p7729_p2), %s7126_s2, 2048, %s7124_s25, %s3647_s8, %s5204_s20, %s5204_s20, %s5205_s27   ;;  %v7735_v25 = vld [vmem:[#allocation85_spill] sm:$0xff]  ;;  %v7736_v11 = vld [vmem:[#allocation86_spill] sm:$0xff]  ;;  %v7737_v10 = vld [vmem:[#allocation87_spill] sm:$0xff] }
 0x5d7   : > { %s3907_s28 = sshll.u32 %s5302_s19, 4  ;;  %s7733_s18 = sld [smem:[#allocation99_spill]] }
 0x5d8   : > { %p622_p2 = scmp.lt.s32.totalorder %s3907_s28, 31 }
 0x5d9   : > { %v7156_v47 = vpop.xlane.xlu0 %3224  ;;  %v7158_v60 = vpop.xlane.xlu1 %3229 }
 0x5da   : > { %s7756_s28 = smov (!%p622_p2, %s3907_s28), 31 }
 0x5db   : > { %s3908_s12 = sshll.u32 %s7756_s28, 3 }
 0x5dd   : > { %v7160_v19 = vpop.xlane.xlu0 %3234  ;;  %v7162_v16 = vpop.xlane.xlu1 %3239  ;;  %s7175_s24 = scalar_lea.vmem %s7733_s18, %s3908_s12 }
 0x5e1   : > { %v7164_v53 = vpop.xlane.xlu0 %3244  ;;  %v7166_v63 = vpop.xlane.xlu1 %3249 }
 0x5e5   : > { %v3319_v42 = vpop.xlane.xlu0 %3318  ;;  %v3324_v23 = vpop.xlane.xlu1 %3323 }
 0x5e9   : > { %v3329_v41 = vpop.xlane.xlu0 %3328  ;;  %v3334_v40 = vpop.xlane.xlu1 %3333 }
 0x5ed   : > { %v3339_v50 = vpop.xlane.xlu0 %3338  ;;  %v3344_v43 = vpop.xlane.xlu1 %3343 }
 0x5f1   : > { %v2951_v0 = vpop.xlane.xlu0 %2950  ;;  %v2956_v44 = vpop.xlane.xlu1 %2955 }
 0x5f2   : > { %4838 = vlog2.f32 %v2951_v0 }
 0x5f3   : > { %4840 = vlog2.f32 %v2956_v44 }
 0x5f7   : > { %v2961_v12 = vpop.xlane.xlu0 %2960  ;;  %v2966_v61 = vpop.xlane.xlu1 %2965 }
 0x5f8   : > { %4842 = vlog2.f32 %v2961_v12 }
 0x5f9   : > { %4844 = vlog2.f32 %v2966_v61  ;;  %v7738_v61 = vld [vmem:[#allocation88_spill] sm:$0xff] }
 0x5fc   : > { %v4839_v18 = vpop.eup %4838 }
 0x5fd   : > { %v4841_v29 = vpop.eup %4840  ;;  %v3028_v54 = vmul.f32 0.6931472, %v4839_v18 }
 0x5fe   : > { %v3030_v24 = vmul.f32 0.6931472, %v4841_v29  ;;  %v2971_v8 = vpop.xlane.xlu0 %2970 }
 0x5ff   : > { %v3059_v6 = vadd.f32 %v3028_v54, %v7731_v30  ;;  %4846 = vlog2.f32 %v2971_v8  ;;  %v2976_v9 = vpop.xlane.xlu1 %2975  ;;  %v7739_v30 = vld [vmem:[#allocation25_spill] sm:$0xff]  ;;  %v7740_v8 = vld [vmem:[#allocation27_spill] sm:$0xff] }
 0x600   : > { %v3060_v28 = vadd.f32 %v3030_v24, %v7732_v39  ;;  %4848 = vlog2.f32 %v2976_v9 }
 0x601   : > { %v3395_v45 = vmul.f32 %v7070_v2, %v3059_v6 }
 0x602   : > { %v3396_v17 = vmul.f32 %v7072_v34, %v3060_v28  ;;  %v4843_v62 = vpop.eup %4842 }
 0x603   : > { %v3411_v14 = vsub.f32 %v3395_v45, %v3319_v42  ;;  %v4845_v37 = vpop.eup %4844  ;;  %v3032_v20 = vmul.f32 0.6931472, %v4843_v62 }
 0x604   : > { %v3412_v31 = vsub.f32 %v3396_v17, %v3324_v23  ;;  %v3034_v35 = vmul.f32 0.6931472, %v4845_v37 }
 0x605   : > { %3428 = vst.msk [vmem:[%s7175_s24] sm:$0xff] %vm3427_vm0, %v3411_v14  ;;  %v3061_v26 = vadd.f32 %v3032_v20, %v7734_v38  ;;  %v7741_v20 = vld [vmem:[#allocation26_spill] sm:$0xff] }
 0x606   : > { %3429 = vst.msk [vmem:[%s7175_s24 + $0x8] sm:$0xff] %vm3427_vm0, %v3412_v31  ;;  %v3062_v7 = vadd.f32 %v3034_v35, %v7735_v25 }
 0x607   : > { %v3397_v32 = vmul.f32 %v7074_v49, %v3061_v26  ;;  %v2981_v58 = vpop.xlane.xlu0 %2980  ;;  %v2986_v2 = vpop.xlane.xlu1 %2985 }
 0x608   : > { %v3398_v59 = vmul.f32 %v7076_v22, %v3062_v7  ;;  %4850 = vlog2.f32 %v2981_v58 }
 0x609   : > { %v4847_v1 = vpop.eup %4846  ;;  %v3413_v51 = vsub.f32 %v3397_v32, %v3329_v41  ;;  %4852 = vlog2.f32 %v2986_v2 }
 0x60a   : > { %v4849_v15 = vpop.eup %4848  ;;  %v3414_v57 = vsub.f32 %v3398_v59, %v3334_v40  ;;  %v3036_v36 = vmul.f32 0.6931472, %v4847_v1 }
 0x60b   : > { %3430 = vst.msk [vmem:[%s7175_s24 + $0x10] sm:$0xff] %vm3427_vm0, %v3413_v51  ;;  %v3038_v55 = vmul.f32 0.6931472, %v4849_v15 }
 0x60c   : > { %3431 = vst.msk [vmem:[%s7175_s24 + $0x18] sm:$0xff] %vm3427_vm0, %v3414_v57  ;;  %v3063_v48 = vadd.f32 %v3036_v36, %v7736_v11 }
 0x60d   : > { %v3064_v5 = vadd.f32 %v3038_v55, %v7737_v10 }
 0x60e   : > { %v3399_v27 = vmul.f32 %v7078_v13, %v3063_v48  ;;  %v2991_v49 = vpop.xlane.xlu0 %2990  ;;  %v7744_v48 = vld [vmem:[#allocation31_spill] sm:$0xff] }
 0x60f   : > { %v3400_v21 = vmul.f32 %v7080_v46, %v3064_v5  ;;  %4854 = vlog2.f32 %v2991_v49  ;;  %v2996_v22 = vpop.xlane.xlu1 %2995 }
 0x610   : > { %v3415_v4 = vsub.f32 %v3399_v27, %v3339_v50  ;;  %4856 = vlog2.f32 %v2996_v22  ;;  %v7746_v22 = vld [vmem:[#allocation32_spill] sm:$0xff] }
 0x611   : > { %v3416_v34 = vsub.f32 %v3400_v21, %v3344_v43 }
 0x612   : > { %3432 = vst.msk [vmem:[%s7175_s24 + $0x20] sm:$0xff] %vm3427_vm0, %v3415_v4  ;;  %v4851_v41 = vpop.eup %4850 }
 0x613   : > { %3433 = vst.msk [vmem:[%s7175_s24 + $0x28] sm:$0xff] %vm3427_vm0, %v3416_v34  ;;  %v4853_v46 = vpop.eup %4852  ;;  %v3040_v40 = vmul.f32 0.6931472, %v4851_v41  ;;  %v7745_v34 = vld [vmem:[#allocation30_spill] sm:$0xff] }
 0x614   : > { %v3042_v0 = vmul.f32 0.6931472, %v4853_v46 }
 0x615   : > { %v3065_v18 = vadd.f32 %v3040_v40, %v7738_v61 }
 0x616   : > { %v3066_v6 = vadd.f32 %v3042_v0, %v7739_v30 }
 0x617   : > { %v3001_v42 = vpop.xlane.xlu0 %3000  ;;  %v3401_v45 = vmul.f32 %v7091_v3, %v3065_v18  ;;  %v7742_v3 = vld [vmem:[#allocation28_spill] sm:$0xff] }
 0x618   : > { %4858 = vlog2.f32 %v3001_v42  ;;  %v3006_v23 = vpop.xlane.xlu1 %3005  ;;  %v3402_v37 = vmul.f32 %v7093_v33, %v3066_v6 }
 0x619   : > { %4860 = vlog2.f32 %v3006_v23  ;;  %v4855_v50 = vpop.eup %4854 }
 0x61a   : > { %v4857_v44 = vpop.eup %4856  ;;  %v3044_v12 = vmul.f32 0.6931472, %v4855_v50  ;;  %v7747_v50 = vld [vmem:[#allocation33_spill] sm:$0xff] }
 0x61b   : > { %v3011_v13 = vpop.xlane.xlu0 %3010  ;;  %v3046_v24 = vmul.f32 0.6931472, %v4857_v44 }
 0x61c   : > { %4862 = vlog2.f32 %v3011_v13  ;;  %v3067_v17 = vadd.f32 %v3044_v12, %v7740_v8 }
 0x61d   : > { %v3068_v35 = vadd.f32 %v3046_v24, %v7741_v20 }
 0x61e   : > { %v3016_v43 = vpop.xlane.xlu1 %3015  ;;  %v3403_v25 = vmul.f32 %v7152_v52, %v3067_v17  ;;  %v7743_v52 = vld [vmem:[#allocation29_spill] sm:$0xff] }
 0x61f   : > { %4864 = vlog2.f32 %v3016_v43  ;;  %v3404_v33 = vmul.f32 %v7154_v56, %v3068_v35 }
 0x622   : > { %v4859_v29 = vpop.eup %4858 }
 0x623   : > { %v3021_v54 = vpop.xlane.xlu0 %3020  ;;  %v4861_v39 = vpop.eup %4860  ;;  %v3048_v28 = vmul.f32 0.6931472, %v4859_v29 }
 0x624   : > { %4866 = vlog2.f32 %v3021_v54  ;;  %v3050_v38 = vmul.f32 0.6931472, %v4861_v39 }
 0x625   : > { %v3069_v7 = vadd.f32 %v3048_v28, %v7742_v3 }
 0x626   : > { %v4863_v9 = vpop.eup %4862  ;;  %v3070_v11 = vadd.f32 %v3050_v38, %v7743_v52 }
 0x627   : > { %v3026_v14 = vpop.xlane.xlu1 %3025  ;;  %v3349_v31 = vpop.xlane.xlu0 %3348  ;;  %v3052_v26 = vmul.f32 0.6931472, %v4863_v9  ;;  %v3405_v55 = vmul.f32 %v7156_v47, %v3069_v7 }
 0x628   : > { %4868 = vlog2.f32 %v3026_v14  ;;  %v3417_v62 = vsub.f32 %v3401_v45, %v3349_v31  ;;  %v3406_v2 = vmul.f32 %v7158_v60, %v3070_v11 }
 0x629   : > { %v4865_v32 = vpop.eup %4864  ;;  %v3071_v10 = vadd.f32 %v3052_v26, %v7744_v48 }
 0x62a   : > { %3434 = vst.msk [vmem:[%s7175_s24 + $0x30] sm:$0xff] %vm3427_vm0, %v3417_v62  ;;  %v3054_v36 = vmul.f32 0.6931472, %v4865_v32 }
 0x62b   : > { %v3354_v59 = vpop.xlane.xlu1 %3353  ;;  %v3359_v1 = vpop.xlane.xlu0 %3358  ;;  %v3407_v47 = vmul.f32 %v7160_v19, %v3071_v10 }
 0x62c   : > { %v3418_v51 = vsub.f32 %v3402_v37, %v3354_v59  ;;  %v3419_v15 = vsub.f32 %v3403_v25, %v3359_v1  ;;  %v3072_v49 = vadd.f32 %v3054_v36, %v7745_v34 }
 0x62e   : > { %v4867_v57 = vpop.eup %4866  ;;  %3435 = vst.msk [vmem:[%s7175_s24 + $0x38] sm:$0xff] %vm3427_vm0, %v3418_v51  ;;  %3436 = vst.msk [vmem:[%s7175_s24 + $0x40] sm:$0xff] %vm3427_vm0, %v3419_v15  ;;  %v3408_v60 = vmul.f32 %v7162_v16, %v3072_v49 }
 0x62f   : > { %v3056_v5 = vmul.f32 0.6931472, %v4867_v57  ;;  %v3364_v58 = vpop.xlane.xlu1 %3363  ;;  %v3369_v27 = vpop.xlane.xlu0 %3368 }
 0x630   : > { %v3420_v21 = vsub.f32 %v3404_v33, %v3364_v58  ;;  %v3421_v4 = vsub.f32 %v3405_v55, %v3369_v27 }
 0x631   : > { %v3073_v42 = vadd.f32 %v3056_v5, %v7746_v22 }
 0x632   : > { %v4869_v56 = vpop.eup %4868  ;;  %3437 = vst.msk [vmem:[%s7175_s24 + $0x48] sm:$0xff] %vm3427_vm0, %v3420_v21  ;;  %3438 = vst.msk [vmem:[%s7175_s24 + $0x50] sm:$0xff] %vm3427_vm0, %v3421_v4 }
 0x633   : > { %v3058_v23 = vmul.f32 0.6931472, %v4869_v56  ;;  %v3374_v41 = vpop.xlane.xlu1 %3373  ;;  %v3409_v19 = vmul.f32 %v7164_v53, %v3073_v42 }
 0x634   : > { %v3379_v13 = vpop.xlane.xlu0 %3378  ;;  %v3422_v46 = vsub.f32 %v3406_v2, %v3374_v41 }
 0x635   : > { %v3423_v40 = vsub.f32 %v3407_v47, %v3379_v13  ;;  %v3074_v43 = vadd.f32 %v3058_v23, %v7747_v50 }
 0x636   : > { %3439 = vst.msk [vmem:[%s7175_s24 + $0x58] sm:$0xff] %vm3427_vm0, %v3422_v46 }
 0x637   : > { %3440 = vst.msk [vmem:[%s7175_s24 + $0x60] sm:$0xff] %vm3427_vm0, %v3423_v40  ;;  %v3384_v0 = vpop.xlane.xlu1 %3383  ;;  %v3410_v18 = vmul.f32 %v7166_v63, %v3074_v43 }
 0x638   : > { %v3389_v44 = vpop.xlane.xlu0 %3388  ;;  %v3424_v12 = vsub.f32 %v3408_v60, %v3384_v0 }
 0x639   : > { %v3425_v61 = vsub.f32 %v3409_v19, %v3389_v44 }
 0x63a   : > { %3441 = vst.msk [vmem:[%s7175_s24 + $0x68] sm:$0xff] %vm3427_vm0, %v3424_v12 }
 0x63b   : > { %3442 = vst.msk [vmem:[%s7175_s24 + $0x70] sm:$0xff] %vm3427_vm0, %v3425_v61  ;;  %v3394_v29 = vpop.xlane.xlu1 %3393 }
 0x63c   : > { %v3426_v54 = vsub.f32 %v3410_v18, %v3394_v29 }
 0x63e   : > { %3443 = vst.msk [vmem:[%s7175_s24 + $0x78] sm:$0xff] %vm3427_vm0, %v3426_v54 }
 0x63f PF: > { %s3696_s25 = sand.u32 1, %s5172_s29   ;;  %p7748_p8 = scmp.ne.s32.totalorder %s7451_s13, 0 }
 0x640   : > { %p7749_p11 = scmp.ge.s32.totalorder %s5184_s16, 2  ;;  %s3697_s8 = scalar_lea.sflag [#allocation4], %s3696_s25 }
 0x642   : > { %p4396_p3 = pnand %p7749_p11, %p7748_p8 }
 0x644   : > { %5163 = dma.done.wait (!%p4396_p3), %s3697_s8, 4096  }
 0x645   : > { %5165 = vsyncadd (!%p4396_p3), %s3697_s8, 4294963200  ;;  %s3714_s22 = scalar_lea.sflag [#allocation16], %s3696_s25 }
 0x646   : > { %5167 = dma.done.wait (!%p4396_p3), %s3714_s22, 2048  }
 0x647   : > { %5169 = vsyncadd (!%p4396_p3), %s3714_s22, 4294965248  ;;  %s7750_s11 = sld [smem:[#allocation24_spill]]  ;;  %p36_p12 = scmp.ge.s32.totalorder %s5451_s21, 4  }
 0x648   : > { %s7751_s29 = smov %s5176_s30  ;;  %s7752_s30 = smov %s5180_s15 }
 0x649   : > { %s7754_s16 = smov %s5451_s21  ;;  %38 = sbr.rel (!%p36_p12) target bundleno = 24 (0x18), region = 175 }
 0x64d   : > { %s7753_s15 = smov %s7750_s11 }
 0x650   :  { %3719 = vsyncpa [#allocation3], 1 }
 0x651   :  { %3721 = vsyncpa [#allocation3 + $0x1], 1 }
 0x652   :  { %3722 = vsyncpa [#allocation6], 1 }
 0x653   :  { %3724 = vsyncpa [#allocation6 + $0x1], 1 }
 0x654   :  { %3725 = vsyncpa [#allocation9], 1 }
 0x655   :  { %3726 = vsyncpa [#allocation12], 1 }
 0x656   :  { %3727 = vsyncpa [#allocation4], 1 }
 0x657   :  { %3729 = vsyncpa [#allocation4 + $0x1], 1 }
 0x658   :  { %3730 = vsyncpa [#allocation16], 1 }
 0x659   :  { %3732 = vsyncpa [#allocation16 + $0x1], 1 }

</bundles_post_ra>
